<compile_context>
chip_gen: v7x
topology: tpu7x:2x2x1
jax: 0.10.0
libtpu: 0.0.40
codegen_flags: <defaults>
</compile_context>

<pallas_src>
import functools
import math

import jax
import jax.numpy as jnp
from jax.experimental import pallas as pl
from jax.experimental.pallas import tpu as pltpu

_NEG_LARGE = float(jnp.finfo(jnp.float32).min)


# -----------------------------------------------------------------------------
# Fused ASP kernel
# -----------------------------------------------------------------------------
def _asp_kernel(x_ref, w1_ref, b1_ref, w2_ref, mu_ref, sg_ref, state_ref,
                *, t_valid, masked):
    """One (batch, time-tile) grid step.

    x_ref    : (1, D, tT) bf16  activation tile (torch NCL layout, time on lanes)
    w1_ref   : (128, D)   bf16  Conv1d(D->128, k=1) weight
    b1_ref   : (128, 1)   f32   conv1 bias
    w2_ref   : (D, 128)   bf16  Conv1d(128->D, k=1) weight with BN scale folded in
    mu_ref/sg_ref : (1, D, 1) f32 outputs (written on the last time tile)
    state_ref: (D, 4) f32 online-softmax state, columns = [m, l, sum(x*p), sum(x^2*p)]
    """
    t_i = pl.program_id(1)
    tt = x_ref.shape[2]

    @pl.when(t_i == 0)
    def _():
        col = jax.lax.broadcasted_iota(jnp.int32, state_ref.shape, 1)
        # column 0 (running max) starts at finfo.min so alpha = exp(min - m_new)
        # underflows to exactly 0 on the first step; columns 1..3 start at 0.
        state_ref[...] = jnp.where(col == 0, _NEG_LARGE, 0.0)

    x = x_ref[0]                                           # (D, tT) bf16

    # ---- attention MLP: conv1(k=1) -> ReLU -> [BN folded into w2] -> conv2(k=1) ----
    h = jnp.dot(w1_ref[...], x, preferred_element_type=jnp.float32)   # (128, tT)
    h = jnp.maximum(h + b1_ref[...], 0.0)
    logits = jnp.dot(w2_ref[...], h.astype(jnp.bfloat16),
                     preferred_element_type=jnp.float32)              # (D, tT)
    # (conv2 bias and BN shift are time-constant per channel -> cancel in softmax_t)

    if masked:  # static: only compiled in when T % tT != 0
        lane = jax.lax.broadcasted_iota(jnp.int32, (1, tt), 1)
        neg = jnp.where(t_i * tt + lane < t_valid, 0.0, _NEG_LARGE)   # (1, tT)
        logits = logits + neg        # padded lanes -> ~finfo.min, exp underflows to 0

    # ---- online softmax over time + attentive statistics accumulation ----
    st = state_ref[...]                                    # (D, 4)
    m_prev = st[:, 0:1]
    m_new = jnp.maximum(m_prev, jnp.max(logits, axis=1, keepdims=True))
    alpha = jnp.exp(m_prev - m_new)                        # rescale of old state
    p = jnp.exp(logits - m_new)                            # masked lanes == exactly 0
    xf = x.astype(jnp.float32)
    xp = xf * p
    state_ref[:, 0:1] = m_new
    state_ref[:, 1:2] = alpha * st[:, 1:2] + jnp.sum(p, axis=1, keepdims=True)
    state_ref[:, 2:3] = alpha * st[:, 2:3] + jnp.sum(xp, axis=1, keepdims=True)
    state_ref[:, 3:4] = alpha * st[:, 3:4] + jnp.sum(xf * xp, axis=1, keepdims=True)

    @pl.when(t_i == pl.num_programs(1) - 1)
    def _():
        stf = state_ref[...]
        inv_l = pl.reciprocal(stf[:, 1:2], approx=True)
        mu = stf[:, 2:3] * inv_l
        ex2 = stf[:, 3:4] * inv_l
        mu_ref[0] = mu
        sg_ref[0] = jnp.sqrt(jnp.maximum(ex2 - mu * mu, 1e-5))


# -----------------------------------------------------------------------------
# Wrapper
# -----------------------------------------------------------------------------
def asp_forward(x, params, *, t_tile=256):
    """x: (B, ..., T) -> (B, 2*D), D = prod(middle dims).  Matches torch ASP (eval BN)."""
    B = x.shape[0]
    T = x.shape[-1]
    x = x.reshape(B, -1, T)                                # torch: x.reshape(B, -1, T)
    D = x.shape[1]
    # Stream x in bf16 (dominant HBM traffic); cast fuses with the pad under jit.
    x = x.astype(jnp.bfloat16)

    if T > t_tile:
        assert t_tile % 128 == 0, "t_tile must be a multiple of 128 when tiling T"
        pad = (-T) % t_tile
        if pad:
            x = jnp.pad(x, ((0, 0), (0, 0), (0, pad)))
        tt = t_tile
        masked = pad > 0                                   # statically specialize
    else:
        tt = T                                             # single full-extent tile
        masked = False
    n_t = x.shape[2] // tt

    kernel = functools.partial(_asp_kernel, t_valid=T, masked=masked)

    # Generation-aware-ish VMEM budget (capped at 48 MiB so v7x's 64 MiB is safe;
    # on v5e/v6e this could be raised for larger t_tile).
    vmem_est = (
        2 * D * tt * 2            # double-buffered bf16 x tile
        + 2 * 2 * (128 * D) * 2   # double-buffered bf16 w1 + w2
        + 2 * 128 * 128 * 4       # b1 block (lane padded)
        + D * 512                 # (D,4) f32 state (lane padded to 128)
        + 6 * D * tt * 4          # f32 intermediates headroom (h/logits/p/...)
    )
    vmem_limit = int(min(max(2 * vmem_est, 32 * 1024 * 1024), 48 * 1024 * 1024))

    mu, sg = pl.pallas_call(
        kernel,
        out_shape=(jax.ShapeDtypeStruct((B, D, 1), jnp.float32),
                   jax.ShapeDtypeStruct((B, D, 1), jnp.float32)),
        grid_spec=pltpu.PrefetchScalarGridSpec(
            num_scalar_prefetch=0,
            grid=(B, n_t),
            in_specs=[
                pl.BlockSpec((1, D, tt), lambda b, t: (b, 0, t)),   # x tile (bf16)
                pl.BlockSpec((128, D), lambda b, t: (0, 0)),        # w1 (resident)
                pl.BlockSpec((128, 1), lambda b, t: (0, 0)),        # b1
                pl.BlockSpec((D, 128), lambda b, t: (0, 0)),        # w2*bn_scale (resident)
            ],
            out_specs=(pl.BlockSpec((1, D, 1), lambda b, t: (b, 0, 0)),
                       pl.BlockSpec((1, D, 1), lambda b, t: (b, 0, 0))),
            scratch_shapes=[pltpu.VMEM((D, 4), jnp.float32)],
        ),
        compiler_params=pltpu.CompilerParams(
            dimension_semantics=("parallel", "arbitrary"),
            vmem_limit_bytes=vmem_limit,
        ),
    )(x, params["w1"], params["b1"], params["w2"])

    # torch.cat((mu, sg), dim=1) -> (B, 2D); tiny, done by XLA.
    return jnp.concatenate([mu[..., 0], sg[..., 0]], axis=1)


# -----------------------------------------------------------------------------
# Parameter init (eval-mode BN folded; b2 / BN shift dropped — softmax invariant)
# -----------------------------------------------------------------------------
def init_asp_params(key, in_planes, acoustic_dim):
    outmap = acoustic_dim // 8
    D = in_planes * 8 * outmap
    k = jax.random.split(key, 8)
    w1 = jax.random.normal(k[0], (128, D), jnp.float32) / math.sqrt(D)
    b1 = 0.1 * jax.random.normal(k[1], (128,), jnp.float32)
    gamma = 1.0 + 0.1 * jax.random.normal(k[2], (128,), jnp.float32)
    beta = 0.1 * jax.random.normal(k[3], (128,), jnp.float32)
    rmean = 0.1 * jax.random.normal(k[4], (128,), jnp.float32)
    rvar = 1.0 + 0.1 * jax.random.uniform(k[5], (128,), jnp.float32)
    bn_s = gamma / jnp.sqrt(rvar + 1e-5)
    bn_t = beta - rmean * bn_s
    w2 = jax.random.normal(k[6], (D, 128), jnp.float32) / math.sqrt(128)
    b2 = 0.1 * jax.random.normal(k[7], (D,), jnp.float32)

    params = {
        "w1": w1.astype(jnp.bfloat16),                    # MXU operand (bf16)
        "b1": b1.reshape(128, 1),                         # f32 epilogue param
        # BN scale folded into conv2 weight; b2 and w2@bn_t cancel under softmax_t.
        "w2": (w2 * bn_s[None, :]).astype(jnp.bfloat16),
    }
    ref = {"w1": w1, "b1": b1, "bn_s": bn_s, "bn_t": bn_t, "w2": w2, "b2": b2}
    return params, ref


# -----------------------------------------------------------------------------
# Pure-JAX reference of the torch module (eval BN), with the same bf16 rounding
# of MXU operands / x stream as the kernel.  b2 and the BN shift are KEPT here —
# they cancel under softmax, which also validates dropping them in the kernel.
# -----------------------------------------------------------------------------
def asp_reference(x, ref):
    B, T = x.shape[0], x.shape[-1]
    x = x.reshape(B, -1, T).astype(jnp.float32)
    xb = x.astype(jnp.bfloat16).astype(jnp.float32)       # kernel streams x as bf16
    w1 = ref["w1"].astype(jnp.bfloat16).astype(jnp.float32)
    w2 = ref["w2"].astype(jnp.bfloat16).astype(jnp.float32)
    h = jnp.einsum("od,bdt->bot", w1, xb) + ref["b1"][None, :, None]
    h = jnp.maximum(h, 0.0)
    h = h * ref["bn_s"][None, :, None] + ref["bn_t"][None, :, None]
    hb = h.astype(jnp.bfloat16).astype(jnp.float32)
    logits = jnp.einsum("do,bot->bdt", w2, hb) + ref["b2"][None, :, None]
    w = jax.nn.softmax(logits, axis=2)
    mu = jnp.sum(xb * w, axis=2)
    sg = jnp.sqrt(jnp.maximum(jnp.sum(xb * xb * w, axis=2) - mu * mu, 1e-5))
    return jnp.concatenate([mu, sg], axis=1)


# -----------------------------------------------------------------------------
if __name__ == "__main__":
    in_planes, acoustic_dim = 4, 64          # D = 4 * 8 * (64 // 8) = 256
    B, T = 2, 300                            # exercises multi-tile + tail masking
    key = jax.random.PRNGKey(0)
    pkey, xkey = jax.random.split(key)
    params, ref_params = init_asp_params(pkey, in_planes, acoustic_dim)

    # Input as the torch module receives it (any (B, ..., T); forward flattens
    # the middle dims exactly like x.reshape(B, -1, T)).
    x = jax.random.normal(
        xkey, (B, in_planes * 8, acoustic_dim // 8, T), jnp.float32)

    D = in_planes * 8 * (acoustic_dim // 8)
    fwd = jax.jit(functools.partial(asp_forward, t_tile=256))

    # Multi-tile path (T=300 -> 2 tiles of 256, tail masked).
    out = fwd(x, params)
    jax.block_until_ready(out)
    assert out.shape == (B, 2 * D) and out.dtype == jnp.float32
    expected = asp_reference(x, ref_params)
    max_err = float(jnp.max(jnp.abs(out - expected)))
    assert jnp.allclose(out, expected, rtol=2e-2, atol=2e-2), f"max err {max_err}"

    # Single full-extent tile path (no pad / no mask specialization).
    x2 = x[..., :192]
    out2 = fwd(x2, params)
    jax.block_until_ready(out2)
    expected2 = asp_reference(x2, ref_params)
    max_err2 = float(jnp.max(jnp.abs(out2 - expected2)))
    assert jnp.allclose(out2, expected2, rtol=2e-2, atol=2e-2), f"max err {max_err2}"

    print("KERNEL_OK")
</pallas_src>

<mosaic_0001>
module attributes {stable_mosaic.version = 11 : i64} {
  func.func @_asp_kernel(%arg0: i32, %arg1: i32, %arg2: memref<1x256x256xbf16, #tpu.memory_space<vmem>>, %arg3: memref<128x256xbf16, #tpu.memory_space<vmem>>, %arg4: memref<128x1xf32, #tpu.memory_space<vmem>>, %arg5: memref<256x128xbf16, #tpu.memory_space<vmem>>, %arg6: memref<1x256x1xf32, #tpu.memory_space<vmem>>, %arg7: memref<1x256x1xf32, #tpu.memory_space<vmem>>, %arg8: memref<256x4xf32, #tpu.memory_space<vmem>>) attributes {dimension_semantics = [#tpu.dimension_semantics<parallel>, #tpu.dimension_semantics<arbitrary>], iteration_bounds = array<i64: 2, 2>, scalar_prefetch = 0 : i64, scratch_operands = 1 : i64, tpu.core_type = #tpu.core_type<tc>, window_params = [{transform_indices = @transform_0, window_bounds = array<i64: 1, 256, 256>}, {pipeline_mode = #tpu.pipeline_mode<synchronous>, transform_indices = @transform_1, window_bounds = array<i64: 128, 256>}, {pipeline_mode = #tpu.pipeline_mode<synchronous>, transform_indices = @transform_2, window_bounds = array<i64: 128, 1>}, {pipeline_mode = #tpu.pipeline_mode<synchronous>, transform_indices = @transform_3, window_bounds = array<i64: 256, 128>}, {transform_indices = @transform_4, window_bounds = array<i64: 1, 256, 1>}, {transform_indices = @transform_5, window_bounds = array<i64: 1, 256, 1>}]} {
    %c0_i32 = arith.constant 0 : i32
    %0 = arith.cmpi eq, %arg1, %c0_i32 : i32
    %1 = arith.extui %0 : i1 to i32
    %c0_i32_0 = arith.constant 0 : i32
    %2 = arith.cmpi ne, %1, %c0_i32_0 : i32
    scf.if %2 {
      %61 = tpu.iota {dimensions = array<i32: 1>} : vector<256x4xi32>
      %c0_i32_25 = arith.constant 0 : i32
      %62 = vector.broadcast %c0_i32_25 : i32 to vector<256x4xi32>
      %63 = arith.cmpi eq, %61, %62 : vector<256x4xi32>
      %cst_26 = arith.constant -3.40282347E+38 : f32
      %cst_27 = arith.constant 0.000000e+00 : f32
      %64 = vector.broadcast %cst_26 : f32 to vector<256x4xf32>
      %65 = vector.broadcast %cst_27 : f32 to vector<256x4xf32>
      %66 = arith.select %63, %64, %65 : vector<256x4xi1>, vector<256x4xf32>
      %c0_28 = arith.constant 0 : index
      %c0_29 = arith.constant 0 : index
      %67 = vector.load %arg8[%c0_28, %c0_29] : memref<256x4xf32, #tpu.memory_space<vmem>>, vector<256x4xf32>
      tpu.vector_store %arg8[%c0_28, %c0_29], %66 {strides = array<i32>} : memref<256x4xf32, #tpu.memory_space<vmem>>, vector<256x4xf32>,
    } else {
    }
    %c0 = arith.constant 0 : index
    %c0_1 = arith.constant 0 : index
    %c0_2 = arith.constant 0 : index
    %3 = vector.load %arg2[%c0, %c0_1, %c0_2] : memref<1x256x256xbf16, #tpu.memory_space<vmem>>, vector<1x256x256xbf16>
    %4 = vector.shape_cast %3 : vector<1x256x256xbf16> to vector<256x256xbf16>
    %c0_3 = arith.constant 0 : index
    %c0_4 = arith.constant 0 : index
    %5 = vector.load %arg3[%c0_3, %c0_4] : memref<128x256xbf16, #tpu.memory_space<vmem>>, vector<128x256xbf16>
    %cst = arith.constant dense<0.000000e+00> : vector<128x256xf32>
    %6 = tpu.matmul %5, %4, %cst {dimension_numbers = #tpu.dot_dimension_numbers<[1], [0], [0], [1], [0, 0, 1, 1], [], []>} : vector<128x256xbf16>, vector<256x256xbf16>, vector<128x256xf32> -> vector<128x256xf32>
    %c0_5 = arith.constant 0 : index
    %c0_6 = arith.constant 0 : index
    %7 = vector.load %arg4[%c0_5, %c0_6] : memref<128x1xf32, #tpu.memory_space<vmem>>, vector<128x1xf32>
    %8 = vector.broadcast %7 : vector<128x1xf32> to vector<128x256xf32>
    %9 = arith.addf %6, %8 : vector<128x256xf32>
    %cst_7 = arith.constant 0.000000e+00 : f32
    %10 = vector.broadcast %cst_7 : f32 to vector<128x256xf32>
    %11 = arith.maximumf %9, %10 : vector<128x256xf32>
    %c0_8 = arith.constant 0 : index
    %c0_9 = arith.constant 0 : index
    %12 = vector.load %arg5[%c0_8, %c0_9] : memref<256x128xbf16, #tpu.memory_space<vmem>>, vector<256x128xbf16>
    %13 = arith.truncf %11 : vector<128x256xf32> to vector<128x256xbf16>
    %cst_10 = arith.constant dense<0.000000e+00> : vector<256x256xf32>
    %14 = tpu.matmul %12, %13, %cst_10 {dimension_numbers = #tpu.dot_dimension_numbers<[1], [0], [0], [1], [0, 0, 1, 1], [], []>} : vector<256x128xbf16>, vector<128x256xbf16>, vector<256x256xf32> -> vector<256x256xf32>
    %15 = tpu.iota {dimensions = array<i32: 1>} : vector<1x256xi32>
    %c256_i32 = arith.constant 256 : i32
    %16 = arith.muli %arg1, %c256_i32 : i32
    %17 = vector.broadcast %16 : i32 to vector<1x256xi32>
    %18 = arith.addi %17, %15 : vector<1x256xi32>
    %c300_i32 = arith.constant 300 : i32
    %19 = vector.broadcast %c300_i32 : i32 to vector<1x256xi32>
    %20 = arith.cmpi slt, %18, %19 : vector<1x256xi32>
    %cst_11 = arith.constant 0.000000e+00 : f32
    %cst_12 = arith.constant -3.40282347E+38 : f32
    %21 = vector.broadcast %cst_11 : f32 to vector<1x256xf32>
    %22 = vector.broadcast %cst_12 : f32 to vector<1x256xf32>
    %23 = arith.select %20, %21, %22 : vector<1x256xi1>, vector<1x256xf32>
    %24 = vector.broadcast %23 : vector<1x256xf32> to vector<256x256xf32>
    %25 = arith.addf %14, %24 : vector<256x256xf32>
    %c0_13 = arith.constant 0 : index
    %c0_14 = arith.constant 0 : index
    %26 = vector.load %arg8[%c0_13, %c0_14] : memref<256x4xf32, #tpu.memory_space<vmem>>, vector<256x4xf32>
    %27 = vector.extract_strided_slice %26 {offsets = [0, 0], sizes = [256, 1], strides = [1, 1]} : vector<256x4xf32> to vector<256x1xf32>
    %cst_15 = arith.constant dense<0xFF800000> : vector<256xf32>
    %28 = vector.multi_reduction <maximumf>, %25, %cst_15 [1] : vector<256x256xf32> to vector<256xf32>
    %29 = vector.shape_cast %28 : vector<256xf32> to vector<256x1xf32>
    %30 = arith.maximumf %27, %29 : vector<256x1xf32>
    %31 = arith.subf %27, %30 : vector<256x1xf32>
    %32 = math.exp %31 : vector<256x1xf32>
    %33 = vector.broadcast %30 : vector<256x1xf32> to vector<256x256xf32>
    %34 = arith.subf %25, %33 : vector<256x256xf32>
    %35 = math.exp %34 : vector<256x256xf32>
    %36 = arith.extf %4 : vector<256x256xbf16> to vector<256x256xf32>
    %37 = arith.mulf %36, %35 : vector<256x256xf32>
    %c0_16 = arith.constant 0 : index
    %c0_17 = arith.constant 0 : index
    %38 = vector.load %arg8[%c0_16, %c0_17] : memref<256x4xf32, #tpu.memory_space<vmem>>, vector<256x1xf32>
    tpu.vector_store %arg8[%c0_16, %c0_17], %30 {strides = array<i32>} : memref<256x4xf32, #tpu.memory_space<vmem>>, vector<256x1xf32>,
    %39 = vector.extract_strided_slice %26 {offsets = [0, 1], sizes = [256, 1], strides = [1, 1]} : vector<256x4xf32> to vector<256x1xf32>
    %40 = arith.mulf %32, %39 : vector<256x1xf32>
    %cst_18 = arith.constant dense<0.000000e+00> : vector<256xf32>
    %41 = vector.multi_reduction <add>, %35, %cst_18 [1] : vector<256x256xf32> to vector<256xf32>
    %42 = vector.shape_cast %41 : vector<256xf32> to vector<256x1xf32>
    %43 = arith.addf %40, %42 : vector<256x1xf32>
    %c0_19 = arith.constant 0 : index
    %c1 = arith.constant 1 : index
    %44 = vector.load %arg8[%c0_19, %c1] : memref<256x4xf32, #tpu.memory_space<vmem>>, vector<256x1xf32>
    tpu.vector_store %arg8[%c0_19, %c1], %43 {strides = array<i32>} : memref<256x4xf32, #tpu.memory_space<vmem>>, vector<256x1xf32>,
    %45 = vector.extract_strided_slice %26 {offsets = [0, 2], sizes = [256, 1], strides = [1, 1]} : vector<256x4xf32> to vector<256x1xf32>
    %46 = arith.mulf %32, %45 : vector<256x1xf32>
    %cst_20 = arith.constant dense<0.000000e+00> : vector<256xf32>
    %47 = vector.multi_reduction <add>, %37, %cst_20 [1] : vector<256x256xf32> to vector<256xf32>
    %48 = vector.shape_cast %47 : vector<256xf32> to vector<256x1xf32>
    %49 = arith.addf %46, %48 : vector<256x1xf32>
    %c0_21 = arith.constant 0 : index
    %c2 = arith.constant 2 : index
    %50 = vector.load %arg8[%c0_21, %c2] : memref<256x4xf32, #tpu.memory_space<vmem>>, vector<256x1xf32>
    tpu.vector_store %arg8[%c0_21, %c2], %49 {strides = array<i32>} : memref<256x4xf32, #tpu.memory_space<vmem>>, vector<256x1xf32>,
    %51 = vector.extract_strided_slice %26 {offsets = [0, 3], sizes = [256, 1], strides = [1, 1]} : vector<256x4xf32> to vector<256x1xf32>
    %52 = arith.mulf %32, %51 : vector<256x1xf32>
    %53 = arith.mulf %36, %37 : vector<256x256xf32>
    %cst_22 = arith.constant dense<0.000000e+00> : vector<256xf32>
    %54 = vector.multi_reduction <add>, %53, %cst_22 [1] : vector<256x256xf32> to vector<256xf32>
    %55 = vector.shape_cast %54 : vector<256xf32> to vector<256x1xf32>
    %56 = arith.addf %52, %55 : vector<256x1xf32>
    %c0_23 = arith.constant 0 : index
    %c3 = arith.constant 3 : index
    %57 = vector.load %arg8[%c0_23, %c3] : memref<256x4xf32, #tpu.memory_space<vmem>>, vector<256x1xf32>
    tpu.vector_store %arg8[%c0_23, %c3], %56 {strides = array<i32>} : memref<256x4xf32, #tpu.memory_space<vmem>>, vector<256x1xf32>,
    %c1_i32 = arith.constant 1 : i32
    %58 = arith.cmpi eq, %arg1, %c1_i32 : i32
    %59 = arith.extui %58 : i1 to i32
    %c0_i32_24 = arith.constant 0 : i32
    %60 = arith.cmpi ne, %59, %c0_i32_24 : i32
    scf.if %60 {
      %c0_25 = arith.constant 0 : index
      %c0_26 = arith.constant 0 : index
      %61 = vector.load %arg8[%c0_25, %c0_26] : memref<256x4xf32, #tpu.memory_space<vmem>>, vector<256x4xf32>
      %62 = vector.extract_strided_slice %61 {offsets = [0, 1], sizes = [256, 1], strides = [1, 1]} : vector<256x4xf32> to vector<256x1xf32>
      %63 = tpu.reciprocal %62 {approx = true} : vector<256x1xf32> -> vector<256x1xf32>
      %64 = vector.extract_strided_slice %61 {offsets = [0, 2], sizes = [256, 1], strides = [1, 1]} : vector<256x4xf32> to vector<256x1xf32>
      %65 = arith.mulf %64, %63 : vector<256x1xf32>
      %66 = vector.extract_strided_slice %61 {offsets = [0, 3], sizes = [256, 1], strides = [1, 1]} : vector<256x4xf32> to vector<256x1xf32>
      %67 = arith.mulf %66, %63 : vector<256x1xf32>
      %c0_27 = arith.constant 0 : index
      %c0_28 = arith.constant 0 : index
      %c0_29 = arith.constant 0 : index
      %68 = vector.load %arg6[%c0_27, %c0_28, %c0_29] : memref<1x256x1xf32, #tpu.memory_space<vmem>>, vector<1x256x1xf32>
      %69 = vector.shape_cast %68 : vector<1x256x1xf32> to vector<256x1xf32>
      %70 = vector.shape_cast %65 : vector<256x1xf32> to vector<1x256x1xf32>
      tpu.vector_store %arg6[%c0_27, %c0_28, %c0_29], %70 {strides = array<i32>} : memref<1x256x1xf32, #tpu.memory_space<vmem>>, vector<1x256x1xf32>,
      %71 = arith.mulf %65, %65 : vector<256x1xf32>
      %72 = arith.subf %67, %71 : vector<256x1xf32>
      %cst_30 = arith.constant 9.99999974E-6 : f32
      %73 = vector.broadcast %cst_30 : f32 to vector<256x1xf32>
      %74 = arith.maximumf %72, %73 : vector<256x1xf32>
      %75 = math.sqrt %74 : vector<256x1xf32>
      %c0_31 = arith.constant 0 : index
      %c0_32 = arith.constant 0 : index
      %c0_33 = arith.constant 0 : index
      %76 = vector.load %arg7[%c0_31, %c0_32, %c0_33] : memref<1x256x1xf32, #tpu.memory_space<vmem>>, vector<1x256x1xf32>
      %77 = vector.shape_cast %76 : vector<1x256x1xf32> to vector<256x1xf32>
      %78 = vector.shape_cast %75 : vector<256x1xf32> to vector<1x256x1xf32>
      tpu.vector_store %arg7[%c0_31, %c0_32, %c0_33], %78 {strides = array<i32>} : memref<1x256x1xf32, #tpu.memory_space<vmem>>, vector<1x256x1xf32>,
    } else {
    }
    return
  }
  func.func @transform_0(%arg0: i32, %arg1: i32) -> (i32, i32, i32) {
    %c0_i32 = arith.constant 0 : i32
    %c0_i32_0 = arith.constant 0 : i32
    return %arg0, %c0_i32, %arg1 : i32, i32, i32
  }
  func.func @transform_1(%arg0: i32, %arg1: i32) -> (i32, i32) {
    %c0_i32 = arith.constant 0 : i32
    %c0_i32_0 = arith.constant 0 : i32
    %c0_i32_1 = arith.constant 0 : i32
    return %c0_i32, %c0_i32_0 : i32, i32
  }
  func.func @transform_2(%arg0: i32, %arg1: i32) -> (i32, i32) {
    %c0_i32 = arith.constant 0 : i32
    %c0_i32_0 = arith.constant 0 : i32
    %c0_i32_1 = arith.constant 0 : i32
    return %c0_i32, %c0_i32_0 : i32, i32
  }
  func.func @transform_3(%arg0: i32, %arg1: i32) -> (i32, i32) {
    %c0_i32 = arith.constant 0 : i32
    %c0_i32_0 = arith.constant 0 : i32
    %c0_i32_1 = arith.constant 0 : i32
    return %c0_i32, %c0_i32_0 : i32, i32
  }
  func.func @transform_4(%arg0: i32, %arg1: i32) -> (i32, i32, i32) {
    %c0_i32 = arith.constant 0 : i32
    %c0_i32_0 = arith.constant 0 : i32
    %c0_i32_1 = arith.constant 0 : i32
    return %arg0, %c0_i32, %c0_i32_0 : i32, i32, i32
  }
  func.func @transform_5(%arg0: i32, %arg1: i32) -> (i32, i32, i32) {
    %c0_i32 = arith.constant 0 : i32
    %c0_i32_0 = arith.constant 0 : i32
    %c0_i32_1 = arith.constant 0 : i32
    return %arg0, %c0_i32, %c0_i32_0 : i32, i32, i32
  }
}

</mosaic_0001>

<bundles_post_ra>
// kernel: asp_forward.1
= control target key start
LH: loop header
LB: loop body
LE: loop exit
PB: predicated region body
PF: predicated region fallthrough
CT: control target
= control target key end

     0   :  { %s5408_s18 = smov 0   ;;  %s5410_s19 = smov 0   ;;  %s8704_s0 = inlined_call_operand.vmem [shape: bf16[2,256,512], index: 0, kind: input, shape index: {}]   ;;  %s8705_s1 = inlined_call_operand.vmem [shape: bf16[128,256], index: 1, kind: input, shape index: {}]   ;;  %s8706_s2 = inlined_call_operand.vmem [shape: f32[128,1], index: 2, kind: input, shape index: {}]   ;;  %s8707_s3 = inlined_call_operand.vmem [shape: bf16[256,128], index: 3, kind: input, shape index: {}]   ;;  %s8708_s4 = inlined_call_operand.vmem [shape: f32[2,256,1], index: 4, kind: output, shape index: {0}]   ;;  %s8709_s5 = inlined_call_operand.vmem [shape: f32[2,256,1], index: 5, kind: output, shape index: {1}]  }
   0x1   :  { %s5412_s20 = smov 0   ;;  %s5414_s21 = smov 0  }
   0x2   :  { %s5416_s22 = smov 0   ;;  %s5418_s23 = smov 0  }
   0x3   :  { %s5420_s24 = smov 0  }
   0x4 LB: > { %s25_s25 = sadd.s32 1, %s5355_s22  ;;  %s28_s26 = sadd.s32 1, %s5359_s23  ;;  %s5363_s24 = sphi %s5420_s24, %s16_s24   ;;  %s5359_s23 = sphi %s5418_s23, %s9212_s23   ;;  %s5355_s22 = sphi %s5416_s22, %s9211_s22   ;;  %s5351_s21 = sphi %s5414_s21, %s9210_s21   ;;  %s5347_s20 = sphi %s5412_s20, %s9209_s20   ;;  %s5343_s19 = sphi %s5410_s19, %s9208_s19   ;;  %s5339_s18 = sphi %s5408_s18, %s9207_s18  }
   0x5   : > { %p26_p0 = scmp.ge.s32.totalorder %s25_s25, 2  ;;  %p44_p1 = scmp.ne.s32.totalorder %s5343_s19, %s5339_s18 }
   0x6   : > { %p45_p2 = scmp.eq.s32.totalorder %s5363_s24, 0  ;;  %s37_s30 = sadd.s32 1, %s5343_s19 }
   0x7   : > { %s9214_s25 = smov (%p26_p0, %s25_s25), 0  ;;  %s9216_s26 = smov (!%p26_p0, %s28_s26), %s5359_s23 }
   0x8   : > { %p46_p3 = por %p45_p2, %p44_p1  ;;  %p30_p4 = scmp.ge.s32.totalorder %s9216_s26, 2 }
   0x9   : > { %s33_s27 = ssub.s32 %s5355_s22, %s9214_s25  ;;  %p4684_p6 = scmp.ge.s32.totalorder %s5363_s24, 4 }
   0xa   : > { %s9218_s26 = smov (%p30_p4, %s9216_s26), 0 }
   0xb   : > { %s32_s28 = ssub.s32 %s5359_s23, %s9218_s26  ;;  %194 = sbr.rel (%p4684_p6) target bundleno = 41 (0x29), region = 28 }
   0xc   : > { %s34_s29 = sor.u32 %s33_s27, %s32_s28 }
   0xd   : > { %p35_p5 = scmp.eq.s32.totalorder %s34_s29, 0 }
   0xf   : > { %s5459_s6 = scalar_select %p35_p5, %s5343_s19, %s37_s30  }
  0x12   : > { %197 = sbr.rel (!%p46_p3) target bundleno = 41 (0x29), region = 32  ;;  %s199_s7 = sand.u32 (%p46_p3), 1, %s5343_s19  }
  0x13   : > { %s4686_s8 = sshll.u32 (%p46_p3), %s5355_s22, 1  ;;  %s4685_s9 = sshll.u32 (%p46_p3), %s199_s7, 8 }
  0x14   : > { %s4687_s10 = sshll.u32 (%p46_p3), %s5359_s23, 7  ;;  %s5473_s16 = scalar_lea.vmem (%p46_p3), [#allocation3], %s4685_s9 }
  0x15   : > { %s204_s11 = sadd.s32 (%p46_p3), %s4687_s10, %s4686_s8 }
  0x16   : > { %s4688_s12 = sshll.u32 (%p46_p3), %s204_s11, 2 }
  0x17   : > { %s5468_s15 = scalar_lea.vmem (%p46_p3), %s8704_s0, %s4688_s12 }
  0x18   : > { %v296_v0 = vld [vmem:[%s5468_s15] sm:$0xff] (%p46_p3)  ;;  %v298_v1 = vld [vmem:[%s5468_s15 + $0x10] sm:$0xff] (%p46_p3) }
  0x19   : > { %v300_v2 = vld [vmem:[%s5468_s15 + $0x20] sm:$0xff]  ;;  %297 = vst [vmem:[%s5473_s16] sm:$0xff] %v296_v0  ;;  %299 = vst [vmem:[%s5473_s16 + $0x8] sm:$0xff] %v298_v1  ;;  %v302_v3 = vld [vmem:[%s5468_s15 + $0x30] sm:$0xff] }
  0x1a   : > { %301 = vst [vmem:[%s5473_s16 + $0x10] sm:$0xff] %v300_v2  ;;  %v304_v4 = vld [vmem:[%s5468_s15 + $0x40] sm:$0xff]  ;;  %v306_v5 = vld [vmem:[%s5468_s15 + $0x50] sm:$0xff]  ;;  %303 = vst [vmem:[%s5473_s16 + $0x18] sm:$0xff] %v302_v3 }
  0x1b   : > { %305 = vst [vmem:[%s5473_s16 + $0x20] sm:$0xff] %v304_v4  ;;  %307 = vst [vmem:[%s5473_s16 + $0x28] sm:$0xff] %v306_v5  ;;  %v308_v6 = vld [vmem:[%s5468_s15 + $0x60] sm:$0xff]  ;;  %v310_v7 = vld [vmem:[%s5468_s15 + $0x70] sm:$0xff] }
  0x1c   : > { %v312_v8 = vld [vmem:[%s5468_s15 + $0x80] sm:$0xff]  ;;  %309 = vst [vmem:[%s5473_s16 + $0x30] sm:$0xff] %v308_v6  ;;  %311 = vst [vmem:[%s5473_s16 + $0x38] sm:$0xff] %v310_v7  ;;  %v314_v9 = vld [vmem:[%s5468_s15 + $0x90] sm:$0xff] }
  0x1d   : > { %313 = vst [vmem:[%s5473_s16 + $0x40] sm:$0xff] %v312_v8  ;;  %v316_v10 = vld [vmem:[%s5468_s15 + $0xa0] sm:$0xff]  ;;  %v318_v11 = vld [vmem:[%s5468_s15 + $0xb0] sm:$0xff]  ;;  %315 = vst [vmem:[%s5473_s16 + $0x48] sm:$0xff] %v314_v9 }
  0x1e   : > { %317 = vst [vmem:[%s5473_s16 + $0x50] sm:$0xff] %v316_v10  ;;  %319 = vst [vmem:[%s5473_s16 + $0x58] sm:$0xff] %v318_v11  ;;  %v320_v12 = vld [vmem:[%s5468_s15 + $0xc0] sm:$0xff]  ;;  %v322_v13 = vld [vmem:[%s5468_s15 + $0xd0] sm:$0xff] }
  0x1f   : > { %v324_v14 = vld [vmem:[%s5468_s15 + $0xe0] sm:$0xff]  ;;  %321 = vst [vmem:[%s5473_s16 + $0x60] sm:$0xff] %v320_v12  ;;  %323 = vst [vmem:[%s5473_s16 + $0x68] sm:$0xff] %v322_v13  ;;  %v326_v15 = vld [vmem:[%s5468_s15 + $0xf0] sm:$0xff] }
  0x20   : > { %325 = vst [vmem:[%s5473_s16 + $0x70] sm:$0xff] %v324_v14  ;;  %v328_v16 = vld [vmem:[%s5468_s15 + $0x100] sm:$0xff]  ;;  %v330_v17 = vld [vmem:[%s5468_s15 + $0x110] sm:$0xff]  ;;  %327 = vst [vmem:[%s5473_s16 + $0x78] sm:$0xff] %v326_v15 }
  0x21   : > { %329 = vst [vmem:[%s5473_s16 + $0x80] sm:$0xff] %v328_v16  ;;  %331 = vst [vmem:[%s5473_s16 + $0x88] sm:$0xff] %v330_v17  ;;  %v332_v18 = vld [vmem:[%s5468_s15 + $0x120] sm:$0xff]  ;;  %v334_v19 = vld [vmem:[%s5468_s15 + $0x130] sm:$0xff] }
  0x22   : > { %v336_v20 = vld [vmem:[%s5468_s15 + $0x140] sm:$0xff]  ;;  %333 = vst [vmem:[%s5473_s16 + $0x90] sm:$0xff] %v332_v18  ;;  %335 = vst [vmem:[%s5473_s16 + $0x98] sm:$0xff] %v334_v19  ;;  %v338_v21 = vld [vmem:[%s5468_s15 + $0x150] sm:$0xff] }
  0x23   : > { %337 = vst [vmem:[%s5473_s16 + $0xa0] sm:$0xff] %v336_v20  ;;  %v340_v22 = vld [vmem:[%s5468_s15 + $0x160] sm:$0xff]  ;;  %v342_v23 = vld [vmem:[%s5468_s15 + $0x170] sm:$0xff]  ;;  %339 = vst [vmem:[%s5473_s16 + $0xa8] sm:$0xff] %v338_v21 }
  0x24   : > { %341 = vst [vmem:[%s5473_s16 + $0xb0] sm:$0xff] %v340_v22  ;;  %343 = vst [vmem:[%s5473_s16 + $0xb8] sm:$0xff] %v342_v23  ;;  %v344_v24 = vld [vmem:[%s5468_s15 + $0x180] sm:$0xff]  ;;  %v346_v25 = vld [vmem:[%s5468_s15 + $0x190] sm:$0xff] }
  0x25   : > { %v348_v26 = vld [vmem:[%s5468_s15 + $0x1a0] sm:$0xff]  ;;  %345 = vst [vmem:[%s5473_s16 + $0xc0] sm:$0xff] %v344_v24  ;;  %347 = vst [vmem:[%s5473_s16 + $0xc8] sm:$0xff] %v346_v25  ;;  %v350_v27 = vld [vmem:[%s5468_s15 + $0x1b0] sm:$0xff] }
  0x26   : > { %349 = vst [vmem:[%s5473_s16 + $0xd0] sm:$0xff] %v348_v26  ;;  %v352_v28 = vld [vmem:[%s5468_s15 + $0x1c0] sm:$0xff]  ;;  %v354_v29 = vld [vmem:[%s5468_s15 + $0x1d0] sm:$0xff]  ;;  %351 = vst [vmem:[%s5473_s16 + $0xd8] sm:$0xff] %v350_v27 }
  0x27   : > { %353 = vst [vmem:[%s5473_s16 + $0xe0] sm:$0xff] %v352_v28  ;;  %355 = vst [vmem:[%s5473_s16 + $0xe8] sm:$0xff] %v354_v29  ;;  %v356_v30 = vld [vmem:[%s5468_s15 + $0x1e0] sm:$0xff]  ;;  %v358_v31 = vld [vmem:[%s5468_s15 + $0x1f0] sm:$0xff] }
  0x28   : > { %357 = vst [vmem:[%s5473_s16 + $0xf0] sm:$0xff] %v356_v30  ;;  %359 = vst [vmem:[%s5473_s16 + $0xf8] sm:$0xff] %v358_v31 }
  0x29 PF: > { %p4689_p7 = scmp.ge.s32.totalorder %s5363_s24, 1  ;;  %p364_p8 = scmp.lt.s32.totalorder %s5363_s24, 5 }
  0x2b   : > { %p365_p9 = pnand %p4689_p7, %p364_p8 }
  0x2d   : > { %368 = sbr.rel (%p365_p9) target bundleno = 1970 (0x7b2), region = 70 }
  0x34   : > { %s371_s17 = sand.u32 1, %s5339_s18   ;;  %p404_p10 = scmp.lt.s32.totalorder %s5351_s21, 1 }
  0x35   : > { %s4690_s27 = sshll.u32 %s371_s17, 8  ;;  %p4695_p11 = scmp.ne.s32.totalorder %s5347_s20, 0 }
  0x36   : > { %s9220_s21 = smov (!%p404_p10, %s5351_s21), 1  ;;  %s5551_s11 = scalar_lea.vmem [#allocation3], %s4690_s27  ;;  %v419_v32 = vlaneseq (!%p4695_p11)  ;;  %vm423_vm0 = vcmask (!%p4695_p11), 31744   ;;  %v5365_v34 = vmov (!%p4695_p11), 0.0  }
  0x37   : > { %s4764_s28 = sshll.u32 %s9220_s21, 8  ;;  %418 = sbr.rel (%p4695_p11) target bundleno = 76 (0x4c), region = 78 }
  0x38   : > { %s5544_s7 = scalar_lea.vmem %s8708_s4, %s4764_s28  ;;  %s5549_s10 = scalar_lea.vmem %s8709_s5, %s4764_s28  ;;  %v420_v33 = vand.u32 (!%p4695_p11), 127, %v419_v32 }
  0x3a   : > { %vm421_vm1 = vcmp.eq.s32.totalorder (!%p4695_p11), %v420_v33, 0 }
  0x3b   : > { %v422_v35 = vsel (!%p4695_p11), %vm421_vm1, -3.4028235e+38, %v5365_v34 }
  0x3c   : > { %424 = vst.msk [vmem:[#allocation2] sm:$0xff] (!%p4695_p11), %vm423_vm0, %v422_v35  ;;  %425 = vst.msk [vmem:[#allocation2 + $0x8] sm:$0xff] (!%p4695_p11), %vm423_vm0, %v422_v35 }
  0x3d   : > { %426 = vst.msk [vmem:[#allocation2 + $0x10] sm:$0xff] (!%p4695_p11), %vm423_vm0, %v422_v35  ;;  %427 = vst.msk [vmem:[#allocation2 + $0x18] sm:$0xff] (!%p4695_p11), %vm423_vm0, %v422_v35 }
  0x3e   : > { %428 = vst.msk [vmem:[#allocation2 + $0x20] sm:$0xff] %vm423_vm0, %v422_v35  ;;  %429 = vst.msk [vmem:[#allocation2 + $0x28] sm:$0xff] %vm423_vm0, %v422_v35 }
  0x3f   : > { %430 = vst.msk [vmem:[#allocation2 + $0x30] sm:$0xff] %vm423_vm0, %v422_v35  ;;  %431 = vst.msk [vmem:[#allocation2 + $0x38] sm:$0xff] %vm423_vm0, %v422_v35 }
  0x40   : > { %432 = vst.msk [vmem:[#allocation2 + $0x40] sm:$0xff] %vm423_vm0, %v422_v35  ;;  %433 = vst.msk [vmem:[#allocation2 + $0x48] sm:$0xff] %vm423_vm0, %v422_v35 }
  0x41   : > { %434 = vst.msk [vmem:[#allocation2 + $0x50] sm:$0xff] %vm423_vm0, %v422_v35  ;;  %435 = vst.msk [vmem:[#allocation2 + $0x58] sm:$0xff] %vm423_vm0, %v422_v35 }
  0x42   : > { %436 = vst.msk [vmem:[#allocation2 + $0x60] sm:$0xff] %vm423_vm0, %v422_v35  ;;  %437 = vst.msk [vmem:[#allocation2 + $0x68] sm:$0xff] %vm423_vm0, %v422_v35 }
  0x43   : > { %438 = vst.msk [vmem:[#allocation2 + $0x70] sm:$0xff] %vm423_vm0, %v422_v35  ;;  %439 = vst.msk [vmem:[#allocation2 + $0x78] sm:$0xff] %vm423_vm0, %v422_v35 }
  0x44   : > { %440 = vst.msk [vmem:[#allocation2 + $0x80] sm:$0xff] %vm423_vm0, %v422_v35  ;;  %441 = vst.msk [vmem:[#allocation2 + $0x88] sm:$0xff] %vm423_vm0, %v422_v35 }
  0x45   : > { %442 = vst.msk [vmem:[#allocation2 + $0x90] sm:$0xff] %vm423_vm0, %v422_v35  ;;  %443 = vst.msk [vmem:[#allocation2 + $0x98] sm:$0xff] %vm423_vm0, %v422_v35 }
  0x46   : > { %444 = vst.msk [vmem:[#allocation2 + $0xa0] sm:$0xff] %vm423_vm0, %v422_v35  ;;  %445 = vst.msk [vmem:[#allocation2 + $0xa8] sm:$0xff] %vm423_vm0, %v422_v35 }
  0x47   : > { %446 = vst.msk [vmem:[#allocation2 + $0xb0] sm:$0xff] %vm423_vm0, %v422_v35  ;;  %447 = vst.msk [vmem:[#allocation2 + $0xb8] sm:$0xff] %vm423_vm0, %v422_v35 }
  0x48   : > { %448 = vst.msk [vmem:[#allocation2 + $0xc0] sm:$0xff] %vm423_vm0, %v422_v35  ;;  %449 = vst.msk [vmem:[#allocation2 + $0xc8] sm:$0xff] %vm423_vm0, %v422_v35 }
  0x49   : > { %450 = vst.msk [vmem:[#allocation2 + $0xd0] sm:$0xff] %vm423_vm0, %v422_v35  ;;  %451 = vst.msk [vmem:[#allocation2 + $0xd8] sm:$0xff] %vm423_vm0, %v422_v35 }
  0x4a   : > { %452 = vst.msk [vmem:[#allocation2 + $0xe0] sm:$0xff] %vm423_vm0, %v422_v35  ;;  %453 = vst.msk [vmem:[#allocation2 + $0xe8] sm:$0xff] %vm423_vm0, %v422_v35 }
  0x4b   : > { %454 = vst.msk [vmem:[#allocation2 + $0xf0] sm:$0xff] %vm423_vm0, %v422_v35  ;;  %455 = vst.msk [vmem:[#allocation2 + $0xf8] sm:$0xff] %vm423_vm0, %v422_v35 }
  0x4c PF: > { %v456_v36 = vld [vmem:[%s5551_s11] sm:$0xff]  ;;  %v457_v37 = vld [vmem:[%s5551_s11 + $0x8] sm:$0xff]  ;;  %v458_v38 = vld [vmem:[%s5551_s11 + $0x10] sm:$0xff]  ;;  %v5366_v42 = vmov 0   ;;  %s5367_s27 = smov 127   ;;  %s5368_s28 = smov 126  }
  0x4d   : > { %v4713_v39 = vcombine.high %v456_v36, %v457_v37  ;;  %v4712_v40 = vcombine.low %v456_v36, %v457_v37  ;;  %v459_v41 = vld [vmem:[%s5551_s11 + $0x18] sm:$0xff]  ;;  %4851 = vset.pattern.permute.xlu0 %v5366_v42  ;;  %4852 = vset.pattern.permute.xlu1 %v5366_v42  ;;  %v460_v44 = vld [vmem:[%s5551_s11 + $0x20] sm:$0xff]  ;;  %v461_v45 = vld [vmem:[%s5551_s11 + $0x28] sm:$0xff]  ;;  %s5369_s29 = smov 125   ;;  %s4744_s12 = sshll.u32 %s5347_s20, 8  ;;  %vm2069_vm4 = vcmask 7168  }
  0x4e   : > { %v4715_v43 = vcombine.high %v458_v38, %v459_v41  ;;  %1192 = vmatprep.mubr.bf16.mxu1 %v5366_v42  ;;  %v4714_v46 = vcombine.low %v458_v38, %v459_v41  ;;  %v4717_v47 = vcombine.high %v460_v44, %v461_v45  ;;  %v462_v48 = vld [vmem:[%s5551_s11 + $0x30] sm:$0xff]  ;;  %v463_v49 = vld [vmem:[%s5551_s11 + $0x38] sm:$0xff]  ;;  %v4716_v50 = vcombine.low %v460_v44, %v461_v45  ;;  %v464_v52 = vld [vmem:[%s5551_s11 + $0x40] sm:$0xff]  ;;  %s5372_s13 = smov 2   ;;  %s5373_s14 = smov 3  }
  0x4f   : > { %840 = vmatprep.subr.bf16.mxu0 %v4713_v39  ;;  %v4719_v51 = vcombine.high %v462_v48, %v463_v49  ;;  %v465_v53 = vld [vmem:[%s5551_s11 + $0x48] sm:$0xff]  ;;  %v4718_v55 = vcombine.low %v462_v48, %v463_v49  ;;  %v466_v57 = vld [vmem:[%s5551_s11 + $0x50] sm:$0xff]  ;;  %v467_v58 = vld [vmem:[%s5551_s11 + $0x58] sm:$0xff]  ;;  %vm2518_vm5 = vcmask 15368   ;;  %vm2935_vm6 = vcmask 23568   ;;  %p4761_p12 = scmp.ne.s32.totalorder %s5347_s20, 1 }
  0x50   : > { %841 = vmatpush1.bf16.msra.mxu0 %v4712_v40  ;;  %v4887_v54 = vld [vmem:[%s8705_s1 + $0x4] ss:$8 sps:$4 sm:$0xff]   ;;  %v4721_v56 = vcombine.high %v464_v52, %v465_v53  ;;  %v4720_v59 = vcombine.low %v464_v52, %v465_v53  ;;  %v4723_v60 = vcombine.high %v466_v57, %v467_v58  ;;  %v4722_v63 = vcombine.low %v466_v57, %v467_v58  ;;  %v470_v2 = vld [vmem:[%s5551_s11 + $0x70] sm:$0xff]  ;;  %v471_v3 = vld [vmem:[%s5551_s11 + $0x78] sm:$0xff] }
  0x51   : > { %842 = vmatprep.subr.bf16.mxu0 %v4715_v43  ;;  %872 = vmatprep.mubr.bf16.mxu0 %v4887_v54  ;;  %v468_v61 = vld [vmem:[%s5551_s11 + $0x60] sm:$0xff]  ;;  %v469_v62 = vld [vmem:[%s5551_s11 + $0x68] sm:$0xff]  ;;  %v506_v5 = vld [vmem:[%s8706_s2 + $0x10] sm:$0xff]  ;;  %v4727_v8 = vcombine.high %v470_v2, %v471_v3  ;;  %v4726_v13 = vcombine.low %v470_v2, %v471_v3  ;;  %vm3416_vm7 = vcmask 31768  }
  0x52   : > { %v504_v0 = vld [vmem:[%s8706_s2] sm:$0xff]  ;;  %v4725_v1 = vcombine.high %v468_v61, %v469_v62  ;;  %v505_v4 = vld [vmem:[%s8706_s2 + $0x8] sm:$0xff]  ;;  %532 = vperm.xlu1 %4852, %v506_v5   ;;  %v4724_v6 = vcombine.low %v468_v61, %v469_v62  ;;  %v507_v7 = vld [vmem:[%s8706_s2 + $0x18] sm:$0xff] }
  0x53   : > { %522 = vperm.xlu0 %4851, %v504_v0   ;;  %v472_v9 = vld [vmem:[%s5551_s11 + $0x80] sm:$0xff]  ;;  %v473_v10 = vld [vmem:[%s5551_s11 + $0x88] sm:$0xff]  ;;  %v474_v14 = vld [vmem:[%s5551_s11 + $0x90] sm:$0xff] }
  0x54   : > { %843 = vmatpush1.bf16.msra.mxu0 %v4714_v46  ;;  %v508_v11 = vld [vmem:[%s8706_s2 + $0x20] sm:$0xff]  ;;  %v509_v12 = vld [vmem:[%s8706_s2 + $0x28] sm:$0xff]  ;;  %v475_v15 = vld [vmem:[%s5551_s11 + $0x98] sm:$0xff]  ;;  %v4729_v17 = vcombine.high %v472_v9, %v473_v10  ;;  %v4728_v19 = vcombine.low %v472_v9, %v473_v10 }
  0x55   : > { %844 = vmatprep.subr.bf16.mxu0 %v4717_v47  ;;  %v510_v16 = vld [vmem:[%s8706_s2 + $0x30] sm:$0xff]  ;;  %v511_v18 = vld [vmem:[%s8706_s2 + $0x38] sm:$0xff]  ;;  %v476_v20 = vld [vmem:[%s5551_s11 + $0xa0] sm:$0xff]  ;;  %v4731_v23 = vcombine.high %v474_v14, %v475_v15  ;;  %v4730_v25 = vcombine.low %v474_v14, %v475_v15 }
  0x56   : > { %537 = vperm.xlu1 %4852, %v507_v7   ;;  %v477_v21 = vld [vmem:[%s5551_s11 + $0xa8] sm:$0xff]  ;;  %v512_v22 = vld [vmem:[%s8706_s2 + $0x40] sm:$0xff]  ;;  %v478_v27 = vld [vmem:[%s5551_s11 + $0xb0] sm:$0xff] }
  0x57   : > { %527 = vperm.xlu0 %4851, %v505_v4   ;;  %v513_v24 = vld [vmem:[%s8706_s2 + $0x48] sm:$0xff]  ;;  %v4733_v26 = vcombine.high %v476_v20, %v477_v21  ;;  %v479_v28 = vld [vmem:[%s5551_s11 + $0xb8] sm:$0xff]  ;;  %v514_v29 = vld [vmem:[%s8706_s2 + $0x50] sm:$0xff]  ;;  %v4732_v30 = vcombine.low %v476_v20, %v477_v21 }
  0x58   : > { %845 = vmatpush1.bf16.msra.mxu0 %v4716_v50  ;;  %v515_v31 = vld [vmem:[%s8706_s2 + $0x58] sm:$0xff]  ;;  %v4735_v32 = vcombine.high %v478_v27, %v479_v28  ;;  %v480_v33 = vld [vmem:[%s5551_s11 + $0xc0] sm:$0xff]  ;;  %v481_v34 = vld [vmem:[%s5551_s11 + $0xc8] sm:$0xff]  ;;  %v4734_v36 = vcombine.low %v478_v27, %v479_v28 }
  0x59   : > { %846 = vmatprep.subr.bf16.mxu0 %v4719_v51  ;;  %v516_v35 = vld [vmem:[%s8706_s2 + $0x60] sm:$0xff]  ;;  %v517_v37 = vld [vmem:[%s8706_s2 + $0x68] sm:$0xff]  ;;  %v4737_v38 = vcombine.high %v480_v33, %v481_v34  ;;  %v482_v39 = vld [vmem:[%s5551_s11 + $0xd0] sm:$0xff]  ;;  %v4736_v43 = vcombine.low %v480_v33, %v481_v34 }
  0x5a   : > { %547 = vperm.xlu1 %4852, %v509_v12   ;;  %v483_v40 = vld [vmem:[%s5551_s11 + $0xd8] sm:$0xff]  ;;  %v518_v41 = vld [vmem:[%s8706_s2 + $0x70] sm:$0xff]  ;;  %v484_v46 = vld [vmem:[%s5551_s11 + $0xe0] sm:$0xff] }
  0x5b   : > { %542 = vperm.xlu0 %4851, %v508_v11   ;;  %v519_v44 = vld [vmem:[%s8706_s2 + $0x78] sm:$0xff]  ;;  %v4739_v45 = vcombine.high %v482_v39, %v483_v40  ;;  %v485_v47 = vld [vmem:[%s5551_s11 + $0xe8] sm:$0xff]  ;;  %v4738_v48 = vcombine.low %v482_v39, %v483_v40  ;;  %v486_v50 = vld [vmem:[%s5551_s11 + $0xf0] sm:$0xff] }
  0x5c   : > { %847 = vmatpush1.bf16.msra.mxu0 %v4718_v55  ;;  %v4741_v49 = vcombine.high %v484_v46, %v485_v47  ;;  %v487_v51 = vld [vmem:[%s5551_s11 + $0xf8] sm:$0xff]  ;;  %v4740_v52 = vcombine.low %v484_v46, %v485_v47  ;;  %v4885_v55 = vld [vmem:[%s8705_s1] ss:$8 sps:$4 sm:$0xff]   ;;  %v4891_v58 = vld [vmem:[%s8705_s1 + $0x24] ss:$8 sps:$4 sm:$0xff]  }
  0x5d   : > { %848 = vmatprep.subr.bf16.mxu0 %v4721_v56  ;;  %v4743_v53 = vcombine.high %v486_v50, %v487_v51  ;;  %v4742_v54 = vcombine.low %v486_v50, %v487_v51  ;;  %v4888_v56 = vld [vmem:[%s8705_s1 + $0x14] ss:$8 sps:$4 sm:$0xff]   ;;  %v4890_v57 = vld [vmem:[%s8705_s1 + $0x10] ss:$8 sps:$4 sm:$0xff]   ;;  %v4897_v62 = vld [vmem:[%s8705_s1 + $0x44] ss:$8 sps:$4 sm:$0xff]  }
  0x5e   : > { %557 = vperm.xlu1 %4852, %v511_v18   ;;  %v4896_v61 = vld [vmem:[%s8705_s1 + $0x30] ss:$8 sps:$4 sm:$0xff]   ;;  %v4900_v0 = vld [vmem:[%s8705_s1 + $0x54] ss:$8 sps:$4 sm:$0xff]   ;;  %v4903_v2 = vld [vmem:[%s8705_s1 + $0x64] ss:$8 sps:$4 sm:$0xff]  }
  0x5f   : > { %552 = vperm.xlu0 %4851, %v510_v16   ;;  %v4905_v3 = vld [vmem:[%s8705_s1 + $0x60] ss:$8 sps:$4 sm:$0xff]   ;;  %v4906_v4 = vld [vmem:[%s8705_s1 + $0x74] ss:$8 sps:$4 sm:$0xff]   ;;  %v4908_v5 = vld [vmem:[%s8705_s1 + $0x70] ss:$8 sps:$4 sm:$0xff]  }
  0x60   : > { %849 = vmatpush1.bf16.msra.mxu0 %v4720_v59  ;;  %v4893_v59 = vld [vmem:[%s8705_s1 + $0x20] ss:$8 sps:$4 sm:$0xff]   ;;  %v5722_v7 = vld [vmem:[#allocation2 + $0x18] sm:$0xff]  ;;  %v5732_v10 = vld [vmem:[#allocation2 + $0x10] sm:$0xff] }
  0x61   : > { %850 = vmatprep.subr.bf16.mxu0 %v4723_v60  ;;  %v4894_v60 = vld [vmem:[%s8705_s1 + $0x34] ss:$8 sps:$4 sm:$0xff]   ;;  %v5730_v9 = vld [vmem:[#allocation2 + $0x28] sm:$0xff]  ;;  %v5740_v12 = vld [vmem:[#allocation2 + $0x20] sm:$0xff] }
  0x62   : > { %567 = vperm.xlu1 %4852, %v513_v24   ;;  %v5738_v11 = vld [vmem:[#allocation2 + $0x38] sm:$0xff]  ;;  %v5748_v14 = vld [vmem:[#allocation2 + $0x30] sm:$0xff]  ;;  %v5756_v16 = vld [vmem:[#allocation2 + $0x40] sm:$0xff] }
  0x63   : > { %562 = vperm.xlu0 %4851, %v512_v22   ;;  %v5754_v15 = vld [vmem:[#allocation2 + $0x58] sm:$0xff]  ;;  %v5764_v18 = vld [vmem:[#allocation2 + $0x50] sm:$0xff]  ;;  %v5772_v20 = vld [vmem:[#allocation2 + $0x60] sm:$0xff] }
  0x64   : > { %851 = vmatpush1.bf16.msra.mxu0 %v4722_v63  ;;  %v4899_v63 = vld [vmem:[%s8705_s1 + $0x40] ss:$8 sps:$4 sm:$0xff]   ;;  %v5780_v22 = vld [vmem:[#allocation2 + $0x70] sm:$0xff]  ;;  %v5802_v27 = vld [vmem:[#allocation2 + $0xb8] sm:$0xff] }
  0x65   : > { %852 = vmatprep.subr.bf16.mxu0 %v4725_v1  ;;  %v4902_v1 = vld [vmem:[%s8705_s1 + $0x50] ss:$8 sps:$4 sm:$0xff]   ;;  %v5778_v21 = vld [vmem:[#allocation2 + $0x88] sm:$0xff]  ;;  %v5788_v24 = vld [vmem:[#allocation2 + $0x80] sm:$0xff] }
  0x66   : > { %577 = vperm.xlu1 %4852, %v515_v31   ;;  %v5804_v28 = vld [vmem:[#allocation2 + $0xa0] sm:$0xff]  ;;  %v5818_v31 = vld [vmem:[#allocation2 + $0xd8] sm:$0xff]  ;;  %v5826_v33 = vld [vmem:[#allocation2 + $0xe8] sm:$0xff] }
  0x67   : > { %572 = vperm.xlu0 %4851, %v514_v29   ;;  %v5810_v29 = vld [vmem:[#allocation2 + $0xc8] sm:$0xff]  ;;  %v5828_v34 = vld [vmem:[#allocation2 + $0xd0] sm:$0xff] }
  0x68   : > { %853 = vmatpush1.bf16.msra.mxu0 %v4724_v6  ;;  %v5718_v6 = vld [vmem:[#allocation2 + $0x8] sm:$0xff] }
  0x69   : > { %854 = vmatprep.subr.bf16.mxu0 %v4727_v8  ;;  %v5726_v8 = vld [vmem:[#allocation2] sm:$0xff] }
  0x6a   : > { %587 = vperm.xlu1 %4852, %v517_v37  }
  0x6b   : > { %582 = vperm.xlu0 %4851, %v516_v35   ;;  %v5834_v35 = vld [vmem:[#allocation2 + $0xf8] sm:$0xff] }
  0x6c   : > { %855 = vmatpush1.bf16.msra.mxu0 %v4726_v13  ;;  %v5746_v13 = vld [vmem:[#allocation2 + $0x48] sm:$0xff] }
  0x6d   : > { %856 = vmatprep.subr.bf16.mxu0 %v4729_v17  ;;  %v5762_v17 = vld [vmem:[#allocation2 + $0x68] sm:$0xff] }
  0x6e   : > { %597 = vperm.xlu1 %4852, %v519_v44  }
  0x6f   : > { %592 = vperm.xlu0 %4851, %v518_v41  }
  0x70   : > { %857 = vmatpush1.bf16.msra.mxu0 %v4728_v19  ;;  %v5770_v19 = vld [vmem:[#allocation2 + $0x78] sm:$0xff] }
  0x71   : > { %858 = vmatprep.subr.bf16.mxu0 %v4731_v23  ;;  %v5786_v23 = vld [vmem:[#allocation2 + $0x98] sm:$0xff] }
  0x72   : > { %2136 = vrot.lane.b32.xlu1 %v5718_v6, %s5367_s27 }
  0x73   : > { %2134 = vrot.lane.b32.xlu0 %v5726_v8, %s5367_s27 }
  0x74   : > { %859 = vmatpush1.bf16.msra.mxu0 %v4730_v25  ;;  %v5794_v25 = vld [vmem:[#allocation2 + $0xa8] sm:$0xff] }
  0x75   : > { %860 = vmatprep.subr.bf16.mxu0 %v4733_v26  ;;  %v5796_v26 = vld [vmem:[#allocation2 + $0x90] sm:$0xff] }
  0x76   : > { %2140 = vrot.lane.b32.xlu1 %v5722_v7, %s5367_s27 }
  0x77   : > { %2138 = vrot.lane.b32.xlu0 %v5732_v10, %s5367_s27 }
  0x78   : > { %861 = vmatpush1.bf16.msra.mxu0 %v4732_v30  ;;  %v5812_v30 = vld [vmem:[#allocation2 + $0xb0] sm:$0xff] }
  0x79   : > { %862 = vmatprep.subr.bf16.mxu0 %v4735_v32  ;;  %v5820_v32 = vld [vmem:[#allocation2 + $0xc0] sm:$0xff] }
  0x7a   : > { %2144 = vrot.lane.b32.xlu1 %v5730_v9, %s5367_s27 }
  0x7b   : > { %2142 = vrot.lane.b32.xlu0 %v5740_v12, %s5367_s27 }
  0x7c   : > { %863 = vmatpush1.bf16.msra.mxu0 %v4734_v36  ;;  %v5836_v36 = vld [vmem:[#allocation2 + $0xe0] sm:$0xff] }
  0x7d   : > { %864 = vmatprep.subr.bf16.mxu0 %v4737_v38  ;;  %v5842_v38 = vld [vmem:[#allocation2 + $0xf0] sm:$0xff] }
  0x7e   : > { %2148 = vrot.lane.b32.xlu1 %v5738_v11, %s5367_s27 }
  0x7f   : > { %2146 = vrot.lane.b32.xlu0 %v5748_v14, %s5367_s27 }
  0x80   : > { %865 = vmatpush1.bf16.msra.mxu0 %v4736_v43 }
  0x81   : > { %866 = vmatprep.subr.bf16.mxu0 %v4739_v45 }
  0x82   : > { %2152 = vrot.lane.b32.xlu1 %v5746_v13, %s5367_s27 }
  0x83   : > { %2150 = vrot.lane.b32.xlu0 %v5756_v16, %s5367_s27 }
  0x84   : > { %867 = vmatpush1.bf16.msra.mxu0 %v4738_v48 }
  0x85   : > { %868 = vmatprep.subr.bf16.mxu0 %v4741_v49 }
  0x86   : > { %2156 = vrot.lane.b32.xlu1 %v5754_v15, %s5367_s27 }
  0x87   : > { %2154 = vrot.lane.b32.xlu0 %v5764_v18, %s5367_s27 }
  0x88   : > { %869 = vmatpush1.bf16.msra.mxu0 %v4740_v52 }
  0x89   : > { %870 = vmatprep.subr.bf16.mxu0 %v4743_v53 }
  0x8a   : > { %2160 = vrot.lane.b32.xlu1 %v5762_v17, %s5367_s27 }
  0x8b   : > { %2158 = vrot.lane.b32.xlu0 %v5772_v20, %s5367_s27 }
  0x8c   : > { %871 = vmatpush1.bf16.msra.mxu0 %v4742_v54 }
  0x8e   : > { %2164 = vrot.lane.b32.xlu1 %v5770_v19, %s5367_s27 }
  0x8f   : > { %873 = vmatmul.mubr.bf16.vlgmr.msra.gmra.mrb[0].mxu0 %v4885_v55  ;;  %2162 = vrot.lane.b32.xlu0 %v5780_v22, %s5367_s27 }
  0x90   : > { %882 = vmatprep.mubr.bf16.mxu0 %v4888_v56 }
  0x92   : > { %2168 = vrot.lane.b32.xlu1 %v5778_v21, %s5367_s27 }
  0x93   : > { %2166 = vrot.lane.b32.xlu0 %v5788_v24, %s5367_s27 }
  0x96   : > { %2172 = vrot.lane.b32.xlu1 %v5786_v23, %s5367_s27 }
  0x97   : > { %883 = vmatmul.mubr.bf16.gmra.mrb[4].mxu0 %v4890_v57  ;;  %2170 = vrot.lane.b32.xlu0 %v5796_v26, %s5367_s27 }
  0x98   : > { %892 = vmatprep.mubr.bf16.mxu0 %v4891_v58 }
  0x9a   : > { %2176 = vrot.lane.b32.xlu1 %v5794_v25, %s5367_s27 }
  0x9b   : > { %2174 = vrot.lane.b32.xlu0 %v5804_v28, %s5367_s27 }
  0x9e   : > { %2180 = vrot.lane.b32.xlu1 %v5802_v27, %s5367_s27 }
  0x9f   : > { %893 = vmatmul.mubr.bf16.gmra.mrb[8].mxu0 %v4893_v59  ;;  %2178 = vrot.lane.b32.xlu0 %v5812_v30, %s5367_s27 }
  0xa0   : > { %902 = vmatprep.mubr.bf16.mxu0 %v4894_v60 }
  0xa2   : > { %2184 = vrot.lane.b32.xlu1 %v5810_v29, %s5367_s27 }
  0xa3   : > { %2182 = vrot.lane.b32.xlu0 %v5820_v32, %s5367_s27 }
  0xa6   : > { %2188 = vrot.lane.b32.xlu1 %v5818_v31, %s5367_s27 }
  0xa7   : > { %903 = vmatmul.mubr.bf16.gmra.mrb[12].mxu0 %v4896_v61  ;;  %2186 = vrot.lane.b32.xlu0 %v5828_v34, %s5367_s27 }
  0xa8   : > { %912 = vmatprep.mubr.bf16.mxu0 %v4897_v62 }
  0xaa   : > { %2192 = vrot.lane.b32.xlu1 %v5826_v33, %s5367_s27 }
  0xab   : > { %2190 = vrot.lane.b32.xlu0 %v5836_v36, %s5367_s27 }
  0xae   : > { %2196 = vrot.lane.b32.xlu1 %v5834_v35, %s5367_s27 }
  0xaf   : > { %913 = vmatmul.mubr.bf16.gmra.mrb[16].mxu0 %v4899_v63  ;;  %2194 = vrot.lane.b32.xlu0 %v5842_v38, %s5367_s27 }
  0xb0   : > { %922 = vmatprep.mubr.bf16.mxu0 %v4900_v0 }
  0xb2   : > { %2553 = vrot.lane.b32.xlu1 %v5718_v6, %s5368_s28 }
  0xb3   : > { %2551 = vrot.lane.b32.xlu0 %v5726_v8, %s5368_s28 }
  0xb6   : > { %2557 = vrot.lane.b32.xlu1 %v5722_v7, %s5368_s28 }
  0xb7   : > { %923 = vmatmul.mubr.bf16.gmra.mrb[20].mxu0 %v4902_v1  ;;  %2555 = vrot.lane.b32.xlu0 %v5732_v10, %s5368_s28 }
  0xb8   : > { %932 = vmatprep.mubr.bf16.mxu0 %v4903_v2 }
  0xba   : > { %2561 = vrot.lane.b32.xlu1 %v5730_v9, %s5368_s28 }
  0xbb   : > { %2559 = vrot.lane.b32.xlu0 %v5740_v12, %s5368_s28 }
  0xbe   : > { %2565 = vrot.lane.b32.xlu1 %v5738_v11, %s5368_s28 }
  0xbf   : > { %933 = vmatmul.mubr.bf16.gmra.mrb[24].mxu0 %v4905_v3  ;;  %2563 = vrot.lane.b32.xlu0 %v5748_v14, %s5368_s28 }
  0xc0   : > { %942 = vmatprep.mubr.bf16.mxu0 %v4906_v4 }
  0xc2   : > { %2569 = vrot.lane.b32.xlu1 %v5746_v13, %s5368_s28 }
  0xc3   : > { %2567 = vrot.lane.b32.xlu0 %v5756_v16, %s5368_s28 }
  0xc6   : > { %2573 = vrot.lane.b32.xlu1 %v5754_v15, %s5368_s28 }
  0xc7   : > { %943 = vmatmul.mubr.bf16.gmra.mrb[28].mxu0 %v4908_v5  ;;  %2571 = vrot.lane.b32.xlu0 %v5764_v18, %s5368_s28 }
  0xc8   : > { %1172 = vmatprep.mubr.bf16.mxu0 %v5366_v42 }
  0xca   : > { %2577 = vrot.lane.b32.xlu1 %v5762_v17, %s5368_s28 }
  0xcb   : > { %2575 = vrot.lane.b32.xlu0 %v5772_v20, %s5368_s28 }
  0xce   : > { %2581 = vrot.lane.b32.xlu1 %v5770_v19, %s5368_s28 }
  0xcf   : > { %2579 = vrot.lane.b32.xlu0 %v5780_v22, %s5368_s28 }
  0xd1   : > { %v533_v48 = vpop.permute.xlu1 %532 }
  0xd2   : > { %v523_v37 = vpop.permute.xlu0 %522  ;;  %2585 = vrot.lane.b32.xlu1 %v5778_v21, %s5368_s28 }
  0xd3   : > { %2583 = vrot.lane.b32.xlu0 %v5788_v24, %s5368_s28 }
  0xd5   : > { %v538_v59 = vpop.permute.xlu1 %537 }
  0xd6   : > { %v528_v39 = vpop.permute.xlu0 %527  ;;  %2589 = vrot.lane.b32.xlu1 %v5786_v23, %s5368_s28 }
  0xd7   : > { %2587 = vrot.lane.b32.xlu0 %v5796_v26, %s5368_s28 }
  0xda   : > { %2593 = vrot.lane.b32.xlu1 %v5794_v25, %s5368_s28 }
  0xdb   : > { %2591 = vrot.lane.b32.xlu0 %v5804_v28, %s5368_s28 }
  0xde   : > { %2597 = vrot.lane.b32.xlu1 %v5802_v27, %s5368_s28 }
  0xdf   : > { %2595 = vrot.lane.b32.xlu0 %v5812_v30, %s5368_s28 }
  0xe2   : > { %2601 = vrot.lane.b32.xlu1 %v5810_v29, %s5368_s28 }
  0xe3   : > { %2599 = vrot.lane.b32.xlu0 %v5820_v32, %s5368_s28 }
  0xe6   : > { %2605 = vrot.lane.b32.xlu1 %v5818_v31, %s5368_s28 }
  0xe7   : > { %2603 = vrot.lane.b32.xlu0 %v5828_v34, %s5368_s28 }
  0xea   : > { %2609 = vrot.lane.b32.xlu1 %v5826_v33, %s5368_s28 }
  0xeb   : > { %2607 = vrot.lane.b32.xlu0 %v5836_v36, %s5368_s28 }
  0xee   : > { %2613 = vrot.lane.b32.xlu1 %v5834_v35, %s5368_s28 }
  0xef   : > { %2611 = vrot.lane.b32.xlu0 %v5842_v38, %s5368_s28 }
  0xf2   : > { %2970 = vrot.lane.b32.xlu1 %v5718_v6, %s5369_s29  ;;  %v4911_v6 = vld [vmem:[%s8707_s3 + $0x8] sm:$0xff]  }
  0xf3   : > { %2968 = vrot.lane.b32.xlu0 %v5726_v8, %s5369_s29  ;;  %v4913_v8 = vld [vmem:[%s8707_s3 + $0x20] sm:$0xff]  }
  0xf6   : > { %2974 = vrot.lane.b32.xlu1 %v5722_v7, %s5369_s29  ;;  %v4912_v7 = vld [vmem:[%s8707_s3 + $0x18] sm:$0xff]  }
  0xf7   : > { %2972 = vrot.lane.b32.xlu0 %v5732_v10, %s5369_s29  ;;  %v4915_v10 = vld [vmem:[%s8707_s3 + $0x30] sm:$0xff]  }
  0xfa   : > { %2978 = vrot.lane.b32.xlu1 %v5730_v9, %s5369_s29  ;;  %v4914_v9 = vld [vmem:[%s8707_s3 + $0x28] sm:$0xff]  }
  0xfb   : > { %2976 = vrot.lane.b32.xlu0 %v5740_v12, %s5369_s29  ;;  %v4917_v12 = vld [vmem:[%s8707_s3 + $0x40] sm:$0xff]  }
  0xfe   : > { %2982 = vrot.lane.b32.xlu1 %v5738_v11, %s5369_s29  ;;  %v4916_v11 = vld [vmem:[%s8707_s3 + $0x38] sm:$0xff]  }
  0xff   : > { %2980 = vrot.lane.b32.xlu0 %v5748_v14, %s5369_s29  ;;  %v4919_v14 = vld [vmem:[%s8707_s3 + $0x50] sm:$0xff]  }
 0x102   : > { %2986 = vrot.lane.b32.xlu1 %v5746_v13, %s5369_s29  ;;  %v4918_v13 = vld [vmem:[%s8707_s3 + $0x48] sm:$0xff]  }
 0x103   : > { %2984 = vrot.lane.b32.xlu0 %v5756_v16, %s5369_s29 }
 0x106   : > { %2990 = vrot.lane.b32.xlu1 %v5754_v15, %s5369_s29 }
 0x107   : > { %2988 = vrot.lane.b32.xlu0 %v5764_v18, %s5369_s29 }
 0x10a   : > { %2994 = vrot.lane.b32.xlu1 %v5762_v17, %s5369_s29  ;;  %v4920_v17 = vld [vmem:[%s8707_s3 + $0x58] sm:$0xff]  }
 0x10b   : > { %2992 = vrot.lane.b32.xlu0 %v5772_v20, %s5369_s29  ;;  %v4921_v20 = vld [vmem:[%s8707_s3 + $0x60] sm:$0xff]  }
 0x10e   : > { %2998 = vrot.lane.b32.xlu1 %v5770_v19, %s5369_s29 }
 0x10f   : > { %2996 = vrot.lane.b32.xlu0 %v5780_v22, %s5369_s29 }
 0x112   : > { %3002 = vrot.lane.b32.xlu1 %v5778_v21, %s5369_s29 }
 0x113   : > { %3000 = vrot.lane.b32.xlu0 %v5788_v24, %s5369_s29 }
 0x116   : > { %3006 = vrot.lane.b32.xlu1 %v5786_v23, %s5369_s29  ;;  %v4922_v23 = vld [vmem:[%s8707_s3 + $0x68] sm:$0xff]  }
 0x117   : > { %3004 = vrot.lane.b32.xlu0 %v5796_v26, %s5369_s29 }
 0x11a   : > { %3010 = vrot.lane.b32.xlu1 %v5794_v25, %s5369_s29 }
 0x11b   : > { %3008 = vrot.lane.b32.xlu0 %v5804_v28, %s5369_s29  ;;  %v4923_v28 = vld [vmem:[%s8707_s3 + $0x70] sm:$0xff]  }
 0x162   : > { %v874_v40 = vpop.f32.mrb[0].mxu0 }
 0x163   : > { %v875_v41 = vadd.f32 %v874_v40, %v523_v37  ;;  %v876_v43 = vpop.f32.mrb[1].mxu0 }
 0x164   : > { %v877_v44 = vadd.f32 %v876_v43, %v523_v37  ;;  %v878_v45 = vpop.f32.mrb[2].mxu0  ;;  %v543_v37 = vpop.permute.xlu0 %542  ;;  %3012 = vrot.lane.b32.xlu0 %v5812_v30, %s5369_s29 }
 0x165   : > { %v879_v46 = vadd.f32 %v878_v45, %v528_v39  ;;  %v880_v47 = vpop.f32.mrb[3].mxu0  ;;  %v953_v50 = vmax.f32 %v875_v41, 0.0 }
 0x166   : > { %v881_v49 = vadd.f32 %v880_v47, %v528_v39  ;;  %v954_v52 = vmax.f32 %v877_v44, 0.0  ;;  %v548_v44 = vpop.permute.xlu1 %547  ;;  %3014 = vrot.lane.b32.xlu1 %v5802_v27, %s5369_s29 }
 0x167   : > { %v955_v51 = vmax.f32 %v879_v46, 0.0 }
 0x168   : > { %v956_v53 = vmax.f32 %v881_v49, 0.0 }
 0x169   : > { %v1017_v54 = vpack.c.bf16 %v955_v51, %v953_v50 }
 0x16a   : > { %v1018_v55 = vpack.c.bf16 %v956_v53, %v954_v52  ;;  %v884_v56 = vpop.f32.mrb[4].mxu0 }
 0x16b   : > { %v885_v57 = vadd.f32 %v884_v56, %v533_v48  ;;  %v886_v58 = vpop.f32.mrb[5].mxu0 }
 0x16c   : > { %v887_v60 = vadd.f32 %v886_v58, %v533_v48  ;;  %v888_v61 = vpop.f32.mrb[6].mxu0  ;;  %1140 = vmatprep.subr.bf16.mxu0 %v1018_v55  ;;  %4766 = vmatprep.subr.bf16.mxu1 %v1018_v55  ;;  %v553_v55 = vpop.permute.xlu0 %552 }
 0x16d   : > { %v889_v62 = vadd.f32 %v888_v61, %v538_v59  ;;  %v890_v63 = vpop.f32.mrb[7].mxu0  ;;  %1141 = vmatpush1.bf16.msra.mxu0 %v1017_v54  ;;  %4774 = vmatpush1.bf16.msra.mxu1 %v1017_v54  ;;  %v957_v1 = vmax.f32 %v885_v57, 0.0 }
 0x16e   : > { %v891_v0 = vadd.f32 %v890_v63, %v538_v59  ;;  %v958_v3 = vmax.f32 %v887_v60, 0.0  ;;  %v558_v60 = vpop.permute.xlu1 %557  ;;  %3018 = vrot.lane.b32.xlu1 %v5810_v29, %s5369_s29  ;;  %3016 = vrot.lane.b32.xlu0 %v5820_v32, %s5369_s29 }
 0x16f   : > { %v959_v2 = vmax.f32 %v889_v62, 0.0 }
 0x170   : > { %v960_v4 = vmax.f32 %v891_v0, 0.0 }
 0x171   : > { %v1019_v5 = vpack.c.bf16 %v959_v2, %v957_v1 }
 0x172   : > { %v1020_v39 = vpack.c.bf16 %v960_v4, %v958_v3  ;;  %v894_v40 = vpop.f32.mrb[8].mxu0 }
 0x173   : > { %v895_v41 = vadd.f32 %v894_v40, %v543_v37  ;;  %v896_v43 = vpop.f32.mrb[9].mxu0 }
 0x174   : > { %v897_v45 = vadd.f32 %v896_v43, %v543_v37  ;;  %v898_v46 = vpop.f32.mrb[10].mxu0  ;;  %1142 = vmatprep.subr.bf16.mxu0 %v1020_v39  ;;  %4767 = vmatprep.subr.bf16.mxu1 %v1020_v39  ;;  %v563_v39 = vpop.permute.xlu0 %562 }
 0x175   : > { %v899_v47 = vadd.f32 %v898_v46, %v548_v44  ;;  %v900_v48 = vpop.f32.mrb[11].mxu0  ;;  %1143 = vmatpush1.bf16.msra.mxu0 %v1019_v5  ;;  %4775 = vmatpush1.bf16.msra.mxu1 %v1019_v5  ;;  %v961_v50 = vmax.f32 %v895_v41, 0.0 }
 0x176   : > { %v901_v49 = vadd.f32 %v900_v48, %v548_v44  ;;  %v962_v52 = vmax.f32 %v897_v45, 0.0  ;;  %v568_v45 = vpop.permute.xlu1 %567  ;;  %3022 = vrot.lane.b32.xlu1 %v5818_v31, %s5369_s29  ;;  %3020 = vrot.lane.b32.xlu0 %v5828_v34, %s5369_s29  ;;  %v4924_v31 = vld [vmem:[%s8707_s3 + $0x78] sm:$0xff]  }
 0x177   : > { %v963_v51 = vmax.f32 %v899_v47, 0.0 }
 0x178   : > { %v964_v53 = vmax.f32 %v901_v49, 0.0 }
 0x179   : > { %v1021_v54 = vpack.c.bf16 %v963_v51, %v961_v50 }
 0x17a   : > { %v1022_v56 = vpack.c.bf16 %v964_v53, %v962_v52  ;;  %v904_v57 = vpop.f32.mrb[12].mxu0 }
 0x17b   : > { %v905_v58 = vadd.f32 %v904_v57, %v553_v55  ;;  %v906_v59 = vpop.f32.mrb[13].mxu0 }
 0x17c   : > { %v907_v61 = vadd.f32 %v906_v59, %v553_v55  ;;  %v908_v62 = vpop.f32.mrb[14].mxu0  ;;  %1144 = vmatprep.subr.bf16.mxu0 %v1022_v56  ;;  %4768 = vmatprep.subr.bf16.mxu1 %v1022_v56  ;;  %v573_v56 = vpop.permute.xlu0 %572 }
 0x17d   : > { %v909_v63 = vadd.f32 %v908_v62, %v558_v60  ;;  %v910_v0 = vpop.f32.mrb[15].mxu0  ;;  %1145 = vmatpush1.bf16.msra.mxu0 %v1021_v54  ;;  %4776 = vmatpush1.bf16.msra.mxu1 %v1021_v54  ;;  %v965_v2 = vmax.f32 %v905_v58, 0.0 }
 0x17e   : > { %v911_v1 = vadd.f32 %v910_v0, %v558_v60  ;;  %v966_v4 = vmax.f32 %v907_v61, 0.0  ;;  %v578_v61 = vpop.permute.xlu1 %577  ;;  %3026 = vrot.lane.b32.xlu1 %v5826_v33, %s5369_s29  ;;  %3024 = vrot.lane.b32.xlu0 %v5836_v36, %s5369_s29 }
 0x17f   : > { %v967_v3 = vmax.f32 %v909_v63, 0.0 }
 0x180   : > { %v968_v5 = vmax.f32 %v911_v1, 0.0 }
 0x181   : > { %v1023_v37 = vpack.c.bf16 %v967_v3, %v965_v2 }
 0x182   : > { %v1024_v40 = vpack.c.bf16 %v968_v5, %v966_v4  ;;  %v914_v41 = vpop.f32.mrb[16].mxu0 }
 0x183   : > { %v915_v43 = vadd.f32 %v914_v41, %v563_v39  ;;  %v916_v44 = vpop.f32.mrb[17].mxu0 }
 0x184   : > { %v917_v46 = vadd.f32 %v916_v44, %v563_v39  ;;  %v918_v47 = vpop.f32.mrb[18].mxu0  ;;  %1146 = vmatprep.subr.bf16.mxu0 %v1024_v40  ;;  %4769 = vmatprep.subr.bf16.mxu1 %v1024_v40  ;;  %v583_v40 = vpop.permute.xlu0 %582 }
 0x185   : > { %v919_v48 = vadd.f32 %v918_v47, %v568_v45  ;;  %v920_v49 = vpop.f32.mrb[19].mxu0  ;;  %1147 = vmatpush1.bf16.msra.mxu0 %v1023_v37  ;;  %4777 = vmatpush1.bf16.msra.mxu1 %v1023_v37  ;;  %v969_v51 = vmax.f32 %v915_v43, 0.0 }
 0x186   : > { %v921_v50 = vadd.f32 %v920_v49, %v568_v45  ;;  %v970_v53 = vmax.f32 %v917_v46, 0.0  ;;  %v588_v46 = vpop.permute.xlu1 %587  ;;  %3030 = vrot.lane.b32.xlu1 %v5834_v35, %s5369_s29  ;;  %3028 = vrot.lane.b32.xlu0 %v5842_v38, %s5369_s29 }
 0x187   : > { %v971_v52 = vmax.f32 %v919_v48, 0.0 }
 0x188   : > { %v972_v54 = vmax.f32 %v921_v50, 0.0 }
 0x189   : > { %v1025_v55 = vpack.c.bf16 %v971_v52, %v969_v51 }
 0x18a   : > { %v1026_v57 = vpack.c.bf16 %v972_v54, %v970_v53  ;;  %v924_v58 = vpop.f32.mrb[20].mxu0 }
 0x18b   : > { %v925_v59 = vadd.f32 %v924_v58, %v573_v56  ;;  %v926_v60 = vpop.f32.mrb[21].mxu0 }
 0x18c   : > { %v927_v62 = vadd.f32 %v926_v60, %v573_v56  ;;  %v928_v63 = vpop.f32.mrb[22].mxu0  ;;  %1148 = vmatprep.subr.bf16.mxu0 %v1026_v57  ;;  %4770 = vmatprep.subr.bf16.mxu1 %v1026_v57  ;;  %v593_v57 = vpop.permute.xlu0 %592 }
 0x18d   : > { %v929_v0 = vadd.f32 %v928_v63, %v578_v61  ;;  %v930_v1 = vpop.f32.mrb[23].mxu0  ;;  %1149 = vmatpush1.bf16.msra.mxu0 %v1025_v55  ;;  %4778 = vmatpush1.bf16.msra.mxu1 %v1025_v55  ;;  %v973_v3 = vmax.f32 %v925_v59, 0.0 }
 0x18e   : > { %v931_v2 = vadd.f32 %v930_v1, %v578_v61  ;;  %v974_v5 = vmax.f32 %v927_v62, 0.0  ;;  %v598_v62 = vpop.permute.xlu1 %597 }
 0x18f   : > { %v975_v4 = vmax.f32 %v929_v0, 0.0 }
 0x190   : > { %v976_v37 = vmax.f32 %v931_v2, 0.0  ;;  %v6019_v16 = vpop.permute.xlu0 %2134 }
 0x191   : > { %v1027_v39 = vpack.c.bf16 %v975_v4, %v973_v3  ;;  %8812 = vst [vmem:[#allocation5_spill] sm:$0xff] %v6019_v16 }
 0x192   : > { %v1028_v41 = vpack.c.bf16 %v976_v37, %v974_v5  ;;  %v934_v43 = vpop.f32.mrb[24].mxu0  ;;  %v6017_v15 = vpop.permute.xlu1 %2136 }
 0x193   : > { %v935_v44 = vadd.f32 %v934_v43, %v583_v40  ;;  %v936_v45 = vpop.f32.mrb[25].mxu0  ;;  %v4909_v43 = vld [vmem:[%s8707_s3] sm:$0xff]   ;;  %8811 = vst [vmem:[#allocation4_spill] sm:$0xff] %v6017_v15 }
 0x194   : > { %v937_v47 = vadd.f32 %v936_v45, %v583_v40  ;;  %v938_v48 = vpop.f32.mrb[26].mxu0  ;;  %1150 = vmatprep.subr.bf16.mxu0 %v1028_v41  ;;  %4771 = vmatprep.subr.bf16.mxu1 %v1028_v41  ;;  %v6026_v19 = vpop.permute.xlu0 %2138 }
 0x195   : > { %v939_v49 = vadd.f32 %v938_v48, %v588_v46  ;;  %v940_v50 = vpop.f32.mrb[27].mxu0  ;;  %1151 = vmatpush1.bf16.msra.mxu0 %v1027_v39  ;;  %4779 = vmatpush1.bf16.msra.mxu1 %v1027_v39  ;;  %v977_v52 = vmax.f32 %v935_v44, 0.0  ;;  %v4910_v44 = vld [vmem:[%s8707_s3 + $0x10] sm:$0xff]   ;;  %8814 = vst [vmem:[#allocation7_spill] sm:$0xff] %v6026_v19 }
 0x196   : > { %v941_v51 = vadd.f32 %v940_v50, %v588_v46  ;;  %v978_v54 = vmax.f32 %v937_v47, 0.0  ;;  %v6024_v18 = vpop.permute.xlu1 %2140 }
 0x197   : > { %v979_v53 = vmax.f32 %v939_v49, 0.0  ;;  %8813 = vst [vmem:[#allocation6_spill] sm:$0xff] %v6024_v18 }
 0x198   : > { %v980_v55 = vmax.f32 %v941_v51, 0.0  ;;  %v6034_v22 = vpop.permute.xlu0 %2142 }
 0x199   : > { %v1029_v56 = vpack.c.bf16 %v979_v53, %v977_v52  ;;  %8816 = vst [vmem:[#allocation9_spill] sm:$0xff] %v6034_v22 }
 0x19a   : > { %v1030_v58 = vpack.c.bf16 %v980_v55, %v978_v54  ;;  %v944_v59 = vpop.f32.mrb[28].mxu0  ;;  %v6032_v21 = vpop.permute.xlu1 %2144 }
 0x19b   : > { %v945_v60 = vadd.f32 %v944_v59, %v593_v57  ;;  %v946_v61 = vpop.f32.mrb[29].mxu0  ;;  %8815 = vst [vmem:[#allocation8_spill] sm:$0xff] %v6032_v21 }
 0x19c   : > { %v947_v63 = vadd.f32 %v946_v61, %v593_v57  ;;  %v948_v0 = vpop.f32.mrb[30].mxu0  ;;  %1152 = vmatprep.subr.bf16.mxu0 %v1030_v58  ;;  %4772 = vmatprep.subr.bf16.mxu1 %v1030_v58  ;;  %v6042_v25 = vpop.permute.xlu0 %2146 }
 0x19d   : > { %v949_v1 = vadd.f32 %v948_v0, %v598_v62  ;;  %v950_v2 = vpop.f32.mrb[31].mxu0  ;;  %1153 = vmatpush1.bf16.msra.mxu0 %v1029_v56  ;;  %4780 = vmatpush1.bf16.msra.mxu1 %v1029_v56  ;;  %v981_v4 = vmax.f32 %v945_v60, 0.0  ;;  %8818 = vst [vmem:[#allocation11_spill] sm:$0xff] %v6042_v25 }
 0x19e   : > { %v951_v3 = vadd.f32 %v950_v2, %v598_v62  ;;  %v982_v37 = vmax.f32 %v947_v63, 0.0  ;;  %v6040_v24 = vpop.permute.xlu1 %2148 }
 0x19f   : > { %v983_v5 = vmax.f32 %v949_v1, 0.0  ;;  %8817 = vst [vmem:[#allocation10_spill] sm:$0xff] %v6040_v24 }
 0x1a0   : > { %v984_v39 = vmax.f32 %v951_v3, 0.0  ;;  %v6047_v27 = vpop.permute.xlu0 %2150 }
 0x1a1   : > { %v1031_v40 = vpack.c.bf16 %v983_v5, %v981_v4  ;;  %8820 = vst [vmem:[#allocation13_spill] sm:$0xff] %v6047_v27  ;;  %v1033_v4 = vlaneseq }
 0x1a2   : > { %v1032_v41 = vpack.c.bf16 %v984_v39, %v982_v37  ;;  %v6045_v26 = vpop.permute.xlu1 %2152 }
 0x1a3   : > { %8819 = vst [vmem:[#allocation12_spill] sm:$0xff] %v6045_v26  ;;  %v1034_v39 = vand.u32 127, %v1033_v4 }
 0x1a4   : > { %1154 = vmatprep.subr.bf16.mxu0 %v1032_v41  ;;  %4773 = vmatprep.subr.bf16.mxu1 %v1032_v41  ;;  %v6054_v30 = vpop.permute.xlu0 %2154 }
 0x1a5   : > { %1155 = vmatpush1.bf16.msra.mxu0 %v1031_v40  ;;  %4781 = vmatpush1.bf16.msra.mxu1 %v1031_v40  ;;  %8822 = vst [vmem:[#allocation15_spill] sm:$0xff] %v6054_v30 }
 0x1a6   : > { %v6052_v29 = vpop.permute.xlu1 %2156 }
 0x1a7   : > { %8821 = vst [vmem:[#allocation14_spill] sm:$0xff] %v6052_v29 }
 0x1a8   : > { %1173 = vmatmul.mubr.bf16.vlgmr.msra.gmra.mrb[32].mxu0 %v4909_v43  ;;  %1193 = vmatmul.mubr.bf16.vlgmr.msra.gmra.mrb[0].mxu1 %v4910_v44  ;;  %v6062_v33 = vpop.permute.xlu0 %2158  ;;  %v1037_v43 = vstv %s4744_s12  ;;  %v1035_v44 = vadd.s32 128, %v1034_v39 }
 0x1a9   : > { %1182 = vmatprep.mubr.bf16.mxu0 %v5366_v42  ;;  %1202 = vmatprep.mubr.bf16.mxu1 %v5366_v42  ;;  %8824 = vst [vmem:[#allocation17_spill] sm:$0xff] %v6062_v33 }
 0x1aa   : > { %v6060_v32 = vpop.permute.xlu1 %2160 }
 0x1ab   : > { %8823 = vst [vmem:[#allocation16_spill] sm:$0xff] %v6060_v32 }
 0x1ac   : > { %v6066_v35 = vpop.permute.xlu0 %2162 }
 0x1ad   : > { %8826 = vst [vmem:[#allocation19_spill] sm:$0xff] %v6066_v35 }
 0x1ae   : > { %v6064_v34 = vpop.permute.xlu1 %2164 }
 0x1af   : > { %8825 = vst [vmem:[#allocation18_spill] sm:$0xff] %v6064_v34 }
 0x1b0   : > { %1183 = vmatmul.mubr.bf16.gmra.mrb[36].mxu0 %v4911_v6  ;;  %1203 = vmatmul.mubr.bf16.gmra.mrb[4].mxu1 %v4912_v7  ;;  %v6070_v38 = vpop.permute.xlu0 %2166  ;;  %v1038_v6 = vadd.s32 %v1037_v43, %v1034_v39  ;;  %v1039_v7 = vadd.s32 %v1037_v43, %v1035_v44 }
 0x1b1   : > { %1212 = vmatprep.mubr.bf16.mxu1 %v5366_v42  ;;  %8828 = vst [vmem:[#allocation21_spill] sm:$0xff] %v6070_v38 }
 0x1b2   : > { %v6068_v36 = vpop.permute.xlu1 %2168  ;;  %vm1040_vm2 = vcmp.lt.s32.totalorder %v1038_v6, 300  ;;  %vm1041_vm3 = vcmp.lt.s32.totalorder %v1039_v7, 300 }
 0x1b3   : > { %8827 = vst [vmem:[#allocation20_spill] sm:$0xff] %v6068_v36 }
 0x1b6   : > { %v6072_v45 = vpop.permute.xlu1 %2172 }
 0x1b7   : > { %8829 = vst [vmem:[#allocation22_spill] sm:$0xff] %v6072_v45 }
 0x1b8   : > { %1213 = vmatmul.mubr.bf16.gmra.mrb[8].mxu1 %v4913_v8 }
 0x1b9   : > { %1222 = vmatprep.mubr.bf16.mxu1 %v5366_v42 }
 0x1ba   : > { %v6076_v46 = vpop.permute.xlu1 %2176 }
 0x1bb   : > { %8831 = vst [vmem:[#allocation24_spill] sm:$0xff] %v6076_v46 }
 0x1be   : > { %v6080_v48 = vpop.permute.xlu1 %2180 }
 0x1bf   : > { %8833 = vst [vmem:[#allocation26_spill] sm:$0xff] %v6080_v48 }
 0x1c0   : > { %1223 = vmatmul.mubr.bf16.gmra.mrb[12].mxu1 %v4914_v9 }
 0x1c1   : > { %1232 = vmatprep.mubr.bf16.mxu1 %v5366_v42 }
 0x1c2   : > { %v6084_v50 = vpop.permute.xlu1 %2184 }
 0x1c3   : > { %8835 = vst [vmem:[#allocation28_spill] sm:$0xff] %v6084_v50 }
 0x1c6   : > { %v6088_v52 = vpop.permute.xlu1 %2188 }
 0x1c7   : > { %8837 = vst [vmem:[#allocation30_spill] sm:$0xff] %v6088_v52 }
 0x1c8   : > { %1233 = vmatmul.mubr.bf16.gmra.mrb[16].mxu1 %v4915_v10  ;;  %v5370_v10 = vmov -3.4028235e+38  }
 0x1c9   : > { %1242 = vmatprep.mubr.bf16.mxu1 %v5366_v42 }
 0x1ca   : > { %v6092_v54 = vpop.permute.xlu1 %2192 }
 0x1cb   : > { %8839 = vst [vmem:[#allocation32_spill] sm:$0xff] %v6092_v54 }
 0x1ce   : > { %v6096_v56 = vpop.permute.xlu1 %2196 }
 0x1cf   : > { %8841 = vst [vmem:[#allocation34_spill] sm:$0xff] %v6096_v56 }
 0x1d0   : > { %1243 = vmatmul.mubr.bf16.gmra.mrb[20].mxu1 %v4916_v11  ;;  %v6133_v11 = vsel %vm1040_vm2, 0.0, %v5370_v10 }
 0x1d1   : > { %1252 = vmatprep.mubr.bf16.mxu1 %v5366_v42 }
 0x1d2   : > { %v6100_v58 = vpop.permute.xlu1 %2553 }
 0x1d3   : > { %8843 = vst [vmem:[#allocation36_spill] sm:$0xff] %v6100_v58 }
 0x1d6   : > { %v6104_v60 = vpop.permute.xlu1 %2557 }
 0x1d7   : > { %8845 = vst [vmem:[#allocation38_spill] sm:$0xff] %v6104_v60 }
 0x1d8   : > { %1253 = vmatmul.mubr.bf16.gmra.mrb[24].mxu1 %v4917_v12 }
 0x1d9   : > { %1262 = vmatprep.mubr.bf16.mxu1 %v5366_v42 }
 0x1da   : > { %v6108_v62 = vpop.permute.xlu1 %2561 }
 0x1db   : > { %8847 = vst [vmem:[#allocation40_spill] sm:$0xff] %v6108_v62 }
 0x1de   : > { %v6112_v0 = vpop.permute.xlu1 %2565 }
 0x1df   : > { %8849 = vst [vmem:[#allocation42_spill] sm:$0xff] %v6112_v0 }
 0x1e0   : > { %1263 = vmatmul.mubr.bf16.gmra.mrb[28].mxu1 %v4918_v13  ;;  %v6137_v13 = vsel %vm1041_vm3, 0.0, %v5370_v10 }
 0x1e1   : > { %1272 = vmatprep.mubr.bf16.mxu1 %v5366_v42 }
 0x1e2   : > { %v6116_v2 = vpop.permute.xlu1 %2569 }
 0x1e3   : > { %8851 = vst [vmem:[#allocation44_spill] sm:$0xff] %v6116_v2 }
 0x1e6   : > { %v6120_v5 = vpop.permute.xlu1 %2573 }
 0x1e7   : > { %8853 = vst [vmem:[#allocation46_spill] sm:$0xff] %v6120_v5 }
 0x1e8   : > { %1273 = vmatmul.mubr.bf16.gmra.mrb[32].mxu1 %v4919_v14 }
 0x1e9   : > { %1282 = vmatprep.mubr.bf16.mxu1 %v5366_v42 }
 0x1ea   : > { %v6125_v40 = vpop.permute.xlu1 %2577 }
 0x1eb   : > { %8855 = vst [vmem:[#allocation48_spill] sm:$0xff] %v6125_v40 }
 0x1ee   : > { %v6129_v8 = vpop.permute.xlu1 %2581 }
 0x1ef   : > { %8857 = vst [vmem:[#allocation50_spill] sm:$0xff] %v6129_v8 }
 0x1f0   : > { %1283 = vmatmul.mubr.bf16.gmra.mrb[36].mxu1 %v4920_v17 }
 0x1f1   : > { %1292 = vmatprep.mubr.bf16.mxu1 %v5366_v42 }
 0x1f2   : > { %v6135_v12 = vpop.permute.xlu1 %2585 }
 0x1f3   : > { %8859 = vst [vmem:[#allocation52_spill] sm:$0xff] %v6135_v12 }
 0x1f8   : > { %1293 = vmatmul.mubr.bf16.gmra.mrb[40].mxu1 %v4921_v20 }
 0x1f9   : > { %1302 = vmatprep.mubr.bf16.mxu1 %v5366_v42 }
 0x200   : > { %1303 = vmatmul.mubr.bf16.gmra.mrb[44].mxu1 %v4922_v23 }
 0x201   : > { %1312 = vmatprep.mubr.bf16.mxu1 %v5366_v42 }
 0x208   : > { %1313 = vmatmul.mubr.bf16.gmra.mrb[48].mxu1 %v4923_v28 }
 0x209   : > { %1322 = vmatprep.mubr.bf16.mxu1 %v5366_v42  ;;  %v6074_v42 = vpop.permute.xlu0 %2170 }
 0x20a   : > { %8830 = vst [vmem:[#allocation23_spill] sm:$0xff] %v6074_v42 }
 0x20d   : > { %v6078_v47 = vpop.permute.xlu0 %2174 }
 0x20e   : > { %8832 = vst [vmem:[#allocation25_spill] sm:$0xff] %v6078_v47 }
 0x210   : > { %1323 = vmatmul.mubr.bf16.gmra.mrb[52].mxu1 %v4924_v31 }
 0x211   : > { %v6082_v49 = vpop.permute.xlu0 %2178 }
 0x212   : > { %8834 = vst [vmem:[#allocation27_spill] sm:$0xff] %v6082_v49 }
 0x215   : > { %v6086_v51 = vpop.permute.xlu0 %2182 }
 0x216   : > { %8836 = vst [vmem:[#allocation29_spill] sm:$0xff] %v6086_v51 }
 0x219   : > { %v6090_v53 = vpop.permute.xlu0 %2186 }
 0x21a   : > { %8838 = vst [vmem:[#allocation31_spill] sm:$0xff] %v6090_v53 }
 0x21d   : > { %v6094_v55 = vpop.permute.xlu0 %2190 }
 0x21e   : > { %8840 = vst [vmem:[#allocation33_spill] sm:$0xff] %v6094_v55 }
 0x221   : > { %v6098_v57 = vpop.permute.xlu0 %2194 }
 0x222   : > { %8842 = vst [vmem:[#allocation35_spill] sm:$0xff] %v6098_v57 }
 0x225   : > { %v6102_v59 = vpop.permute.xlu0 %2551 }
 0x226   : > { %8844 = vst [vmem:[#allocation37_spill] sm:$0xff] %v6102_v59 }
 0x229   : > { %v6106_v61 = vpop.permute.xlu0 %2555 }
 0x22a   : > { %8846 = vst [vmem:[#allocation39_spill] sm:$0xff] %v6106_v61 }
 0x22d   : > { %v6110_v63 = vpop.permute.xlu0 %2559 }
 0x22e   : > { %8848 = vst [vmem:[#allocation41_spill] sm:$0xff] %v6110_v63 }
 0x231   : > { %v6114_v1 = vpop.permute.xlu0 %2563 }
 0x232   : > { %8850 = vst [vmem:[#allocation43_spill] sm:$0xff] %v6114_v1 }
 0x235   : > { %v6118_v3 = vpop.permute.xlu0 %2567 }
 0x236   : > { %8852 = vst [vmem:[#allocation45_spill] sm:$0xff] %v6118_v3 }
 0x239   : > { %v6122_v37 = vpop.permute.xlu0 %2571 }
 0x23a   : > { %8854 = vst [vmem:[#allocation47_spill] sm:$0xff] %v6122_v37 }
 0x23d   : > { %v6127_v41 = vpop.permute.xlu0 %2575 }
 0x23e   : > { %8856 = vst [vmem:[#allocation49_spill] sm:$0xff] %v6127_v41 }
 0x241   : > { %v6131_v9 = vpop.permute.xlu0 %2579 }
 0x242   : > { %8858 = vst [vmem:[#allocation51_spill] sm:$0xff] %v6131_v9 }
 0x245   : > { %v6139_v14 = vpop.permute.xlu0 %2583 }
 0x246   : > { %8860 = vst [vmem:[#allocation53_spill] sm:$0xff] %v6139_v14 }
 0x27b   : > { %v1174_v17 = vpop.f32.mrb[32].mxu0  ;;  %v1194_v20 = vpop.f32.mrb[0].mxu1 }
 0x27c   : > { %v6142_v23 = vadd.f32 %v1174_v17, %v6133_v11  ;;  %v6145_v28 = vadd.f32 %v1194_v20, %v6133_v11  ;;  %v1176_v31 = vpop.f32.mrb[33].mxu0  ;;  %v1196_v4 = vpop.f32.mrb[1].mxu1 }
 0x27d   : > { %v6148_v39 = vadd.f32 %v1176_v31, %v6137_v13  ;;  %v6151_v43 = vadd.f32 %v1196_v4, %v6137_v13  ;;  %v1178_v44 = vpop.f32.mrb[34].mxu0  ;;  %v1198_v6 = vpop.f32.mrb[2].mxu1 }
 0x27e   : > { %v6154_v7 = vadd.f32 %v1178_v44, %v6133_v11  ;;  %v6157_v10 = vadd.f32 %v1198_v6, %v6133_v11  ;;  %v1180_v17 = vpop.f32.mrb[35].mxu0  ;;  %v1200_v57 = vpop.f32.mrb[3].mxu1 }
 0x27f   : > { %v1365_v20 = vmax.f32 %v6142_v23, %v6148_v39  ;;  %v1377_v31 = vmax.f32 %v6145_v28, %v6151_v43  ;;  %v6164_v56 = vadd.f32 %v1180_v17, %v6137_v13  ;;  %v6167_v4 = vadd.f32 %v1200_v57, %v6137_v13  ;;  %v6169_v44 = vpop.permute.xlu1 %2589  ;;  %v6171_v6 = vpop.permute.xlu0 %2587 }
 0x280   : > { %8861 = vst [vmem:[#allocation54_spill] sm:$0xff] %v6169_v44  ;;  %8862 = vst [vmem:[#allocation55_spill] sm:$0xff] %v6171_v6 }
 0x281   : > { %1378 = vmax.xlane.f32.xlu1 %v1377_v31  ;;  %1366 = vmax.xlane.f32.xlu0 %v1365_v20  ;;  %v1368_v55 = vmax.f32 %v6154_v7, %v6164_v56  ;;  %v1380_v54 = vmax.f32 %v6157_v10, %v6167_v4 }
 0x283   : > { %v1184_v53 = vpop.f32.mrb[36].mxu0  ;;  %v1204_v52 = vpop.f32.mrb[4].mxu1 }
 0x284   : > { %v6178_v17 = vadd.f32 %v1184_v53, %v6133_v11  ;;  %v6181_v57 = vadd.f32 %v1204_v52, %v6133_v11  ;;  %v1186_v31 = vpop.f32.mrb[37].mxu0  ;;  %v1206_v20 = vpop.f32.mrb[5].mxu1 }
 0x285   : > { %v6184_v51 = vadd.f32 %v1186_v31, %v6137_v13  ;;  %v6187_v50 = vadd.f32 %v1206_v20, %v6137_v13  ;;  %1369 = vmax.xlane.f32.xlu1 %v1368_v55  ;;  %1381 = vmax.xlane.f32.xlu0 %v1380_v54  ;;  %v1188_v49 = vpop.f32.mrb[38].mxu0  ;;  %v1208_v48 = vpop.f32.mrb[6].mxu1 }
 0x286   : > { %v6190_v47 = vadd.f32 %v1188_v49, %v6133_v11  ;;  %v1190_v53 = vpop.f32.mrb[39].mxu0  ;;  %v1210_v46 = vpop.f32.mrb[7].mxu1  ;;  %v6204_v49 = vadd.f32 %v1208_v48, %v6133_v11 }
 0x287   : > { %v1371_v52 = vmax.f32 %v6178_v17, %v6184_v51  ;;  %v1383_v6 = vmax.f32 %v6181_v57, %v6187_v50  ;;  %v6197_v31 = vadd.f32 %v1190_v53, %v6137_v13  ;;  %v6201_v54 = vpop.permute.xlu1 %2593  ;;  %v6207_v20 = vadd.f32 %v1210_v46, %v6137_v13  ;;  %v6209_v42 = vpop.permute.xlu0 %2591 }
 0x288   : > { %8863 = vst [vmem:[#allocation56_spill] sm:$0xff] %v6201_v54  ;;  %8864 = vst [vmem:[#allocation57_spill] sm:$0xff] %v6209_v42 }
 0x289   : > { %v1374_v55 = vmax.f32 %v6190_v47, %v6197_v31  ;;  %1384 = vmax.xlane.f32.xlu1 %v1383_v6  ;;  %1372 = vmax.xlane.f32.xlu0 %v1371_v52  ;;  %v1386_v48 = vmax.f32 %v6204_v49, %v6207_v20 }
 0x28b   : > { %v1214_v44 = vpop.f32.mrb[8].mxu1 }
 0x28c   : > { %v6212_v45 = vadd.f32 %v1214_v44, %v6133_v11  ;;  %v1216_v53 = vpop.f32.mrb[9].mxu1  ;;  %v6227_v44 = vpop.permute.xlu1 %2597 }
 0x28d   : > { %v6215_v14 = vadd.f32 %v1216_v53, %v6137_v13  ;;  %1375 = vmax.xlane.f32.xlu0 %v1374_v55  ;;  %v1218_v6 = vpop.f32.mrb[10].mxu1  ;;  %8865 = vst [vmem:[#allocation58_spill] sm:$0xff] %v6227_v44  ;;  %v6229_v53 = vpop.permute.xlu0 %2595 }
 0x28e   : > { %v1220_v52 = vpop.f32.mrb[11].mxu1  ;;  %v6222_v54 = vadd.f32 %v1218_v6, %v6133_v11  ;;  %8866 = vst [vmem:[#allocation59_spill] sm:$0xff] %v6229_v53 }
 0x28f   : > { %v1389_v46 = vmax.f32 %v6212_v45, %v6215_v14  ;;  %v6225_v42 = vadd.f32 %v1220_v52, %v6137_v13 }
 0x291   : > { %1390 = vmax.xlane.f32.xlu1 %v1389_v46  ;;  %1387 = vmax.xlane.f32.xlu0 %v1386_v48  ;;  %v1392_v55 = vmax.f32 %v6222_v54, %v6225_v42  ;;  %v6242_v48 = vpop.permute.xlu1 %2601 }
 0x292   : > { %8867 = vst [vmem:[#allocation60_spill] sm:$0xff] %v6242_v48 }
 0x293   : > { %v1224_v12 = vpop.f32.mrb[12].mxu1 }
 0x294   : > { %v6234_v38 = vadd.f32 %v1224_v12, %v6133_v11  ;;  %v1226_v36 = vpop.f32.mrb[13].mxu1  ;;  %v6249_v12 = vpop.permute.xlu0 %2599 }
 0x295   : > { %v6237_v6 = vadd.f32 %v1226_v36, %v6137_v13  ;;  %v1228_v9 = vpop.f32.mrb[14].mxu1  ;;  %1393 = vmax.xlane.f32.xlu0 %v1392_v55  ;;  %8868 = vst [vmem:[#allocation61_spill] sm:$0xff] %v6249_v12  ;;  %v6256_v35 = vpop.permute.xlu1 %2605 }
 0x296   : > { %v6240_v52 = vadd.f32 %v1228_v9, %v6133_v11  ;;  %v1230_v46 = vpop.f32.mrb[15].mxu1  ;;  %8869 = vst [vmem:[#allocation62_spill] sm:$0xff] %v6256_v35 }
 0x297   : > { %v1395_v53 = vmax.f32 %v6234_v38, %v6237_v6  ;;  %v6247_v44 = vadd.f32 %v1230_v46, %v6137_v13 }
 0x298   : > { %v6261_v46 = vpop.permute.xlu0 %2603 }
 0x299   : > { %v1398_v36 = vmax.f32 %v6240_v52, %v6247_v44  ;;  %1396 = vmax.xlane.f32.xlu1 %v1395_v53  ;;  %8870 = vst [vmem:[#allocation63_spill] sm:$0xff] %v6261_v46  ;;  %v6273_v35 = vpop.permute.xlu1 %2609 }
 0x29a   : > { %8871 = vst [vmem:[#allocation64_spill] sm:$0xff] %v6273_v35 }
 0x29b   : > { %v1234_v8 = vpop.f32.mrb[16].mxu1  ;;  %1399 = vmax.xlane.f32.xlu0 %v1398_v36 }
 0x29c   : > { %v6254_v9 = vadd.f32 %v1234_v8, %v6133_v11  ;;  %v1236_v55 = vpop.f32.mrb[17].mxu1  ;;  %v6275_v40 = vpop.permute.xlu0 %2607 }
 0x29d   : > { %v6259_v48 = vadd.f32 %v1236_v55, %v6137_v13  ;;  %v1238_v34 = vpop.f32.mrb[18].mxu1  ;;  %8872 = vst [vmem:[#allocation65_spill] sm:$0xff] %v6275_v40 }
 0x29e   : > { %v6264_v12 = vadd.f32 %v1238_v34, %v6133_v11  ;;  %v1240_v41 = vpop.f32.mrb[19].mxu1 }
 0x29f   : > { %v1401_v53 = vmax.f32 %v6254_v9, %v6259_v48  ;;  %v6269_v36 = vadd.f32 %v1240_v41, %v6137_v13 }
 0x2a0   : > { %v6295_v40 = vpop.permute.xlu0 %2611 }
 0x2a1   : > { %v1404_v8 = vmax.f32 %v6264_v12, %v6269_v36  ;;  %1402 = vmax.xlane.f32.xlu1 %v1401_v53  ;;  %8874 = vst [vmem:[#allocation67_spill] sm:$0xff] %v6295_v40 }
 0x2a3   : > { %v1244_v55 = vpop.f32.mrb[20].mxu1  ;;  %1405 = vmax.xlane.f32.xlu0 %v1404_v8  ;;  %v6291_v8 = vpop.permute.xlu1 %2613 }
 0x2a4   : > { %v6278_v34 = vadd.f32 %v1244_v55, %v6133_v11  ;;  %v1246_v46 = vpop.f32.mrb[21].mxu1  ;;  %8873 = vst [vmem:[#allocation66_spill] sm:$0xff] %v6291_v8 }
 0x2a5   : > { %v6281_v33 = vadd.f32 %v1246_v46, %v6137_v13  ;;  %v1248_v32 = vpop.f32.mrb[22].mxu1 }
 0x2a6   : > { %v6284_v41 = vadd.f32 %v1248_v32, %v6133_v11  ;;  %v1250_v37 = vpop.f32.mrb[23].mxu1 }
 0x2a7   : > { %v1407_v53 = vmax.f32 %v6278_v34, %v6281_v33  ;;  %v6289_v35 = vadd.f32 %v1250_v37, %v6137_v13  ;;  %v6306_v3 = vpop.permute.xlu1 %2970 }
 0x2a8   : > { %8875 = vst [vmem:[#allocation68_spill] sm:$0xff] %v6306_v3 }
 0x2a9   : > { %v1410_v55 = vmax.f32 %v6284_v41, %v6289_v35  ;;  %1408 = vmax.xlane.f32.xlu1 %v1407_v53 }
 0x2ab   : > { %v1254_v46 = vpop.f32.mrb[24].mxu1  ;;  %1411 = vmax.xlane.f32.xlu0 %v1410_v55  ;;  %v6313_v55 = vpop.permute.xlu0 %2968 }
 0x2ac   : > { %v6298_v32 = vadd.f32 %v1254_v46, %v6133_v11  ;;  %v1256_v5 = vpop.f32.mrb[25].mxu1  ;;  %8877 = vst [vmem:[#allocation70_spill] sm:$0xff] %v6313_v55  ;;  %v6320_v27 = vpop.permute.xlu1 %2974 }
 0x2ad   : > { %v6301_v30 = vadd.f32 %v1256_v5, %v6137_v13  ;;  %v1258_v29 = vpop.f32.mrb[26].mxu1  ;;  %8878 = vst [vmem:[#allocation71_spill] sm:$0xff] %v6320_v27 }
 0x2ae   : > { %v6304_v37 = vadd.f32 %v1258_v29, %v6133_v11  ;;  %v1260_v8 = vpop.f32.mrb[27].mxu1 }
 0x2af   : > { %v1413_v53 = vmax.f32 %v6298_v32, %v6301_v30  ;;  %v6311_v40 = vadd.f32 %v1260_v8, %v6137_v13  ;;  %v6325_v8 = vpop.permute.xlu0 %2972 }
 0x2b0   : > { %8879 = vst [vmem:[#allocation72_spill] sm:$0xff] %v6325_v8  ;;  %v6337_v27 = vpop.permute.xlu1 %2978 }
 0x2b1   : > { %8876 = vst [vmem:[#allocation69_spill] sm:$0xff] %v6311_v40  ;;  %v1416_v46 = vmax.f32 %v6304_v37, %v6311_v40  ;;  %1414 = vmax.xlane.f32.xlu1 %v1413_v53  ;;  %8882 = vst [vmem:[#allocation75_spill] sm:$0xff] %v6337_v27 }
 0x2b3   : > { %v1264_v5 = vpop.f32.mrb[28].mxu1  ;;  %1417 = vmax.xlane.f32.xlu0 %v1416_v46  ;;  %v6339_v0 = vpop.permute.xlu0 %2976 }
 0x2b4   : > { %v6318_v29 = vadd.f32 %v1264_v5, %v6133_v11  ;;  %v1266_v2 = vpop.f32.mrb[29].mxu1  ;;  %8883 = vst [vmem:[#allocation76_spill] sm:$0xff] %v6339_v0 }
 0x2b5   : > { %v6323_v26 = vadd.f32 %v1266_v2, %v6137_v13  ;;  %v1268_v1 = vpop.f32.mrb[30].mxu1 }
 0x2b6   : > { %v6328_v25 = vadd.f32 %v1268_v1, %v6133_v11  ;;  %v1270_v3 = vpop.f32.mrb[31].mxu1 }
 0x2b7   : > { %v1419_v53 = vmax.f32 %v6318_v29, %v6323_v26  ;;  %v6333_v46 = vadd.f32 %v1270_v3, %v6137_v13  ;;  %v6359_v0 = vpop.permute.xlu0 %2980 }
 0x2b8   : > { %8880 = vst [vmem:[#allocation73_spill] sm:$0xff] %v6328_v25  ;;  %8889 = vst [vmem:[#allocation82_spill] sm:$0xff] %v6359_v0 }
 0x2b9   : > { %8881 = vst [vmem:[#allocation74_spill] sm:$0xff] %v6333_v46  ;;  %v1422_v5 = vmax.f32 %v6328_v25, %v6333_v46  ;;  %1420 = vmax.xlane.f32.xlu1 %v1419_v53 }
 0x2bb   : > { %v1274_v2 = vpop.f32.mrb[32].mxu1  ;;  %1423 = vmax.xlane.f32.xlu0 %v1422_v5  ;;  %v6355_v5 = vpop.permute.xlu1 %2982 }
 0x2bc   : > { %v6342_v1 = vadd.f32 %v1274_v2, %v6133_v11  ;;  %v1276_v8 = vpop.f32.mrb[33].mxu1  ;;  %8888 = vst [vmem:[#allocation81_spill] sm:$0xff] %v6355_v5 }
 0x2bd   : > { %v6345_v60 = vadd.f32 %v1276_v8, %v6137_v13  ;;  %v1278_v58 = vpop.f32.mrb[34].mxu1 }
 0x2be   : > { %8884 = vst [vmem:[#allocation77_spill] sm:$0xff] %v6342_v1  ;;  %v6348_v3 = vadd.f32 %v1278_v58, %v6133_v11  ;;  %v1280_v61 = vpop.f32.mrb[35].mxu1 }
 0x2bf   : > { %8885 = vst [vmem:[#allocation78_spill] sm:$0xff] %v6345_v60  ;;  %v1425_v53 = vmax.f32 %v6342_v1, %v6345_v60  ;;  %v6353_v63 = vadd.f32 %v1280_v61, %v6137_v13  ;;  %v6370_v22 = vpop.permute.xlu1 %2986 }
 0x2c0   : > { %8886 = vst [vmem:[#allocation79_spill] sm:$0xff] %v6348_v3  ;;  %8893 = vst [vmem:[#allocation86_spill] sm:$0xff] %v6370_v22 }
 0x2c1   : > { %8887 = vst [vmem:[#allocation80_spill] sm:$0xff] %v6353_v63  ;;  %v1428_v2 = vmax.f32 %v6348_v3, %v6353_v63  ;;  %1426 = vmax.xlane.f32.xlu1 %v1425_v53 }
 0x2c3   : > { %v1284_v8 = vpop.f32.mrb[36].mxu1  ;;  %1429 = vmax.xlane.f32.xlu0 %v1428_v2  ;;  %v6377_v2 = vpop.permute.xlu0 %2984 }
 0x2c4   : > { %v6362_v58 = vadd.f32 %v1284_v8, %v6133_v11  ;;  %v1286_v24 = vpop.f32.mrb[37].mxu1  ;;  %8895 = vst [vmem:[#allocation88_spill] sm:$0xff] %v6377_v2  ;;  %v6384_v27 = vpop.permute.xlu1 %2990 }
 0x2c5   : > { %v6365_v15 = vadd.f32 %v1286_v24, %v6137_v13  ;;  %v1288_v18 = vpop.f32.mrb[38].mxu1  ;;  %8897 = vst [vmem:[#allocation90_spill] sm:$0xff] %v6384_v27 }
 0x2c6   : > { %8890 = vst [vmem:[#allocation83_spill] sm:$0xff] %v6362_v58  ;;  %v6368_v61 = vadd.f32 %v1288_v18, %v6133_v11  ;;  %v1290_v5 = vpop.f32.mrb[39].mxu1 }
 0x2c7   : > { %8891 = vst [vmem:[#allocation84_spill] sm:$0xff] %v6365_v15  ;;  %v1431_v53 = vmax.f32 %v6362_v58, %v6365_v15  ;;  %v6375_v0 = vadd.f32 %v1290_v5, %v6137_v13  ;;  %v6389_v5 = vpop.permute.xlu0 %2988 }
 0x2c8   : > { %8892 = vst [vmem:[#allocation85_spill] sm:$0xff] %v6368_v61  ;;  %8899 = vst [vmem:[#allocation92_spill] sm:$0xff] %v6389_v5  ;;  %v6401_v27 = vpop.permute.xlu1 %2994 }
 0x2c9   : > { %8894 = vst [vmem:[#allocation87_spill] sm:$0xff] %v6375_v0  ;;  %v1434_v8 = vmax.f32 %v6368_v61, %v6375_v0  ;;  %1432 = vmax.xlane.f32.xlu1 %v1431_v53  ;;  %8902 = vst [vmem:[#allocation95_spill] sm:$0xff] %v6401_v27 }
 0x2cb   : > { %v1294_v24 = vpop.f32.mrb[40].mxu1  ;;  %1435 = vmax.xlane.f32.xlu0 %v1434_v8  ;;  %v6403_v59 = vpop.permute.xlu0 %2992 }
 0x2cc   : > { %v6382_v18 = vadd.f32 %v1294_v24, %v6133_v11  ;;  %v1296_v19 = vpop.f32.mrb[41].mxu1  ;;  %8903 = vst [vmem:[#allocation96_spill] sm:$0xff] %v6403_v59 }
 0x2cd   : > { %v6387_v22 = vadd.f32 %v1296_v19, %v6137_v13  ;;  %v1298_v55 = vpop.f32.mrb[42].mxu1 }
 0x2ce   : > { %8896 = vst [vmem:[#allocation89_spill] sm:$0xff] %v6382_v18  ;;  %v6392_v2 = vadd.f32 %v1298_v55, %v6133_v11  ;;  %v1300_v62 = vpop.f32.mrb[43].mxu1 }
 0x2cf   : > { %8898 = vst [vmem:[#allocation91_spill] sm:$0xff] %v6387_v22  ;;  %v1437_v53 = vmax.f32 %v6382_v18, %v6387_v22  ;;  %v6397_v8 = vadd.f32 %v1300_v62, %v6137_v13  ;;  %v6423_v59 = vpop.permute.xlu0 %2996  ;;  %v5152_v22 = vld [vmem:[%s5551_s11 + $0x8] sm:$0xff] }
 0x2d0   : > { %8900 = vst [vmem:[#allocation93_spill] sm:$0xff] %v6392_v2  ;;  %8909 = vst [vmem:[#allocation102_spill] sm:$0xff] %v6423_v59 }
 0x2d1   : > { %8901 = vst [vmem:[#allocation94_spill] sm:$0xff] %v6397_v8  ;;  %v1440_v24 = vmax.f32 %v6392_v2, %v6397_v8  ;;  %1438 = vmax.xlane.f32.xlu1 %v1437_v53 }
 0x2d3   : > { %v1304_v19 = vpop.f32.mrb[44].mxu1  ;;  %1441 = vmax.xlane.f32.xlu0 %v1440_v24  ;;  %v6419_v24 = vpop.permute.xlu1 %2998 }
 0x2d4   : > { %v6406_v55 = vadd.f32 %v1304_v19, %v6133_v11  ;;  %v1306_v5 = vpop.f32.mrb[45].mxu1  ;;  %8908 = vst [vmem:[#allocation101_spill] sm:$0xff] %v6419_v24 }
 0x2d5   : > { %v6409_v21 = vadd.f32 %v1306_v5, %v6137_v13  ;;  %v1308_v16 = vpop.f32.mrb[46].mxu1 }
 0x2d6   : > { %8904 = vst [vmem:[#allocation97_spill] sm:$0xff] %v6406_v55  ;;  %v6412_v62 = vadd.f32 %v1308_v16, %v6133_v11  ;;  %v1310_v0 = vpop.f32.mrb[47].mxu1 }
 0x2d7   : > { %8905 = vst [vmem:[#allocation98_spill] sm:$0xff] %v6409_v21  ;;  %v1443_v53 = vmax.f32 %v6406_v55, %v6409_v21  ;;  %v6417_v27 = vadd.f32 %v1310_v0, %v6137_v13  ;;  %v6434_v55 = vpop.permute.xlu1 %3002 }
 0x2d8   : > { %8906 = vst [vmem:[#allocation99_spill] sm:$0xff] %v6412_v62  ;;  %8913 = vst [vmem:[#allocation106_spill] sm:$0xff] %v6434_v55 }
 0x2d9   : > { %8907 = vst [vmem:[#allocation100_spill] sm:$0xff] %v6417_v27  ;;  %v1446_v19 = vmax.f32 %v6412_v62, %v6417_v27  ;;  %1444 = vmax.xlane.f32.xlu1 %v1443_v53 }
 0x2db   : > { %v1314_v5 = vpop.f32.mrb[48].mxu1  ;;  %1447 = vmax.xlane.f32.xlu0 %v1446_v19  ;;  %v6441_v19 = vpop.permute.xlu0 %3000 }
 0x2dc   : > { %v6426_v16 = vadd.f32 %v1314_v5, %v6133_v11  ;;  %v1316_v8 = vpop.f32.mrb[49].mxu1  ;;  %8915 = vst [vmem:[#allocation108_spill] sm:$0xff] %v6441_v19  ;;  %v6448_v62 = vpop.permute.xlu1 %3006 }
 0x2dd   : > { %v6429_v2 = vadd.f32 %v1316_v8, %v6137_v13  ;;  %v1318_v21 = vpop.f32.mrb[50].mxu1  ;;  %8917 = vst [vmem:[#allocation110_spill] sm:$0xff] %v6448_v62 }
 0x2de   : > { %8910 = vst [vmem:[#allocation103_spill] sm:$0xff] %v6426_v16  ;;  %v6432_v0 = vadd.f32 %v1318_v21, %v6133_v11  ;;  %v1320_v24 = vpop.f32.mrb[51].mxu1 }
 0x2df   : > { %8911 = vst [vmem:[#allocation104_spill] sm:$0xff] %v6429_v2  ;;  %v1449_v53 = vmax.f32 %v6426_v16, %v6429_v2  ;;  %v6439_v59 = vadd.f32 %v1320_v24, %v6137_v13  ;;  %v6453_v24 = vpop.permute.xlu0 %3004 }
 0x2e0   : > { %8912 = vst [vmem:[#allocation105_spill] sm:$0xff] %v6432_v0  ;;  %8919 = vst [vmem:[#allocation112_spill] sm:$0xff] %v6453_v24 }
 0x2e1   : > { %8914 = vst [vmem:[#allocation107_spill] sm:$0xff] %v6439_v59  ;;  %v1452_v5 = vmax.f32 %v6432_v0, %v6439_v59  ;;  %1450 = vmax.xlane.f32.xlu1 %v1449_v53 }
 0x2e3   : > { %v1324_v8 = vpop.f32.mrb[52].mxu1  ;;  %1453 = vmax.xlane.f32.xlu0 %v1452_v5  ;;  %v6467_v62 = vpop.permute.xlu0 %3008 }
 0x2e4   : > { %v6446_v21 = vadd.f32 %v1324_v8, %v6133_v11  ;;  %v1326_v27 = vpop.f32.mrb[53].mxu1  ;;  %8923 = vst [vmem:[#allocation116_spill] sm:$0xff] %v6467_v62 }
 0x2e5   : > { %v6451_v55 = vadd.f32 %v1326_v27, %v6137_v13  ;;  %v1328_v2 = vpop.f32.mrb[54].mxu1  ;;  %v6465_v27 = vpop.permute.xlu1 %3010 }
 0x2e6   : > { %8916 = vst [vmem:[#allocation109_spill] sm:$0xff] %v6446_v21  ;;  %v6456_v19 = vadd.f32 %v1328_v2, %v6133_v11  ;;  %v1330_v16 = vpop.f32.mrb[55].mxu1  ;;  %8922 = vst [vmem:[#allocation115_spill] sm:$0xff] %v6465_v27 }
 0x2e7   : > { %8918 = vst [vmem:[#allocation111_spill] sm:$0xff] %v6451_v55  ;;  %v1455_v53 = vmax.f32 %v6446_v21, %v6451_v55  ;;  %v6461_v5 = vadd.f32 %v1330_v16, %v6137_v13  ;;  %v6471_v11 = vpop.permute.xlu0 %3012 }
 0x2e8   : > { %8920 = vst [vmem:[#allocation113_spill] sm:$0xff] %v6456_v19  ;;  %8925 = vst [vmem:[#allocation118_spill] sm:$0xff] %v6471_v11  ;;  %v6489_v11 = vld [vmem:[#allocation2 + $0x20] sm:$0xff] }
 0x2e9   : > { %8921 = vst [vmem:[#allocation114_spill] sm:$0xff] %v6461_v5  ;;  %v1458_v8 = vmax.f32 %v6456_v19, %v6461_v5  ;;  %1456 = vmax.xlane.f32.xlu1 %v1455_v53  ;;  %v6469_v24 = vpop.permute.xlu1 %3014  ;;  %8934 = vst [vmem:[#allocation127_spill] sm:$0xff] %v6489_v11 }
 0x2ea   : > { %8924 = vst [vmem:[#allocation117_spill] sm:$0xff] %v6469_v24 }
 0x2eb   : > { %1459 = vmax.xlane.f32.xlu0 %v1458_v8  ;;  %v6475_v59 = vpop.permute.xlu0 %3016 }
 0x2ec   : > { %8927 = vst [vmem:[#allocation120_spill] sm:$0xff] %v6475_v59  ;;  %v6494_v59 = vld [vmem:[#allocation2] sm:$0xff] }
 0x2ed   : > { %v6473_v2 = vpop.permute.xlu1 %3018  ;;  %8936 = vst [vmem:[#allocation129_spill] sm:$0xff] %v6494_v59 }
 0x2ee   : > { %8926 = vst [vmem:[#allocation119_spill] sm:$0xff] %v6473_v2 }
 0x2ef   : > { %v6479_v13 = vpop.permute.xlu0 %3020 }
 0x2f0   : > { %8929 = vst [vmem:[#allocation122_spill] sm:$0xff] %v6479_v13 }
 0x2f1   : > { %v6477_v0 = vpop.permute.xlu1 %3022 }
 0x2f2   : > { %8928 = vst [vmem:[#allocation121_spill] sm:$0xff] %v6477_v0 }
 0x2f3   : > { %v6483_v53 = vpop.permute.xlu0 %3024 }
 0x2f4   : > { %8931 = vst [vmem:[#allocation124_spill] sm:$0xff] %v6483_v53  ;;  %v6505_v53 = vld [vmem:[#allocation2 + $0x8] sm:$0xff] }
 0x2f5   : > { %v6481_v16 = vpop.permute.xlu1 %3026  ;;  %8938 = vst [vmem:[#allocation131_spill] sm:$0xff] %v6505_v53 }
 0x2f6   : > { %8930 = vst [vmem:[#allocation123_spill] sm:$0xff] %v6481_v16  ;;  %v6510_v16 = vld [vmem:[#allocation2 + $0x28] sm:$0xff] }
 0x2f7   : > { %v6487_v27 = vpop.permute.xlu0 %3028  ;;  %8940 = vst [vmem:[#allocation133_spill] sm:$0xff] %v6510_v16 }
 0x2f8   : > { %8933 = vst [vmem:[#allocation126_spill] sm:$0xff] %v6487_v27 }
 0x2f9   : > { %v6485_v8 = vpop.permute.xlu1 %3030 }
 0x2fa   : > { %8932 = vst [vmem:[#allocation125_spill] sm:$0xff] %v6485_v8 }
 0x30e   : > { %v1379_v62 = vpop.xlane.xlu1 %1378  ;;  %v1367_v24 = vpop.xlane.xlu0 %1366 }
 0x30f   : > { %v6492_v2 = vmax.f32 %v6489_v11, %v1379_v62  ;;  %v6497_v13 = vmax.f32 %v6494_v59, %v1367_v24 }
 0x311   : > { %8935 = vst [vmem:[#allocation128_spill] sm:$0xff] %v6492_v2  ;;  %8937 = vst [vmem:[#allocation130_spill] sm:$0xff] %v6497_v13  ;;  %1611 = vperm.xlu0 %4851, %v6492_v2   ;;  %1591 = vperm.xlu1 %4852, %v6497_v13  }
 0x312   : > { %2070 = vst.msk [vmem:[#allocation2] sm:$0xff] %vm2069_vm4, %v6497_v13  ;;  %2074 = vst.msk [vmem:[#allocation2 + $0x20] sm:$0xff] %vm2069_vm4, %v6492_v2  ;;  %v1370_v27 = vpop.xlane.xlu1 %1369  ;;  %v1382_v8 = vpop.xlane.xlu0 %1381  ;;  %v6521_v2 = vld [vmem:[#allocation2 + $0x30] sm:$0xff] }
 0x313   : > { %v6508_v62 = vmax.f32 %v6505_v53, %v1370_v27  ;;  %v6513_v24 = vmax.f32 %v6510_v16, %v1382_v8  ;;  %8942 = vst [vmem:[#allocation135_spill] sm:$0xff] %v6521_v2  ;;  %v6526_v53 = vld [vmem:[#allocation2 + $0x10] sm:$0xff]  ;;  %v6537_v16 = vld [vmem:[#allocation2 + $0x18] sm:$0xff] }
 0x314   : > { %8944 = vst [vmem:[#allocation137_spill] sm:$0xff] %v6526_v53  ;;  %8946 = vst [vmem:[#allocation139_spill] sm:$0xff] %v6537_v16 }
 0x315   : > { %8939 = vst [vmem:[#allocation132_spill] sm:$0xff] %v6508_v62  ;;  %8941 = vst [vmem:[#allocation134_spill] sm:$0xff] %v6513_v24  ;;  %1596 = vperm.xlu0 %4851, %v6508_v62   ;;  %1616 = vperm.xlu1 %4852, %v6513_v24  }
 0x316   : > { %2071 = vst.msk [vmem:[#allocation2 + $0x8] sm:$0xff] %vm2069_vm4, %v6508_v62  ;;  %2075 = vst.msk [vmem:[#allocation2 + $0x28] sm:$0xff] %vm2069_vm4, %v6513_v24  ;;  %v1385_v0 = vpop.xlane.xlu1 %1384  ;;  %v1373_v11 = vpop.xlane.xlu0 %1372  ;;  %v6550_v24 = vld [vmem:[#allocation2 + $0x38] sm:$0xff] }
 0x317   : > { %v6524_v27 = vmax.f32 %v6521_v2, %v1385_v0  ;;  %v6529_v8 = vmax.f32 %v6526_v53, %v1373_v11  ;;  %v6545_v53 = vld [vmem:[#allocation2 + $0x40] sm:$0xff]  ;;  %8950 = vst [vmem:[#allocation143_spill] sm:$0xff] %v6550_v24 }
 0x318   : > { %8948 = vst [vmem:[#allocation141_spill] sm:$0xff] %v6545_v53 }
 0x319   : > { %8943 = vst [vmem:[#allocation136_spill] sm:$0xff] %v6524_v27  ;;  %8945 = vst [vmem:[#allocation138_spill] sm:$0xff] %v6529_v8  ;;  %1621 = vperm.xlu0 %4851, %v6524_v27   ;;  %1601 = vperm.xlu1 %4852, %v6529_v8  }
 0x31a   : > { %2072 = vst.msk [vmem:[#allocation2 + $0x10] sm:$0xff] %vm2069_vm4, %v6529_v8  ;;  %2076 = vst.msk [vmem:[#allocation2 + $0x30] sm:$0xff] %vm2069_vm4, %v6524_v27  ;;  %v1376_v62 = vpop.xlane.xlu0 %1375 }
 0x31b   : > { %v6540_v0 = vmax.f32 %v6537_v16, %v1376_v62  ;;  %v6561_v16 = vld [vmem:[#allocation2 + $0x48] sm:$0xff] }
 0x31c   : > { %8952 = vst [vmem:[#allocation145_spill] sm:$0xff] %v6561_v16 }
 0x31d   : > { %8947 = vst [vmem:[#allocation140_spill] sm:$0xff] %v6540_v0  ;;  %1606 = vperm.xlu1 %4852, %v6540_v0   ;;  %2073 = vst.msk [vmem:[#allocation2 + $0x18] sm:$0xff] %vm2069_vm4, %v6540_v0  ;;  %v6574_v0 = vld [vmem:[#allocation2 + $0x58] sm:$0xff] }
 0x31e   : > { %v1391_v11 = vpop.xlane.xlu1 %1390  ;;  %v1388_v2 = vpop.xlane.xlu0 %1387  ;;  %8956 = vst [vmem:[#allocation149_spill] sm:$0xff] %v6574_v0 }
 0x31f   : > { %v6548_v8 = vmax.f32 %v6545_v53, %v1391_v11  ;;  %v6553_v27 = vmax.f32 %v6550_v24, %v1388_v2  ;;  %v6569_v53 = vld [vmem:[#allocation2 + $0x50] sm:$0xff] }
 0x320   : > { %8954 = vst [vmem:[#allocation147_spill] sm:$0xff] %v6569_v53 }
 0x321   : > { %8949 = vst [vmem:[#allocation142_spill] sm:$0xff] %v6548_v8  ;;  %8951 = vst [vmem:[#allocation144_spill] sm:$0xff] %v6553_v27  ;;  %1631 = vperm.xlu0 %4851, %v6548_v8   ;;  %1626 = vperm.xlu1 %4852, %v6553_v27  }
 0x322   : > { %2077 = vst.msk [vmem:[#allocation2 + $0x38] sm:$0xff] %vm2069_vm4, %v6553_v27  ;;  %2078 = vst.msk [vmem:[#allocation2 + $0x40] sm:$0xff] %vm2069_vm4, %v6548_v8  ;;  %v1394_v62 = vpop.xlane.xlu0 %1393 }
 0x323   : > { %v6564_v11 = vmax.f32 %v6561_v16, %v1394_v62  ;;  %v6585_v16 = vld [vmem:[#allocation2 + $0x60] sm:$0xff] }
 0x324   : > { %8958 = vst [vmem:[#allocation151_spill] sm:$0xff] %v6585_v16 }
 0x325   : > { %8953 = vst [vmem:[#allocation146_spill] sm:$0xff] %v6564_v11  ;;  %1636 = vperm.xlu1 %4852, %v6564_v11   ;;  %2079 = vst.msk [vmem:[#allocation2 + $0x48] sm:$0xff] %vm2069_vm4, %v6564_v11  ;;  %v6590_v11 = vld [vmem:[#allocation2 + $0x68] sm:$0xff] }
 0x326   : > { %v1397_v2 = vpop.xlane.xlu1 %1396  ;;  %8960 = vst [vmem:[#allocation153_spill] sm:$0xff] %v6590_v11 }
 0x327   : > { %v6572_v24 = vmax.f32 %v6569_v53, %v1397_v2 }
 0x328   : > { %v1400_v27 = vpop.xlane.xlu0 %1399 }
 0x329   : > { %8955 = vst [vmem:[#allocation148_spill] sm:$0xff] %v6572_v24  ;;  %v6577_v8 = vmax.f32 %v6574_v0, %v1400_v27  ;;  %1641 = vperm.xlu0 %4851, %v6572_v24   ;;  %2080 = vst.msk [vmem:[#allocation2 + $0x50] sm:$0xff] %vm2069_vm4, %v6572_v24  ;;  %v6601_v0 = vld [vmem:[#allocation2 + $0x70] sm:$0xff] }
 0x32a   : > { %8962 = vst [vmem:[#allocation155_spill] sm:$0xff] %v6601_v0 }
 0x32b   : > { %8957 = vst [vmem:[#allocation150_spill] sm:$0xff] %v6577_v8  ;;  %1646 = vperm.xlu1 %4852, %v6577_v8   ;;  %2081 = vst.msk [vmem:[#allocation2 + $0x58] sm:$0xff] %vm2069_vm4, %v6577_v8  ;;  %v6606_v8 = vld [vmem:[#allocation2 + $0x78] sm:$0xff] }
 0x32c   : > { %8964 = vst [vmem:[#allocation157_spill] sm:$0xff] %v6606_v8 }
 0x32e   : > { %v1403_v62 = vpop.xlane.xlu1 %1402 }
 0x32f   : > { %v6588_v2 = vmax.f32 %v6585_v16, %v1403_v62 }
 0x330   : > { %v1406_v53 = vpop.xlane.xlu0 %1405 }
 0x331   : > { %8959 = vst [vmem:[#allocation152_spill] sm:$0xff] %v6588_v2  ;;  %v6593_v27 = vmax.f32 %v6590_v11, %v1406_v53  ;;  %1651 = vperm.xlu0 %4851, %v6588_v2   ;;  %2082 = vst.msk [vmem:[#allocation2 + $0x60] sm:$0xff] %vm2069_vm4, %v6588_v2  ;;  %v6617_v11 = vld [vmem:[#allocation2 + $0x80] sm:$0xff] }
 0x332   : > { %8966 = vst [vmem:[#allocation159_spill] sm:$0xff] %v6617_v11 }
 0x333   : > { %8961 = vst [vmem:[#allocation154_spill] sm:$0xff] %v6593_v27  ;;  %1656 = vperm.xlu1 %4852, %v6593_v27   ;;  %2083 = vst.msk [vmem:[#allocation2 + $0x68] sm:$0xff] %vm2069_vm4, %v6593_v27  ;;  %v6622_v27 = vld [vmem:[#allocation2 + $0x88] sm:$0xff] }
 0x334   : > { %8968 = vst [vmem:[#allocation161_spill] sm:$0xff] %v6622_v27 }
 0x336   : > { %v1409_v24 = vpop.xlane.xlu1 %1408 }
 0x337   : > { %v6604_v62 = vmax.f32 %v6601_v0, %v1409_v24 }
 0x338   : > { %v1412_v16 = vpop.xlane.xlu0 %1411 }
 0x339   : > { %8963 = vst [vmem:[#allocation156_spill] sm:$0xff] %v6604_v62  ;;  %v6609_v53 = vmax.f32 %v6606_v8, %v1412_v16  ;;  %1661 = vperm.xlu0 %4851, %v6604_v62   ;;  %2084 = vst.msk [vmem:[#allocation2 + $0x70] sm:$0xff] %vm2069_vm4, %v6604_v62  ;;  %v6633_v8 = vld [vmem:[#allocation2 + $0x90] sm:$0xff] }
 0x33a   : > { %8970 = vst [vmem:[#allocation163_spill] sm:$0xff] %v6633_v8 }
 0x33b   : > { %8965 = vst [vmem:[#allocation158_spill] sm:$0xff] %v6609_v53  ;;  %1666 = vperm.xlu1 %4852, %v6609_v53   ;;  %2085 = vst.msk [vmem:[#allocation2 + $0x78] sm:$0xff] %vm2069_vm4, %v6609_v53  ;;  %v6638_v53 = vld [vmem:[#allocation2 + $0x98] sm:$0xff] }
 0x33c   : > { %8972 = vst [vmem:[#allocation165_spill] sm:$0xff] %v6638_v53 }
 0x33e   : > { %v1415_v2 = vpop.xlane.xlu1 %1414 }
 0x33f   : > { %v6620_v24 = vmax.f32 %v6617_v11, %v1415_v2 }
 0x340   : > { %v1418_v0 = vpop.xlane.xlu0 %1417 }
 0x341   : > { %8967 = vst [vmem:[#allocation160_spill] sm:$0xff] %v6620_v24  ;;  %v6625_v16 = vmax.f32 %v6622_v27, %v1418_v0  ;;  %1671 = vperm.xlu0 %4851, %v6620_v24   ;;  %2086 = vst.msk [vmem:[#allocation2 + $0x80] sm:$0xff] %vm2069_vm4, %v6620_v24  ;;  %v6649_v27 = vld [vmem:[#allocation2 + $0xa0] sm:$0xff] }
 0x342   : > { %8974 = vst [vmem:[#allocation167_spill] sm:$0xff] %v6649_v27 }
 0x343   : > { %8969 = vst [vmem:[#allocation162_spill] sm:$0xff] %v6625_v16  ;;  %1676 = vperm.xlu1 %4852, %v6625_v16   ;;  %2087 = vst.msk [vmem:[#allocation2 + $0x88] sm:$0xff] %vm2069_vm4, %v6625_v16  ;;  %v6654_v16 = vld [vmem:[#allocation2 + $0xa8] sm:$0xff] }
 0x344   : > { %8976 = vst [vmem:[#allocation169_spill] sm:$0xff] %v6654_v16 }
 0x346   : > { %v1421_v62 = vpop.xlane.xlu1 %1420 }
 0x347   : > { %v6636_v2 = vmax.f32 %v6633_v8, %v1421_v62 }
 0x348   : > { %v1424_v11 = vpop.xlane.xlu0 %1423 }
 0x349   : > { %8971 = vst [vmem:[#allocation164_spill] sm:$0xff] %v6636_v2  ;;  %v6641_v0 = vmax.f32 %v6638_v53, %v1424_v11  ;;  %1681 = vperm.xlu0 %4851, %v6636_v2   ;;  %2088 = vst.msk [vmem:[#allocation2 + $0x90] sm:$0xff] %vm2069_vm4, %v6636_v2  ;;  %v6665_v53 = vld [vmem:[#allocation2 + $0xb0] sm:$0xff] }
 0x34a   : > { %8978 = vst [vmem:[#allocation171_spill] sm:$0xff] %v6665_v53 }
 0x34b   : > { %8973 = vst [vmem:[#allocation166_spill] sm:$0xff] %v6641_v0  ;;  %1686 = vperm.xlu1 %4852, %v6641_v0   ;;  %2089 = vst.msk [vmem:[#allocation2 + $0x98] sm:$0xff] %vm2069_vm4, %v6641_v0  ;;  %v6670_v0 = vld [vmem:[#allocation2 + $0xb8] sm:$0xff] }
 0x34c   : > { %8980 = vst [vmem:[#allocation173_spill] sm:$0xff] %v6670_v0 }
 0x34e   : > { %v1427_v24 = vpop.xlane.xlu1 %1426 }
 0x34f   : > { %v6652_v62 = vmax.f32 %v6649_v27, %v1427_v24 }
 0x350   : > { %v1430_v8 = vpop.xlane.xlu0 %1429 }
 0x351   : > { %8975 = vst [vmem:[#allocation168_spill] sm:$0xff] %v6652_v62  ;;  %v6657_v11 = vmax.f32 %v6654_v16, %v1430_v8  ;;  %1691 = vperm.xlu0 %4851, %v6652_v62   ;;  %2090 = vst.msk [vmem:[#allocation2 + $0xa0] sm:$0xff] %vm2069_vm4, %v6652_v62  ;;  %v6681_v16 = vld [vmem:[#allocation2 + $0xc0] sm:$0xff] }
 0x352   : > { %8982 = vst [vmem:[#allocation175_spill] sm:$0xff] %v6681_v16 }
 0x353   : > { %8977 = vst [vmem:[#allocation170_spill] sm:$0xff] %v6657_v11  ;;  %1696 = vperm.xlu1 %4852, %v6657_v11   ;;  %2091 = vst.msk [vmem:[#allocation2 + $0xa8] sm:$0xff] %vm2069_vm4, %v6657_v11  ;;  %v6686_v11 = vld [vmem:[#allocation2 + $0xc8] sm:$0xff] }
 0x354   : > { %8984 = vst [vmem:[#allocation177_spill] sm:$0xff] %v6686_v11 }
 0x356   : > { %v1433_v2 = vpop.xlane.xlu1 %1432 }
 0x357   : > { %v6668_v24 = vmax.f32 %v6665_v53, %v1433_v2 }
 0x358   : > { %v1436_v27 = vpop.xlane.xlu0 %1435 }
 0x359   : > { %8979 = vst [vmem:[#allocation172_spill] sm:$0xff] %v6668_v24  ;;  %v6673_v8 = vmax.f32 %v6670_v0, %v1436_v27  ;;  %1701 = vperm.xlu0 %4851, %v6668_v24   ;;  %2092 = vst.msk [vmem:[#allocation2 + $0xb0] sm:$0xff] %vm2069_vm4, %v6668_v24  ;;  %v6697_v0 = vld [vmem:[#allocation2 + $0xd0] sm:$0xff] }
 0x35a   : > { %8986 = vst [vmem:[#allocation179_spill] sm:$0xff] %v6697_v0 }
 0x35b   : > { %8981 = vst [vmem:[#allocation174_spill] sm:$0xff] %v6673_v8  ;;  %1706 = vperm.xlu1 %4852, %v6673_v8   ;;  %2093 = vst.msk [vmem:[#allocation2 + $0xb8] sm:$0xff] %vm2069_vm4, %v6673_v8  ;;  %v6702_v8 = vld [vmem:[#allocation2 + $0xd8] sm:$0xff] }
 0x35c   : > { %8988 = vst [vmem:[#allocation181_spill] sm:$0xff] %v6702_v8 }
 0x35e   : > { %v1439_v62 = vpop.xlane.xlu1 %1438 }
 0x35f   : > { %v6684_v2 = vmax.f32 %v6681_v16, %v1439_v62 }
 0x360   : > { %v1442_v53 = vpop.xlane.xlu0 %1441 }
 0x361   : > { %8983 = vst [vmem:[#allocation176_spill] sm:$0xff] %v6684_v2  ;;  %v6689_v27 = vmax.f32 %v6686_v11, %v1442_v53  ;;  %1711 = vperm.xlu0 %4851, %v6684_v2   ;;  %2094 = vst.msk [vmem:[#allocation2 + $0xc0] sm:$0xff] %vm2069_vm4, %v6684_v2  ;;  %v6713_v11 = vld [vmem:[#allocation2 + $0xe0] sm:$0xff] }
 0x362   : > { %8990 = vst [vmem:[#allocation183_spill] sm:$0xff] %v6713_v11 }
 0x363   : > { %8985 = vst [vmem:[#allocation178_spill] sm:$0xff] %v6689_v27  ;;  %1716 = vperm.xlu1 %4852, %v6689_v27   ;;  %2095 = vst.msk [vmem:[#allocation2 + $0xc8] sm:$0xff] %vm2069_vm4, %v6689_v27  ;;  %v6718_v27 = vld [vmem:[#allocation2 + $0xe8] sm:$0xff] }
 0x364   : > { %8992 = vst [vmem:[#allocation185_spill] sm:$0xff] %v6718_v27 }
 0x366   : > { %v1445_v24 = vpop.xlane.xlu1 %1444 }
 0x367   : > { %v6700_v62 = vmax.f32 %v6697_v0, %v1445_v24 }
 0x368   : > { %v1448_v16 = vpop.xlane.xlu0 %1447 }
 0x369   : > { %8987 = vst [vmem:[#allocation180_spill] sm:$0xff] %v6700_v62  ;;  %v6705_v53 = vmax.f32 %v6702_v8, %v1448_v16  ;;  %1721 = vperm.xlu0 %4851, %v6700_v62   ;;  %2096 = vst.msk [vmem:[#allocation2 + $0xd0] sm:$0xff] %vm2069_vm4, %v6700_v62  ;;  %v6729_v8 = vld [vmem:[#allocation2 + $0xf0] sm:$0xff] }
 0x36a   : > { %8994 = vst [vmem:[#allocation187_spill] sm:$0xff] %v6729_v8 }
 0x36b   : > { %8989 = vst [vmem:[#allocation182_spill] sm:$0xff] %v6705_v53  ;;  %1726 = vperm.xlu1 %4852, %v6705_v53   ;;  %2097 = vst.msk [vmem:[#allocation2 + $0xd8] sm:$0xff] %vm2069_vm4, %v6705_v53  ;;  %v6734_v53 = vld [vmem:[#allocation2 + $0xf8] sm:$0xff] }
 0x36c   : > { %8996 = vst [vmem:[#allocation189_spill] sm:$0xff] %v6734_v53 }
 0x36e   : > { %v1451_v2 = vpop.xlane.xlu1 %1450 }
 0x36f   : > { %v6716_v24 = vmax.f32 %v6713_v11, %v1451_v2 }
 0x370   : > { %v1454_v0 = vpop.xlane.xlu0 %1453 }
 0x371   : > { %8991 = vst [vmem:[#allocation184_spill] sm:$0xff] %v6716_v24  ;;  %v6721_v16 = vmax.f32 %v6718_v27, %v1454_v0  ;;  %1731 = vperm.xlu0 %4851, %v6716_v24   ;;  %2098 = vst.msk [vmem:[#allocation2 + $0xe0] sm:$0xff] %vm2069_vm4, %v6716_v24 }
 0x373   : > { %8993 = vst [vmem:[#allocation186_spill] sm:$0xff] %v6721_v16  ;;  %1736 = vperm.xlu1 %4852, %v6721_v16   ;;  %2099 = vst.msk [vmem:[#allocation2 + $0xe8] sm:$0xff] %vm2069_vm4, %v6721_v16 }
 0x376   : > { %v1457_v62 = vpop.xlane.xlu1 %1456 }
 0x377   : > { %v6732_v2 = vmax.f32 %v6729_v8, %v1457_v62 }
 0x378   : > { %v1460_v11 = vpop.xlane.xlu0 %1459 }
 0x379   : > { %8995 = vst [vmem:[#allocation188_spill] sm:$0xff] %v6732_v2  ;;  %v6737_v0 = vmax.f32 %v6734_v53, %v1460_v11  ;;  %1741 = vperm.xlu0 %4851, %v6732_v2   ;;  %2100 = vst.msk [vmem:[#allocation2 + $0xf0] sm:$0xff] %vm2069_vm4, %v6732_v2 }
 0x37b   : > { %8997 = vst [vmem:[#allocation190_spill] sm:$0xff] %v6737_v0  ;;  %1746 = vperm.xlu1 %4852, %v6737_v0   ;;  %2101 = vst.msk [vmem:[#allocation2 + $0xf8] sm:$0xff] %vm2069_vm4, %v6737_v0 }
 0x390   : > { %v1592_v24 = vpop.permute.xlu1 %1591  ;;  %v1612_v27 = vpop.permute.xlu0 %1611 }
 0x391   : > { %v1749_v62 = vsub.f32 %v6142_v23, %v1592_v24  ;;  %v1750_v8 = vsub.f32 %v6148_v39, %v1592_v24  ;;  %v1757_v16 = vsub.f32 %v6145_v28, %v1612_v27  ;;  %v1758_v11 = vsub.f32 %v6151_v43, %v1612_v27 }
 0x393   : > { %v1813_v53 = vmul.f32 1.442695, %v1749_v62  ;;  %v1815_v5 = vmul.f32 1.442695, %v1750_v8  ;;  %v1829_v19 = vmul.f32 1.442695, %v1757_v16 }
 0x394   : > { %v1831_v59 = vmul.f32 1.442695, %v1758_v11  ;;  %v1617_v2 = vpop.permute.xlu1 %1616  ;;  %v1597_v13 = vpop.permute.xlu0 %1596 }
 0x395   : > { %4925 = vpow2.f32 %v1813_v53  ;;  %v1759_v55 = vsub.f32 %v6157_v10, %v1617_v2  ;;  %v1760_v0 = vsub.f32 %v6167_v4, %v1617_v2  ;;  %v1751_v21 = vsub.f32 %v6154_v7, %v1597_v13  ;;  %v5150_v2 = vld [vmem:[%s5551_s11 + $0x20] sm:$0xff] }
 0x396   : > { %4927 = vpow2.f32 %v1815_v5  ;;  %v1752_v23 = vsub.f32 %v6164_v56, %v1597_v13  ;;  %v1950_v62 = vunpack.c.h.bf16 %v5150_v2 }
 0x397   : > { %4929 = vpow2.f32 %v1829_v19  ;;  %v1833_v28 = vmul.f32 1.442695, %v1759_v55  ;;  %v1835_v39 = vmul.f32 1.442695, %v1760_v0  ;;  %v1817_v43 = vmul.f32 1.442695, %v1751_v21 }
 0x398   : > { %4931 = vpow2.f32 %v1831_v59  ;;  %v1819_v8 = vmul.f32 1.442695, %v1752_v23  ;;  %v1602_v10 = vpop.permute.xlu1 %1601  ;;  %v1622_v5 = vpop.permute.xlu0 %1621  ;;  %v5149_v19 = vld [vmem:[%s5551_s11] sm:$0xff]  ;;  %v1949_v0 = vunpack.c.l.bf16 %v5150_v2  ;;  %v1944_v2 = vunpack.c.h.bf16 %v5152_v22 }
 0x399   : > { %4933 = vpow2.f32 %v1833_v28  ;;  %v1941_v55 = vunpack.c.l.bf16 %v5149_v19  ;;  %v1942_v13 = vunpack.c.h.bf16 %v5149_v19  ;;  %v1753_v59 = vsub.f32 %v6178_v17, %v1602_v10  ;;  %v5151_v28 = vld [vmem:[%s5551_s11 + $0x28] sm:$0xff] }
 0x39a   : > { %4935 = vpow2.f32 %v1835_v39  ;;  %v1754_v23 = vsub.f32 %v6184_v51, %v1602_v10  ;;  %v1951_v39 = vunpack.c.l.bf16 %v5151_v28  ;;  %v1952_v61 = vunpack.c.h.bf16 %v5151_v28 }
 0x39b   : > { %4937 = vpow2.f32 %v1817_v43  ;;  %v1943_v17 = vunpack.c.l.bf16 %v5152_v22  ;;  %v1762_v63 = vsub.f32 %v6187_v50, %v1622_v5  ;;  %v1821_v58 = vmul.f32 1.442695, %v1753_v59 }
 0x39c   : > { %4939 = vpow2.f32 %v1819_v8  ;;  %v1607_v21 = vpop.permute.xlu1 %1606  ;;  %v1761_v8 = vsub.f32 %v6181_v57, %v1622_v5 }
 0x39d   : > { %v1755_v25 = vsub.f32 %v6190_v47, %v1607_v21  ;;  %v1839_v60 = vmul.f32 1.442695, %v1762_v63  ;;  %4941 = vpow2.f32 %v1821_v58 }
 0x39e   : > { %v1837_v57 = vmul.f32 1.442695, %v1761_v8 }
 0x39f   : > { %v4926_v27 = vpop.eup %4925 }
 0x3a0   : > { %v4928_v4 = vpop.eup %4927  ;;  %v2005_v3 = vmul.f32 %v4926_v27, %v1941_v55  ;;  %v1627_v28 = vpop.permute.xlu1 %1626 }
 0x3a1   : > { %v4930_v53 = vpop.eup %4929  ;;  %v2262_v56 = vadd.f32 %v4928_v4, %v4926_v27  ;;  %v2006_v15 = vmul.f32 %v4928_v4, %v1942_v13  ;;  %v1764_v5 = vsub.f32 %v6207_v20, %v1627_v28 }
 0x3a2   : > { %v4932_v7 = vpop.eup %4931  ;;  %v2013_v51 = vmul.f32 %v4930_v53, %v1949_v0 }
 0x3a3   : > { %v4934_v24 = vpop.eup %4933  ;;  %v2274_v16 = vadd.f32 %v4932_v7, %v4930_v53  ;;  %2263 = vadd.xlane.f32.xlu0 %v2262_v56  ;;  %v2014_v10 = vmul.f32 %v4932_v7, %v1950_v62  ;;  %v1823_v56 = vmul.f32 1.442695, %v1754_v23  ;;  %v2679_v1 = vadd.f32 %v2006_v15, %v2005_v3 }
 0x3a4   : > { %v4936_v11 = vpop.eup %4935  ;;  %v2015_v40 = vmul.f32 %v4934_v24, %v1951_v39  ;;  %v1825_v53 = vmul.f32 1.442695, %v1755_v25  ;;  %v1763_v7 = vsub.f32 %v6204_v49, %v1627_v28  ;;  %v3104_v58 = vmul.f32 %v2013_v51, %v1949_v0 }
 0x3a5   : > { %v4938_v43 = vpop.eup %4937  ;;  %2275 = vadd.xlane.f32.xlu1 %v2274_v16  ;;  %v2277_v19 = vadd.f32 %v4936_v11, %v4934_v24  ;;  %v1756_v16 = vsub.f32 %v6197_v31, %v1607_v21  ;;  %v2016_v50 = vmul.f32 %v4936_v11, %v1952_v61  ;;  %v2691_v27 = vadd.f32 %v2014_v10, %v2013_v51  ;;  %v1632_v31 = vpop.permute.xlu0 %1631 }
 0x3a6   : > { %v4940_v18 = vpop.eup %4939  ;;  %v2007_v22 = vmul.f32 %v4938_v43, %v1943_v17  ;;  %4943 = vpow2.f32 %v1823_v56  ;;  %v3097_v24 = vmul.f32 %v2006_v15, %v1942_v13  ;;  %v3105_v21 = vmul.f32 %v2014_v10, %v1950_v62 }
 0x3a7   : > { %v2265_v46 = vadd.f32 %v4940_v18, %v4938_v43  ;;  %2278 = vadd.xlane.f32.xlu0 %v2277_v19  ;;  %v2008_v4 = vmul.f32 %v4940_v18, %v1944_v2  ;;  %4945 = vpow2.f32 %v1837_v57  ;;  %v1827_v47 = vmul.f32 1.442695, %v1756_v16  ;;  %v5153_v19 = vld [vmem:[%s5551_s11 + $0x30] sm:$0xff] }
 0x3a8   : > { %4947 = vpow2.f32 %v1839_v60  ;;  %v2694_v63 = vadd.f32 %v2016_v50, %v2015_v40  ;;  %v1841_v18 = vmul.f32 1.442695, %v1763_v7  ;;  %v1843_v25 = vmul.f32 1.442695, %v1764_v5 }
 0x3a9   : > { %2266 = vadd.xlane.f32.xlu1 %v2265_v46  ;;  %v3096_v46 = vmul.f32 %v2005_v3, %v1941_v55  ;;  %v2682_v59 = vadd.f32 %v2008_v4, %v2007_v22  ;;  %4949 = vpow2.f32 %v1825_v53  ;;  %v1765_v49 = vsub.f32 %v6212_v45, %v1632_v31  ;;  %v4942_v55 = vpop.eup %4941 }
 0x3aa   : > { %4951 = vpow2.f32 %v1827_v47  ;;  %v3106_v11 = vmul.f32 %v2015_v40, %v1951_v39  ;;  %v3107_v60 = vmul.f32 %v2016_v50, %v1952_v61  ;;  %v3172_v23 = vadd.f32 %v3105_v21, %v3104_v58  ;;  %v1642_v39 = vpop.permute.xlu0 %1641 }
 0x3ab   : > { %2680 = vadd.xlane.f32.xlu0 %v2679_v1  ;;  %v1766_v1 = vsub.f32 %v6215_v14, %v1632_v31  ;;  %v3160_v20 = vadd.f32 %v3097_v24, %v3096_v46  ;;  %v3098_v3 = vmul.f32 %v2007_v22, %v1943_v17  ;;  %v3099_v15 = vmul.f32 %v2008_v4, %v1944_v2  ;;  %v5154_v22 = vld [vmem:[%s5551_s11 + $0x10] sm:$0xff]  ;;  %v6772_v46 = vld [vmem:[%s5551_s11 + $0x18] sm:$0xff] }
 0x3ac   : > { %4953 = vpow2.f32 %v1841_v18  ;;  %v1845_v13 = vmul.f32 1.442695, %v1765_v49  ;;  %v3175_v43 = vadd.f32 %v3107_v60, %v3106_v11  ;;  %v1953_v14 = vunpack.c.l.bf16 %v5153_v19  ;;  %v5156_v49 = vld [vmem:[%s5551_s11 + $0x40] sm:$0xff]  ;;  %v1637_v60 = vpop.permute.xlu1 %1636 }
 0x3ad   : > { %2692 = vadd.xlane.f32.xlu1 %v2691_v27  ;;  %4955 = vpow2.f32 %v1843_v25  ;;  %v1847_v62 = vmul.f32 1.442695, %v1766_v1  ;;  %v3163_v8 = vadd.f32 %v3099_v15, %v3098_v3  ;;  %v1954_v51 = vunpack.c.h.bf16 %v5153_v19 }
 0x3ae   : > { %4957 = vpow2.f32 %v1845_v13  ;;  %v1769_v16 = vsub.f32 %v6234_v38, %v1642_v39  ;;  %v1770_v50 = vsub.f32 %v6237_v6, %v1642_v39  ;;  %v1945_v4 = vunpack.c.l.bf16 %v5154_v22 }
 0x3af   : > { %2695 = vadd.xlane.f32.xlu0 %v2694_v63  ;;  %4959 = vpow2.f32 %v1847_v62  ;;  %v1946_v53 = vunpack.c.h.bf16 %v5154_v22  ;;  %v1947_v38 = vunpack.c.l.bf16 %v6772_v46  ;;  %v1948_v24 = vunpack.c.h.bf16 %v6772_v46 }
 0x3b0   : > { %v4944_v0 = vpop.eup %4943  ;;  %v1853_v63 = vmul.f32 1.442695, %v1769_v16  ;;  %v1855_v6 = vmul.f32 1.442695, %v1770_v50  ;;  %v2009_v58 = vmul.f32 %v4942_v55, %v1945_v4  ;;  %v1957_v1 = vunpack.c.l.bf16 %v5156_v49  ;;  %v1652_v13 = vpop.permute.xlu0 %1651 }
 0x3b1   : > { %2683 = vadd.xlane.f32.xlu1 %v2682_v59  ;;  %v4946_v45 = vpop.eup %4945  ;;  %v2268_v17 = vadd.f32 %v4944_v0, %v4942_v55  ;;  %v2010_v21 = vmul.f32 %v4944_v0, %v1946_v53 }
 0x3b2   : > { %v4948_v40 = vpop.eup %4947  ;;  %v2017_v56 = vmul.f32 %v4946_v45, %v1953_v14  ;;  %4961 = vpow2.f32 %v1853_v63 }
 0x3b3   : > { %3161 = vadd.xlane.f32.xlu0 %v3160_v20  ;;  %v4950_v61 = vpop.eup %4949  ;;  %v2280_v10 = vadd.f32 %v4948_v40, %v4946_v45  ;;  %v2018_v57 = vmul.f32 %v4948_v40, %v1954_v51  ;;  %v1958_v20 = vunpack.c.h.bf16 %v5156_v49  ;;  %4963 = vpow2.f32 %v1855_v6 }
 0x3b4   : > { %v4952_v2 = vpop.eup %4951  ;;  %v3108_v5 = vmul.f32 %v2017_v56, %v1953_v14  ;;  %v2685_v62 = vadd.f32 %v2010_v21, %v2009_v58  ;;  %v2011_v55 = vmul.f32 %v4950_v61, %v1947_v38  ;;  %v1768_v14 = vsub.f32 %v6225_v42, %v1637_v60 }
 0x3b5   : > { %3173 = vadd.xlane.f32.xlu1 %v3172_v23  ;;  %v2271_v27 = vadd.f32 %v4952_v2, %v4950_v61  ;;  %v2697_v47 = vadd.f32 %v2018_v57, %v2017_v56  ;;  %v3109_v31 = vmul.f32 %v2018_v57, %v1954_v51  ;;  %v5157_v23 = vld [vmem:[%s5551_s11 + $0x38] sm:$0xff]  ;;  %v2012_v0 = vmul.f32 %v4952_v2, %v1948_v24 }
 0x3b6   : > { %v4954_v28 = vpop.eup %4953  ;;  %v1955_v3 = vunpack.c.l.bf16 %v5157_v23  ;;  %v1956_v15 = vunpack.c.h.bf16 %v5157_v23  ;;  %v1773_v51 = vsub.f32 %v6254_v9, %v1652_v13  ;;  %v1774_v40 = vsub.f32 %v6259_v48, %v1652_v13  ;;  %v5158_v48 = vld [vmem:[%s5551_s11 + $0x50] sm:$0xff] }
 0x3b7   : > { %3176 = vadd.xlane.f32.xlu0 %v3175_v43  ;;  %v4956_v7 = vpop.eup %4955  ;;  %v3178_v25 = vadd.f32 %v3109_v31, %v3108_v5  ;;  %v1767_v43 = vsub.f32 %v6222_v54, %v1637_v60  ;;  %v2688_v39 = vadd.f32 %v2012_v0, %v2011_v55  ;;  %v1851_v54 = vmul.f32 1.442695, %v1768_v14  ;;  %v1647_v31 = vpop.permute.xlu1 %1646 }
 0x3b8   : > { %v2283_v59 = vadd.f32 %v4956_v7, %v4954_v28  ;;  %v4958_v18 = vpop.eup %4957  ;;  %v1861_v16 = vmul.f32 1.442695, %v1773_v51  ;;  %v1863_v50 = vmul.f32 1.442695, %v1774_v40  ;;  %v3101_v22 = vmul.f32 %v2010_v21, %v1946_v53  ;;  %v1662_v63 = vpop.permute.xlu0 %1661 }
 0x3b9   : > { %3164 = vadd.xlane.f32.xlu1 %v3163_v8  ;;  %v4960_v11 = vpop.eup %4959  ;;  %v2021_v8 = vmul.f32 %v4958_v18, %v1957_v1  ;;  %v1849_v61 = vmul.f32 1.442695, %v1767_v43  ;;  %v1961_v5 = vunpack.c.l.bf16 %v5158_v48  ;;  %v1771_v53 = vsub.f32 %v6240_v52, %v1647_v31 }
 0x3ba   : > { %v2286_v45 = vadd.f32 %v4960_v11, %v4958_v18  ;;  %v2022_v19 = vmul.f32 %v4960_v11, %v1958_v20  ;;  %v1777_v49 = vsub.f32 %v6278_v34, %v1662_v63 }
 0x3bb   : > { %2269 = vadd.xlane.f32.xlu0 %v2268_v17  ;;  %v2019_v17 = vmul.f32 %v4954_v28, %v1955_v3  ;;  %v3112_v2 = vmul.f32 %v2021_v8, %v1957_v1  ;;  %4965 = vpow2.f32 %v1849_v61  ;;  %v1962_v28 = vunpack.c.h.bf16 %v5158_v48  ;;  %v1657_v51 = vpop.permute.xlu1 %1656 }
 0x3bc   : > { %v2703_v56 = vadd.f32 %v2022_v19, %v2021_v8  ;;  %v3113_v57 = vmul.f32 %v2022_v19, %v1958_v20  ;;  %v4962_v9 = vpop.eup %4961  ;;  %4967 = vpow2.f32 %v1851_v54  ;;  %v1778_v1 = vsub.f32 %v6281_v33, %v1662_v63  ;;  %v5161_v63 = vld [vmem:[%s5551_s11 + $0x58] sm:$0xff] }
 0x3bd   : > { %2281 = vadd.xlane.f32.xlu1 %v2280_v10  ;;  %v2020_v10 = vmul.f32 %v4956_v7, %v1956_v15  ;;  %v4964_v7 = vpop.eup %4963  ;;  %4969 = vpow2.f32 %v1861_v16  ;;  %v2025_v21 = vmul.f32 %v4962_v9, %v1961_v5  ;;  %v3110_v11 = vmul.f32 %v2019_v17, %v1955_v3 }
 0x3be   : > { %4971 = vpow2.f32 %v1863_v50  ;;  %v2026_v18 = vmul.f32 %v4964_v7, %v1962_v28  ;;  %v1857_v60 = vmul.f32 1.442695, %v1771_v53  ;;  %v1775_v61 = vsub.f32 %v6264_v12, %v1657_v51  ;;  %v5162_v53 = vld [vmem:[%s5551_s11 + $0x70] sm:$0xff] }
 0x3bf   : > { %2272 = vadd.xlane.f32.xlu0 %v2271_v27  ;;  %v2700_v42 = vadd.f32 %v2020_v10, %v2019_v17  ;;  %v3100_v27 = vmul.f32 %v2009_v58, %v1945_v4  ;;  %v3103_v4 = vmul.f32 %v2012_v0, %v1948_v24  ;;  %v2292_v58 = vadd.f32 %v4964_v7, %v4962_v9  ;;  %v5159_v0 = vld [vmem:[%s5551_s11 + $0x48] sm:$0xff] }
 0x3c0   : > { %v2709_v46 = vadd.f32 %v2026_v18, %v2025_v21  ;;  %v3116_v24 = vmul.f32 %v2025_v21, %v1961_v5  ;;  %v3117_v52 = vmul.f32 %v2026_v18, %v1962_v28  ;;  %v1959_v43 = vunpack.c.l.bf16 %v5159_v0  ;;  %v1672_v40 = vpop.permute.xlu0 %1671 }
 0x3c1   : > { %2698 = vadd.xlane.f32.xlu1 %v2697_v47  ;;  %v3184_v47 = vadd.f32 %v3113_v57, %v3112_v2  ;;  %v3166_v6 = vadd.f32 %v3101_v22, %v3100_v27  ;;  %v1960_v33 = vunpack.c.h.bf16 %v5159_v0  ;;  %4973 = vpow2.f32 %v1857_v60 }
 0x3c2   : > { %v3190_v3 = vadd.f32 %v3117_v52, %v3116_v24  ;;  %v1776_v54 = vsub.f32 %v6269_v36, %v1657_v51  ;;  %v1781_v16 = vsub.f32 %v6298_v32, %v1672_v40  ;;  %v1782_v50 = vsub.f32 %v6301_v30, %v1672_v40  ;;  %v5164_v40 = vld [vmem:[%s5551_s11 + $0x80] sm:$0xff] }
 0x3c3   : > { %2284 = vadd.xlane.f32.xlu0 %v2283_v59  ;;  %v3102_v59 = vmul.f32 %v2011_v55, %v1947_v38  ;;  %v3111_v38 = vmul.f32 %v2020_v10, %v1956_v15  ;;  %v1871_v55 = vmul.f32 1.442695, %v1778_v1  ;;  %v5160_v15 = vld [vmem:[%s5551_s11 + $0x60] sm:$0xff]  ;;  %v1865_v9 = vmul.f32 1.442695, %v1775_v61 }
 0x3c4   : > { %v1965_v8 = vunpack.c.l.bf16 %v5160_v15  ;;  %v1966_v19 = vunpack.c.h.bf16 %v5160_v15  ;;  %v1867_v5 = vmul.f32 1.442695, %v1776_v54  ;;  %v1877_v7 = vmul.f32 1.442695, %v1781_v16 }
 0x3c5   : > { %3179 = vadd.xlane.f32.xlu1 %v3178_v25  ;;  %v1772_v25 = vsub.f32 %v6247_v44, %v1647_v31  ;;  %v3169_v20 = vadd.f32 %v3103_v4, %v3102_v59  ;;  %v4966_v13 = vpop.eup %4965  ;;  %v3181_v34 = vadd.f32 %v3111_v38, %v3110_v11  ;;  %v1879_v31 = vmul.f32 1.442695, %v1782_v50 }
 0x3c6   : > { %v4968_v44 = vpop.eup %4967  ;;  %v2023_v17 = vmul.f32 %v4966_v13, %v1959_v43  ;;  %v1964_v30 = vunpack.c.h.bf16 %v5161_v63  ;;  %v1970_v21 = vunpack.c.h.bf16 %v5162_v53 }
 0x3c7   : > { %2686 = vadd.xlane.f32.xlu0 %v2685_v62  ;;  %v1859_v23 = vmul.f32 1.442695, %v1772_v25  ;;  %v1869_v62 = vmul.f32 1.442695, %v1777_v49  ;;  %v2024_v10 = vmul.f32 %v4968_v44, %v1960_v33  ;;  %v1667_v25 = vpop.permute.xlu1 %1666 }
 0x3c8   : > { %v3114_v27 = vmul.f32 %v2023_v17, %v1959_v43  ;;  %v1682_v49 = vpop.permute.xlu0 %1681  ;;  %v1779_v38 = vsub.f32 %v6284_v41, %v1667_v25  ;;  %v1780_v52 = vsub.f32 %v6289_v35, %v1667_v25 }
 0x3c9   : > { %2287 = vadd.xlane.f32.xlu1 %v2286_v45  ;;  %v4970_v45 = vpop.eup %4969  ;;  %4975 = vpow2.f32 %v1859_v23  ;;  %v3115_v22 = vmul.f32 %v2024_v10, %v1960_v33  ;;  %v1785_v23 = vsub.f32 %v6318_v29, %v1682_v49 }
 0x3ca   : > { %v4972_v14 = vpop.eup %4971  ;;  %4977 = vpow2.f32 %v1869_v62  ;;  %v2029_v2 = vmul.f32 %v4970_v45, %v1965_v8  ;;  %v1875_v33 = vmul.f32 1.442695, %v1780_v52 }
 0x3cb   : > { %2689 = vadd.xlane.f32.xlu0 %v2688_v39  ;;  %4979 = vpow2.f32 %v1871_v55  ;;  %v2289_v39 = vadd.f32 %v4968_v44, %v4966_v13  ;;  %v2030_v57 = vmul.f32 %v4972_v14, %v1966_v19  ;;  %v4974_v28 = vpop.eup %4973  ;;  %v3187_v32 = vadd.f32 %v3115_v22, %v3114_v27  ;;  %v1677_v61 = vpop.permute.xlu1 %1676  ;;  %v8998_v22 = vld [vmem:[#allocation69_spill] sm:$0xff] }
 0x3cc   : > { %v3120_v48 = vmul.f32 %v2029_v2, %v1965_v8  ;;  %4981 = vpow2.f32 %v1865_v9  ;;  %v1786_v13 = vsub.f32 %v6323_v26, %v1682_v49  ;;  %v5163_v8 = vld [vmem:[%s5551_s11 + $0x68] sm:$0xff]  ;;  %v1783_v16 = vsub.f32 %v6304_v37, %v1677_v61 }
 0x3cd   : > { %2704 = vadd.xlane.f32.xlu1 %v2703_v56  ;;  %v2298_v56 = vadd.f32 %v4972_v14, %v4970_v45  ;;  %v3121_v12 = vmul.f32 %v2030_v57, %v1966_v19  ;;  %4983 = vpow2.f32 %v1867_v5  ;;  %v1967_v19 = vunpack.c.l.bf16 %v5163_v8 }
 0x3ce   : > { %4985 = vpow2.f32 %v1877_v7  ;;  %v1887_v15 = vmul.f32 1.442695, %v1786_v13  ;;  %v1968_v26 = vunpack.c.h.bf16 %v5163_v8  ;;  %v1784_v9 = vsub.f32 %v8998_v22, %v1677_v61 }
 0x3cf   : > { %2701 = vadd.xlane.f32.xlu0 %v2700_v42  ;;  %v2706_v42 = vadd.f32 %v2024_v10, %v2023_v17  ;;  %v3196_v4 = vadd.f32 %v3121_v12, %v3120_v48  ;;  %4987 = vpow2.f32 %v1879_v31  ;;  %v1974_v17 = vunpack.c.h.bf16 %v5164_v40  ;;  %v9000_v12 = vld [vmem:[#allocation78_spill] sm:$0xff] }
 0x3d0   : > { %v1881_v31 = vmul.f32 1.442695, %v1783_v16 }
 0x3d1   : > { %3185 = vadd.xlane.f32.xlu1 %v3184_v47  ;;  %v2715_v47 = vadd.f32 %v2030_v57, %v2029_v2 }
 0x3d3   : > { %3167 = vadd.xlane.f32.xlu0 %v3166_v6  ;;  %v4976_v36 = vpop.eup %4975  ;;  %v1963_v6 = vunpack.c.l.bf16 %v5161_v63 }
 0x3d4   : > { %v4978_v59 = vpop.eup %4977  ;;  %v2295_v1 = vadd.f32 %v4976_v36, %v4974_v28  ;;  %v2028_v11 = vmul.f32 %v4976_v36, %v1964_v30 }
 0x3d5   : > { %2293 = vadd.xlane.f32.xlu1 %v2292_v58  ;;  %v1969_v58 = vunpack.c.l.bf16 %v5162_v53  ;;  %v4980_v18 = vpop.eup %4979 }
 0x3d6   : > { %v2304_v60 = vadd.f32 %v4980_v18, %v4978_v59  ;;  %v2034_v24 = vmul.f32 %v4980_v18, %v1970_v21  ;;  %v3119_v55 = vmul.f32 %v2028_v11, %v1964_v30  ;;  %v4982_v45 = vpop.eup %4981 }
 0x3d7   : > { %3170 = vadd.xlane.f32.xlu0 %v3169_v20  ;;  %v2027_v20 = vmul.f32 %v4974_v28, %v1963_v6  ;;  %v4984_v35 = vpop.eup %4983  ;;  %v2031_v57 = vmul.f32 %v4982_v45, %v1967_v19 }
 0x3d8   : > { %v3125_v41 = vmul.f32 %v2034_v24, %v1970_v21  ;;  %v4986_v14 = vpop.eup %4985  ;;  %v2301_v2 = vadd.f32 %v4984_v35, %v4982_v45  ;;  %v2032_v54 = vmul.f32 %v4984_v35, %v1968_v26  ;;  %v5165_v21 = vld [vmem:[%s5551_s11 + $0x78] sm:$0xff] }
 0x3d9   : > { %2710 = vadd.xlane.f32.xlu1 %v2709_v46  ;;  %v2033_v46 = vmul.f32 %v4978_v59, %v1969_v58  ;;  %v2712_v62 = vadd.f32 %v2028_v11, %v2027_v20  ;;  %v3118_v44 = vmul.f32 %v2027_v20, %v1963_v6  ;;  %v4988_v10 = vpop.eup %4987  ;;  %v3122_v7 = vmul.f32 %v2031_v57, %v1967_v19  ;;  %v5166_v20 = vld [vmem:[%s5551_s11 + $0x90] sm:$0xff] }
 0x3da   : > { %v2310_v50 = vadd.f32 %v4988_v10, %v4986_v14  ;;  %v2038_v27 = vmul.f32 %v4988_v10, %v1974_v17  ;;  %v2718_v28 = vadd.f32 %v2032_v54, %v2031_v57  ;;  %v3123_v36 = vmul.f32 %v2032_v54, %v1968_v26 }
 0x3db   : > { %3182 = vadd.xlane.f32.xlu0 %v3181_v34  ;;  %v1873_v34 = vmul.f32 1.442695, %v1779_v38  ;;  %v2721_v0 = vadd.f32 %v2034_v24, %v2033_v46  ;;  %v3124_v43 = vmul.f32 %v2033_v46, %v1969_v58  ;;  %v3193_v29 = vadd.f32 %v3119_v55, %v3118_v44  ;;  %v1687_v46 = vpop.permute.xlu1 %1686 }
 0x3dc   : > { %v3129_v37 = vmul.f32 %v2038_v27, %v1974_v17  ;;  %v1883_v6 = vmul.f32 1.442695, %v1784_v9  ;;  %v3199_v58 = vadd.f32 %v3123_v36, %v3122_v7  ;;  %v1971_v18 = vunpack.c.l.bf16 %v5165_v21  ;;  %v9005_v7 = vld [vmem:[#allocation79_spill] sm:$0xff] }
 0x3dd   : > { %3191 = vadd.xlane.f32.xlu1 %v3190_v3  ;;  %v1885_v3 = vmul.f32 1.442695, %v1785_v23  ;;  %4989 = vpow2.f32 %v1873_v34  ;;  %v3202_v51 = vadd.f32 %v3125_v41, %v3124_v43  ;;  %v1972_v25 = vunpack.c.h.bf16 %v5165_v21  ;;  %v9002_v43 = vld [vmem:[#allocation74_spill] sm:$0xff] }
 0x3de   : > { %4991 = vpow2.f32 %v1875_v33  ;;  %v1977_v11 = vunpack.c.l.bf16 %v5166_v20  ;;  %v1978_v38 = vunpack.c.h.bf16 %v5166_v20  ;;  %v1788_v41 = vsub.f32 %v9002_v43, %v1687_v46  ;;  %v9003_v33 = vld [vmem:[#allocation83_spill] sm:$0xff] }
 0x3df   : > { %2290 = vadd.xlane.f32.xlu0 %v2289_v39  ;;  %v1973_v39 = vunpack.c.l.bf16 %v5164_v40  ;;  %4993 = vpow2.f32 %v1885_v3  ;;  %v9004_v3 = vld [vmem:[#allocation84_spill] sm:$0xff] }
 0x3e0   : > { %4995 = vpow2.f32 %v1887_v15  ;;  %v1891_v40 = vmul.f32 1.442695, %v1788_v41 }
 0x3e1   : > { %2299 = vadd.xlane.f32.xlu1 %v2298_v56  ;;  %v1692_v56 = vpop.permute.xlu0 %1691  ;;  %4997 = vpow2.f32 %v1881_v31 }
 0x3e2   : > { %v1790_v5 = vsub.f32 %v9000_v12, %v1692_v56  ;;  %4999 = vpow2.f32 %v1883_v6 }
 0x3e3   : > { %2707 = vadd.xlane.f32.xlu0 %v2706_v42  ;;  %v2037_v42 = vmul.f32 %v4986_v14, %v1973_v39 }
 0x3e4   : > { %v1895_v53 = vmul.f32 1.442695, %v1790_v5 }
 0x3e5   : > { %2716 = vadd.xlane.f32.xlu1 %v2715_v47  ;;  %v8999_v47 = vld [vmem:[#allocation77_spill] sm:$0xff]  ;;  %v3128_v63 = vmul.f32 %v2037_v42, %v1973_v39  ;;  %v1702_v24 = vpop.permute.xlu0 %1701 }
 0x3e6   : > { %v1789_v48 = vsub.f32 %v8999_v47, %v1692_v56  ;;  %v1793_v45 = vsub.f32 %v9003_v33, %v1702_v24  ;;  %v1794_v35 = vsub.f32 %v9004_v3, %v1702_v24  ;;  %v1697_v47 = vpop.permute.xlu1 %1696 }
 0x3e7   : > { %3188 = vadd.xlane.f32.xlu0 %v3187_v32  ;;  %v2727_v32 = vadd.f32 %v2038_v27, %v2037_v42  ;;  %v4990_v30 = vpop.eup %4989  ;;  %v5168_v42 = vld [vmem:[%s5551_s11 + $0xa0] sm:$0xff]  ;;  %v1791_v36 = vsub.f32 %v9005_v7, %v1697_v47 }
 0x3e8   : > { %v1893_v59 = vmul.f32 1.442695, %v1789_v48  ;;  %v2035_v23 = vmul.f32 %v4990_v30, %v1971_v18  ;;  %v1901_v17 = vmul.f32 1.442695, %v1793_v45  ;;  %v1903_v61 = vmul.f32 1.442695, %v1794_v35 }
 0x3e9   : > { %3197 = vadd.xlane.f32.xlu1 %v3196_v4  ;;  %v4992_v4 = vpop.eup %4991  ;;  %v1981_v27 = vunpack.c.l.bf16 %v5168_v42  ;;  %v1982_v22 = vunpack.c.h.bf16 %v5168_v42  ;;  %v1712_v48 = vpop.permute.xlu0 %1711 }
 0x3ea   : > { %v4994_v49 = vpop.eup %4993  ;;  %5001 = vpow2.f32 %v1893_v59  ;;  %v2307_v52 = vadd.f32 %v4992_v4, %v4990_v30  ;;  %v2036_v13 = vmul.f32 %v4992_v4, %v1972_v25  ;;  %v9007_v30 = vld [vmem:[#allocation89_spill] sm:$0xff]  ;;  %v9008_v4 = vld [vmem:[#allocation91_spill] sm:$0xff]  ;;  %v1707_v33 = vpop.permute.xlu1 %1706 }
 0x3eb   : > { %2296 = vadd.xlane.f32.xlu0 %v2295_v1  ;;  %v3208_v1 = vadd.f32 %v3129_v37, %v3128_v63  ;;  %5003 = vpow2.f32 %v1895_v53  ;;  %v2041_v34 = vmul.f32 %v4994_v49, %v1977_v11  ;;  %v9006_v37 = vld [vmem:[#allocation80_spill] sm:$0xff]  ;;  %v1797_v59 = vsub.f32 %v9007_v30, %v1712_v48 }
 0x3ec   : > { %v2724_v15 = vadd.f32 %v2036_v13, %v2035_v23  ;;  %v3127_v8 = vmul.f32 %v2036_v13, %v1972_v25  ;;  %v1792_v6 = vsub.f32 %v9006_v37, %v1697_v47  ;;  %v1798_v53 = vsub.f32 %v9008_v4, %v1712_v48 }
 0x3ed   : > { %2305 = vadd.xlane.f32.xlu1 %v2304_v60  ;;  %v4996_v60 = vpop.eup %4995  ;;  %v3132_v14 = vmul.f32 %v2041_v34, %v1977_v11  ;;  %v1897_v25 = vmul.f32 1.442695, %v1791_v36  ;;  %v1722_v45 = vpop.permute.xlu0 %1721 }
 0x3ee   : > { %v2316_v55 = vadd.f32 %v4996_v60, %v4994_v49  ;;  %v4998_v39 = vpop.eup %4997  ;;  %v1899_v11 = vmul.f32 1.442695, %v1792_v6  ;;  %v1911_v24 = vmul.f32 1.442695, %v1798_v53  ;;  %v1717_v48 = vpop.permute.xlu1 %1716 }
 0x3ef   : > { %2713 = vadd.xlane.f32.xlu0 %v2712_v62  ;;  %v9001_v62 = vld [vmem:[#allocation73_spill] sm:$0xff]  ;;  %v5000_v10 = vpop.eup %4999 }
 0x3f0   : > { %v1787_v44 = vsub.f32 %v9001_v62, %v1687_v46  ;;  %v2313_v12 = vadd.f32 %v5000_v10, %v4998_v39 }
 0x3f1   : > { %2722 = vadd.xlane.f32.xlu1 %v2721_v0  ;;  %v2042_v0 = vmul.f32 %v4996_v60, %v1978_v38  ;;  %v1909_v60 = vmul.f32 1.442695, %v1797_v59  ;;  %v1732_v4 = vpop.permute.xlu0 %1731 }
 0x3f2   : > { %v1889_v19 = vmul.f32 1.442695, %v1787_v44  ;;  %v6833_v59 = vpop.permute.xlu1 %1726 }
 0x3f3   : > { %3194 = vadd.xlane.f32.xlu0 %v3193_v29  ;;  %v3126_v29 = vmul.f32 %v2035_v23, %v1971_v18  ;;  %v2733_v26 = vadd.f32 %v2042_v0, %v2041_v34  ;;  %v5169_v23 = vld [vmem:[%s5551_s11 + $0x98] sm:$0xff]  ;;  %v5170_v34 = vld [vmem:[%s5551_s11 + $0xb0] sm:$0xff] }
 0x3f4   : > { %v5002_v16 = vpop.eup %5001  ;;  %5005 = vpow2.f32 %v1889_v19  ;;  %v1979_v13 = vunpack.c.l.bf16 %v5169_v23  ;;  %v1980_v62 = vunpack.c.h.bf16 %v5169_v23  ;;  %v1986_v43 = vunpack.c.h.bf16 %v5170_v34 }
 0x3f5   : > { %3203 = vadd.xlane.f32.xlu1 %v3202_v51  ;;  %v3133_v51 = vmul.f32 %v2042_v0, %v1978_v38  ;;  %v3205_v56 = vadd.f32 %v3127_v8, %v3126_v29  ;;  %v5004_v9 = vpop.eup %5003  ;;  %5007 = vpow2.f32 %v1891_v40  ;;  %v1985_v0 = vunpack.c.l.bf16 %v5170_v34  ;;  %v9009_v29 = vld [vmem:[#allocation85_spill] sm:$0xff] }
 0x3f6   : > { %5009 = vpow2.f32 %v1901_v17  ;;  %v2322_v31 = vadd.f32 %v5004_v9, %v5002_v16  ;;  %v2046_v63 = vmul.f32 %v5004_v9, %v1982_v22  ;;  %v1795_v8 = vsub.f32 %v9009_v29, %v1707_v33  ;;  %v6839_v23 = vpop.permute.xlu1 %1736 }
 0x3f7   : > { %2302 = vadd.xlane.f32.xlu0 %v2301_v2  ;;  %v5167_v2 = vld [vmem:[%s5551_s11 + $0x88] sm:$0xff]  ;;  %5011 = vpow2.f32 %v1903_v61 }
 0x3f8   : > { %v1975_v57 = vunpack.c.l.bf16 %v5167_v2  ;;  %v1976_v54 = vunpack.c.h.bf16 %v5167_v2  ;;  %v3137_v20 = vmul.f32 %v2046_v63, %v1982_v22  ;;  %5013 = vpow2.f32 %v1897_v25 }
 0x3f9   : > { %2311 = vadd.xlane.f32.xlu1 %v2310_v50  ;;  %v3214_v50 = vadd.f32 %v3133_v51, %v3132_v14  ;;  %5015 = vpow2.f32 %v1899_v11  ;;  %v9010_v51 = vld [vmem:[#allocation87_spill] sm:$0xff]  ;;  %v9014_v11 = vld [vmem:[#allocation94_spill] sm:$0xff] }
 0x3fa   : > { %v2039_v5 = vmul.f32 %v4998_v39, %v1975_v57  ;;  %5017 = vpow2.f32 %v1909_v60  ;;  %v1796_v40 = vsub.f32 %v9010_v51, %v1707_v33  ;;  %v9011_v39 = vld [vmem:[#allocation97_spill] sm:$0xff]  ;;  %v9015_v60 = vld [vmem:[#allocation103_spill] sm:$0xff]  ;;  %v6841_v29 = vpop.permute.xlu1 %1746 }
 0x3fb   : > { %2719 = vadd.xlane.f32.xlu0 %v2718_v28  ;;  %v2040_v28 = vmul.f32 %v5000_v10, %v1976_v54  ;;  %5019 = vpow2.f32 %v1911_v24  ;;  %v1801_v17 = vsub.f32 %v9011_v39, %v1722_v45  ;;  %v9012_v10 = vld [vmem:[#allocation98_spill] sm:$0xff]  ;;  %v9016_v24 = vld [vmem:[#allocation104_spill] sm:$0xff] }
 0x3fc   : > { %v3130_v21 = vmul.f32 %v2039_v5, %v1975_v57  ;;  %v1802_v61 = vsub.f32 %v9012_v10, %v1722_v45  ;;  %v5174_v39 = vld [vmem:[%s5551_s11 + $0xd0] sm:$0xff] }
 0x3fd   : > { %2728 = vadd.xlane.f32.xlu1 %v2727_v32  ;;  %v2045_v32 = vmul.f32 %v5002_v16, %v1981_v27  ;;  %v3131_v18 = vmul.f32 %v2040_v28, %v1976_v54  ;;  %v1905_v54 = vmul.f32 1.442695, %v1795_v8  ;;  %v1917_v9 = vmul.f32 1.442695, %v1801_v17 }
 0x3fe   : > { %v5006_v38 = vpop.eup %5005  ;;  %v1993_v17 = vunpack.c.l.bf16 %v5174_v39  ;;  %v1994_v10 = vunpack.c.h.bf16 %v5174_v39 }
 0x3ff   : > { %3200 = vadd.xlane.f32.xlu0 %v3199_v58  ;;  %v2730_v58 = vadd.f32 %v2040_v28, %v2039_v5  ;;  %v2739_v49 = vadd.f32 %v2046_v63, %v2045_v32  ;;  %v5008_v46 = vpop.eup %5007  ;;  %v2043_v35 = vmul.f32 %v5006_v38, %v1979_v13  ;;  %v5171_v28 = vld [vmem:[%s5551_s11 + $0xa8] sm:$0xff]  ;;  %5021 = vpow2.f32 %v1905_v54  ;;  %v5172_v63 = vld [vmem:[%s5551_s11 + $0xc0] sm:$0xff] }
 0x400   : > { %v5010_v44 = vpop.eup %5009  ;;  %v2319_v3 = vadd.f32 %v5008_v46, %v5006_v38  ;;  %v1983_v7 = vunpack.c.l.bf16 %v5171_v28  ;;  %v1984_v36 = vunpack.c.h.bf16 %v5171_v28  ;;  %v1989_v37 = vunpack.c.l.bf16 %v5172_v63 }
 0x401   : > { %3209 = vadd.xlane.f32.xlu1 %v3208_v1  ;;  %v3136_v1 = vmul.f32 %v2045_v32, %v1981_v27  ;;  %v5012_v41 = vpop.eup %5011  ;;  %v3134_v2 = vmul.f32 %v2043_v35, %v1979_v13  ;;  %v1907_v27 = vmul.f32 1.442695, %v1796_v40  ;;  %v1990_v6 = vunpack.c.h.bf16 %v5172_v63 }
 0x402   : > { %v2328_v19 = vadd.f32 %v5012_v41, %v5010_v44  ;;  %v2050_v14 = vmul.f32 %v5012_v41, %v1986_v43  ;;  %v5014_v22 = vpop.eup %5013  ;;  %v1800_v38 = vsub.f32 %v9014_v11, %v1717_v48  ;;  %v5175_v11 = vld [vmem:[%s5551_s11 + $0xc8] sm:$0xff] }
 0x403   : > { %2308 = vadd.xlane.f32.xlu0 %v2307_v52  ;;  %v3211_v52 = vadd.f32 %v3131_v18, %v3130_v21  ;;  %v5016_v47 = vpop.eup %5015  ;;  %5023 = vpow2.f32 %v1907_v27  ;;  %v9013_v18 = vld [vmem:[#allocation93_spill] sm:$0xff] }
 0x404   : > { %v3141_v42 = vmul.f32 %v2050_v14, %v1986_v43  ;;  %5025 = vpow2.f32 %v1917_v9  ;;  %v2325_v53 = vadd.f32 %v5016_v47, %v5014_v22  ;;  %v2048_v21 = vmul.f32 %v5016_v47, %v1984_v36  ;;  %v9018_v47 = vld [vmem:[#allocation100_spill] sm:$0xff] }
 0x405   : > { %2317 = vadd.xlane.f32.xlu1 %v2316_v55  ;;  %v3220_v55 = vadd.f32 %v3137_v20, %v3136_v1  ;;  %v1799_v25 = vsub.f32 %v9013_v18, %v1717_v48  ;;  %v1915_v41 = vmul.f32 1.442695, %v1800_v38  ;;  %v1804_v48 = vsub.f32 %v9018_v47, %v6833_v59 }
 0x406   : > { %v1991_v38 = vunpack.c.l.bf16 %v5175_v11 }
 0x407   : > { %2725 = vadd.xlane.f32.xlu0 %v2724_v15  ;;  %v2044_v15 = vmul.f32 %v5008_v46, %v1980_v62  ;;  %v1805_v46 = vsub.f32 %v9015_v60, %v1732_v4  ;;  %v1992_v60 = vunpack.c.h.bf16 %v5175_v11 }
 0x409   : > { %2734 = vadd.xlane.f32.xlu1 %v2733_v26  ;;  %v2049_v26 = vmul.f32 %v5010_v44, %v1985_v0  ;;  %v3135_v57 = vmul.f32 %v2044_v15, %v1980_v62  ;;  %v3139_v44 = vmul.f32 %v2048_v21, %v1984_v36  ;;  %v1925_v45 = vmul.f32 1.442695, %v1805_v46 }
 0x40b   : > { %3206 = vadd.xlane.f32.xlu0 %v3205_v56  ;;  %v2736_v56 = vadd.f32 %v2044_v15, %v2043_v35  ;;  %v2745_v16 = vadd.f32 %v2050_v14, %v2049_v26  ;;  %v3217_v5 = vadd.f32 %v3135_v57, %v3134_v2 }
 0x40d   : > { %3215 = vadd.xlane.f32.xlu1 %v3214_v50  ;;  %v3140_v50 = vmul.f32 %v2049_v26, %v1985_v0 }
 0x40f   : > { %2314 = vadd.xlane.f32.xlu0 %v2313_v12  ;;  %v1919_v12 = vmul.f32 1.442695, %v1802_v61  ;;  %v3226_v32 = vadd.f32 %v3141_v42, %v3140_v50  ;;  %v9017_v50 = vld [vmem:[#allocation99_spill] sm:$0xff] }
 0x410   : > { %v1803_v42 = vsub.f32 %v9017_v50, %v6833_v59 }
 0x411   : > { %2323 = vadd.xlane.f32.xlu1 %v2322_v31  ;;  %v5018_v31 = vpop.eup %5017  ;;  %5027 = vpow2.f32 %v1919_v12  ;;  %v9019_v12 = vld [vmem:[#allocation109_spill] sm:$0xff] }
 0x412   : > { %v5020_v30 = vpop.eup %5019  ;;  %v2053_v1 = vmul.f32 %v5018_v31, %v1989_v37 }
 0x413   : > { %2731 = vadd.xlane.f32.xlu0 %v2730_v58  ;;  %v2047_v58 = vmul.f32 %v5014_v22, %v1983_v7  ;;  %v2054_v20 = vmul.f32 %v5020_v30, %v1990_v6  ;;  %v5022_v33 = vpop.eup %5021 }
 0x414   : > { %v3144_v0 = vmul.f32 %v2053_v1, %v1989_v37  ;;  %v5024_v35 = vpop.eup %5023 }
 0x415   : > { %2740 = vadd.xlane.f32.xlu1 %v2739_v49  ;;  %v2334_v49 = vadd.f32 %v5020_v30, %v5018_v31  ;;  %v2742_v13 = vadd.f32 %v2048_v21, %v2047_v58  ;;  %v3138_v62 = vmul.f32 %v2047_v58, %v1983_v7  ;;  %v2751_v34 = vadd.f32 %v2054_v20, %v2053_v1  ;;  %v5026_v51 = vpop.eup %5025  ;;  %v9020_v7 = vld [vmem:[#allocation111_spill] sm:$0xff] }
 0x416   : > { %v3145_v43 = vmul.f32 %v2054_v20, %v1990_v6  ;;  %v2331_v57 = vadd.f32 %v5024_v35, %v5022_v33  ;;  %v2057_v22 = vmul.f32 %v5026_v51, %v1993_v17  ;;  %v1921_v6 = vmul.f32 1.442695, %v1803_v42 }
 0x417   : > { %3212 = vadd.xlane.f32.xlu0 %v3211_v52  ;;  %v1806_v52 = vsub.f32 %v9016_v24, %v1732_v4  ;;  %v3223_v8 = vadd.f32 %v3139_v44, %v3138_v62  ;;  %v1923_v58 = vmul.f32 1.442695, %v1804_v48 }
 0x418   : > { %v3232_v40 = vadd.f32 %v3145_v43, %v3144_v0  ;;  %v3148_v4 = vmul.f32 %v2057_v22, %v1993_v17 }
 0x419   : > { %3221 = vadd.xlane.f32.xlu1 %v3220_v55  ;;  %v1913_v55 = vmul.f32 1.442695, %v1799_v25  ;;  %v1927_v15 = vmul.f32 1.442695, %v1806_v52  ;;  %v5176_v52 = vld [vmem:[%s5551_s11 + $0xe0] sm:$0xff] }
 0x41a   : > { %v1998_v62 = vunpack.c.h.bf16 %v5176_v52 }
 0x41b   : > { %2320 = vadd.xlane.f32.xlu0 %v2319_v3  ;;  %v1742_v3 = vpop.permute.xlu0 %1741  ;;  %5029 = vpow2.f32 %v1913_v55  ;;  %v5028_v61 = vpop.eup %5027 }
 0x41c   : > { %5031 = vpow2.f32 %v1915_v41  ;;  %v2340_v27 = vadd.f32 %v5028_v61, %v5026_v51  ;;  %v2058_v9 = vmul.f32 %v5028_v61, %v1994_v10  ;;  %v1810_v36 = vsub.f32 %v9020_v7, %v1742_v3 }
 0x41d   : > { %2329 = vadd.xlane.f32.xlu1 %v2328_v19  ;;  %v5173_v19 = vld [vmem:[%s5551_s11 + $0xb8] sm:$0xff]  ;;  %5033 = vpow2.f32 %v1925_v45 }
 0x41e   : > { %v1987_v26 = vunpack.c.l.bf16 %v5173_v19  ;;  %v1988_v14 = vunpack.c.h.bf16 %v5173_v19  ;;  %5035 = vpow2.f32 %v1927_v15  ;;  %v2757_v30 = vadd.f32 %v2058_v9, %v2057_v22  ;;  %v5177_v22 = vld [vmem:[%s5551_s11 + $0xd8] sm:$0xff] }
 0x41f   : > { %2737 = vadd.xlane.f32.xlu0 %v2736_v56  ;;  %5037 = vpow2.f32 %v1921_v6  ;;  %v1996_v47 = vunpack.c.h.bf16 %v5177_v22 }
 0x420   : > { %v2051_v54 = vmul.f32 %v5022_v33, %v1987_v26  ;;  %5039 = vpow2.f32 %v1923_v58  ;;  %v9024_v58 = vld [vmem:[#allocation129_spill] sm:$0xff] }
 0x421   : > { %2746 = vadd.xlane.f32.xlu1 %v2745_v16  ;;  %v2052_v16 = vmul.f32 %v5024_v35, %v1988_v14  ;;  %v9021_v35 = vld [vmem:[#allocation105_spill] sm:$0xff] }
 0x422   : > { %v3142_v63 = vmul.f32 %v2051_v54, %v1987_v26  ;;  %v1807_v15 = vsub.f32 %v9021_v35, %v6839_v23 }
 0x423   : > { %3218 = vadd.xlane.f32.xlu0 %v3217_v5  ;;  %v1809_v5 = vsub.f32 %v9019_v12, %v1742_v3  ;;  %v3143_v37 = vmul.f32 %v2052_v16, %v1988_v14 }
 0x425   : > { %3227 = vadd.xlane.f32.xlu1 %v3226_v32  ;;  %v2748_v32 = vadd.f32 %v2052_v16, %v2051_v54  ;;  %v5030_v59 = vpop.eup %5029  ;;  %v1933_v21 = vmul.f32 1.442695, %v1809_v5  ;;  %v3229_v20 = vadd.f32 %v3143_v37, %v3142_v63  ;;  %v5178_v5 = vld [vmem:[%s5551_s11 + $0xf0] sm:$0xff] }
 0x426   : > { %v5032_v25 = vpop.eup %5031  ;;  %v2055_v43 = vmul.f32 %v5030_v59, %v1991_v38  ;;  %v2001_v7 = vunpack.c.l.bf16 %v5178_v5 }
 0x427   : > { %2326 = vadd.xlane.f32.xlu0 %v2325_v53  ;;  %v3149_v53 = vmul.f32 %v2058_v9, %v1994_v10  ;;  %v5034_v46 = vpop.eup %5033  ;;  %5041 = vpow2.f32 %v1933_v21  ;;  %v2337_v0 = vadd.f32 %v5032_v25, %v5030_v59  ;;  %v2056_v41 = vmul.f32 %v5032_v25, %v1992_v60 }
 0x428   : > { %v5036_v44 = vpop.eup %5035  ;;  %v1995_v9 = vunpack.c.l.bf16 %v5177_v22 }
 0x429   : > { %2335 = vadd.xlane.f32.xlu1 %v2334_v49  ;;  %v1935_v49 = vmul.f32 1.442695, %v1810_v36  ;;  %v3238_v24 = vadd.f32 %v3149_v53, %v3148_v4  ;;  %v2346_v33 = vadd.f32 %v5036_v44, %v5034_v46  ;;  %v2062_v3 = vmul.f32 %v5036_v44, %v1998_v62  ;;  %v5038_v54 = vpop.eup %5037  ;;  %v9023_v53 = vld [vmem:[#allocation130_spill] sm:$0xff] }
 0x42a   : > { %v2754_v51 = vadd.f32 %v2056_v41, %v2055_v43  ;;  %v3147_v39 = vmul.f32 %v2056_v41, %v1992_v60  ;;  %v2002_v36 = vunpack.c.h.bf16 %v5178_v5  ;;  %v1493_v59 = vsub.f32 %v9024_v58, %v9023_v53 }
 0x42b   : > { %2743 = vadd.xlane.f32.xlu0 %v2742_v13  ;;  %v1997_v13 = vunpack.c.l.bf16 %v5176_v52  ;;  %5043 = vpow2.f32 %v1935_v49  ;;  %v3153_v61 = vmul.f32 %v2062_v3, %v1998_v62 }
 0x42c   : > { %v1525_v44 = vmul.f32 1.442695, %v1493_v59 }
 0x42d   : > { %2752 = vadd.xlane.f32.xlu1 %v2751_v34  ;;  %v2061_v45 = vmul.f32 %v5034_v46, %v1997_v13 }
 0x42f   : > { %3224 = vadd.xlane.f32.xlu0 %v3223_v8  ;;  %v9022_v8 = vld [vmem:[#allocation107_spill] sm:$0xff]  ;;  %v2763_v17 = vadd.f32 %v2062_v3, %v2061_v45  ;;  %v3152_v10 = vmul.f32 %v2061_v45, %v1997_v13  ;;  %v9027_v45 = vld [vmem:[#allocation134_spill] sm:$0xff]  ;;  %v9028_v3 = vld [vmem:[#allocation133_spill] sm:$0xff] }
 0x430   : > { %v6845_v56 = vpop.xlane.xlu0 %2263  ;;  %v1808_v19 = vsub.f32 %v9022_v8, %v6839_v23  ;;  %v5040_v23 = vpop.eup %5039  ;;  %v1498_v35 = vsub.f32 %v9028_v3, %v9027_v45 }
 0x431   : > { %3233 = vadd.xlane.f32.xlu1 %v3232_v40  ;;  %v3146_v40 = vmul.f32 %v2055_v43, %v1991_v38  ;;  %v5042_v48 = vpop.eup %5041  ;;  %v3244_v12 = vadd.f32 %v3153_v61, %v3152_v10  ;;  %v2343_v6 = vadd.f32 %v5040_v23, %v5038_v54  ;;  %v2060_v4 = vmul.f32 %v5040_v23, %v1996_v47  ;;  %v9026_v38 = vld [vmem:[#allocation114_spill] sm:$0xff] }
 0x432   : > { %v6847_v2 = vpop.xlane.xlu1 %2275  ;;  %v1931_v16 = vmul.f32 1.442695, %v1808_v19  ;;  %v2065_v25 = vmul.f32 %v5042_v48, %v2001_v7  ;;  %v1812_v60 = vsub.f32 %v9026_v38, %v6841_v29 }
 0x433   : > { %2332 = vadd.xlane.f32.xlu0 %v2331_v57  ;;  %v1929_v57 = vmul.f32 1.442695, %v1807_v15  ;;  %v3151_v62 = vmul.f32 %v2060_v4, %v1996_v47 }
 0x434   : > { %v6854_v28 = vpop.xlane.xlu0 %2278  ;;  %v3156_v43 = vmul.f32 %v2065_v25, %v2001_v7  ;;  %v1939_v15 = vmul.f32 1.442695, %v1812_v60 }
 0x435   : > { %2341 = vadd.xlane.f32.xlu1 %v2340_v27  ;;  %v3235_v27 = vadd.f32 %v3147_v39, %v3146_v40  ;;  %5045 = vpow2.f32 %v1929_v57  ;;  %v5179_v40 = vld [vmem:[%s5551_s11 + $0xe8] sm:$0xff]  ;;  %v1535_v57 = vmul.f32 1.442695, %v1498_v35 }
 0x436   : > { %v6857_v31 = vpop.xlane.xlu1 %2266  ;;  %5047 = vpow2.f32 %v1931_v16  ;;  %v1999_v39 = vunpack.c.l.bf16 %v5179_v40 }
 0x437   : > { %2749 = vadd.xlane.f32.xlu0 %v2748_v32  ;;  %v5044_v32 = vpop.eup %5043  ;;  %5049 = vpow2.f32 %v1525_v44  ;;  %v9031_v44 = vld [vmem:[#allocation137_spill] sm:$0xff] }
 0x438   : > { %v6859_v18 = vpop.xlane.xlu0 %2680  ;;  %v2352_v21 = vadd.f32 %v5044_v32, %v5042_v48  ;;  %v2066_v49 = vmul.f32 %v5044_v32, %v2002_v36 }
 0x439   : > { %2758 = vadd.xlane.f32.xlu1 %v2757_v30  ;;  %v2059_v30 = vmul.f32 %v5038_v54, %v1995_v9 }
 0x43a   : > { %v6861_v1 = vpop.xlane.xlu1 %2692  ;;  %v3157_v41 = vmul.f32 %v2066_v49, %v2002_v36 }
 0x43b   : > { %3230 = vadd.xlane.f32.xlu0 %v3229_v20  ;;  %v9025_v20 = vld [vmem:[#allocation113_spill] sm:$0xff]  ;;  %v2760_v52 = vadd.f32 %v2060_v4, %v2059_v30  ;;  %v3150_v13 = vmul.f32 %v2059_v30, %v1995_v9  ;;  %v5180_v4 = vld [vmem:[%s5551_s11 + $0xf8] sm:$0xff]  ;;  %s5371_s11 = smov 1  }
 0x43c   : > { %v6865_v55 = vpop.xlane.xlu0 %2695  ;;  %v1811_v11 = vsub.f32 %v9025_v20, %v6841_v29  ;;  %v3250_v61 = vadd.f32 %v3157_v41, %v3156_v43  ;;  %v2003_v53 = vunpack.c.l.bf16 %v5180_v4  ;;  %v2004_v58 = vunpack.c.h.bf16 %v5180_v4  ;;  %v9032_v41 = vld [vmem:[#allocation8_spill] sm:$0xff] }
 0x43d   : > { %3239 = vadd.xlane.f32.xlu1 %v3238_v24 }
 0x43e   : > { %v6867_v34 = vpop.xlane.xlu1 %2683 }
 0x43f   : > { %2338 = vadd.xlane.f32.xlu0 %v2337_v0  ;;  %v2769_v0 = vadd.f32 %v2066_v49, %v2065_v25  ;;  %v5046_v8 = vpop.eup %5045  ;;  %v9029_v25 = vld [vmem:[#allocation5_spill] sm:$0xff] }
 0x440   : > { %v6873_v26 = vpop.xlane.xlu0 %3161  ;;  %v5048_v10 = vpop.eup %5047 }
 0x441   : > { %2347 = vadd.xlane.f32.xlu1 %v2346_v33  ;;  %v1937_v33 = vmul.f32 1.442695, %v1811_v11  ;;  %v2349_v23 = vadd.f32 %v5048_v10, %v5046_v8  ;;  %v5050_v7 = vpop.eup %5049 }
 0x442   : > { %v6875_v14 = vpop.xlane.xlu1 %3173  ;;  %v2230_v49 = vmul.f32 %v5050_v7, %v9029_v25 }
 0x443   : > { %2755 = vadd.xlane.f32.xlu0 %v2754_v51  ;;  %v3241_v51 = vadd.f32 %v3151_v62, %v3150_v13  ;;  %5051 = vpow2.f32 %v1937_v33  ;;  %v9030_v62 = vld [vmem:[#allocation138_spill] sm:$0xff] }
 0x444   : > { %v6877_v50 = vpop.xlane.xlu0 %3176  ;;  %5053 = vpow2.f32 %v1939_v15  ;;  %v2358_v13 = vadd.f32 %v6845_v56, %v2230_v49  ;;  %v9042_v49 = vld [vmem:[#allocation40_spill] sm:$0xff] }
 0x445   : > { %2764 = vadd.xlane.f32.xlu1 %v2763_v17  ;;  %v2000_v17 = vunpack.c.h.bf16 %v5179_v40  ;;  %5055 = vpow2.f32 %v1535_v57 }
 0x446   : > { %v6879_v42 = vpop.xlane.xlu1 %3164 }
 0x447   : > { %3236 = vadd.xlane.f32.xlu0 %v3235_v27  ;;  %v2063_v27 = vmul.f32 %v5046_v8, %v1999_v39  ;;  %v2064_v22 = vmul.f32 %v5048_v10, %v2000_v17  ;;  %v9033_v8 = vld [vmem:[#allocation128_spill] sm:$0xff]  ;;  %v9036_v10 = vld [vmem:[#allocation139_spill] sm:$0xff] }
 0x448   : > { %v6883_v63 = vpop.xlane.xlu0 %2269 }
 0x449   : > { %3245 = vadd.xlane.f32.xlu1 %v3244_v12  ;;  %v2766_v48 = vadd.f32 %v2064_v22, %v2063_v27  ;;  %v3154_v12 = vmul.f32 %v2063_v27, %v1999_v39  ;;  %v3155_v5 = vmul.f32 %v2064_v22, %v2000_v17  ;;  %v9035_v17 = vld [vmem:[#allocation140_spill] sm:$0xff] }
 0x44a   : > { %v6885_v37 = vpop.xlane.xlu1 %2281 }
 0x44b   : > { %2344 = vadd.xlane.f32.xlu0 %v2343_v6  ;;  %v3247_v30 = vadd.f32 %v3155_v5, %v3154_v12  ;;  %v9038_v5 = vld [vmem:[#allocation132_spill] sm:$0xff] }
 0x44c   : > { %v6893_v46 = vpop.xlane.xlu0 %2272 }
 0x44d   : > { %2353 = vadd.xlane.f32.xlu1 %v2352_v21  ;;  %v5052_v32 = vpop.eup %5051 }
 0x44e   : > { %v6895_v24 = vpop.xlane.xlu1 %2698  ;;  %v5054_v59 = vpop.eup %5053  ;;  %v2067_v38 = vmul.f32 %v5052_v32, %v2003_v53 }
 0x44f   : > { %2761 = vadd.xlane.f32.xlu0 %v2760_v52  ;;  %v2355_v11 = vadd.f32 %v5054_v59, %v5052_v32  ;;  %v2068_v60 = vmul.f32 %v5054_v59, %v2004_v58  ;;  %v5056_v52 = vpop.eup %5055  ;;  %v9039_v32 = vld [vmem:[#allocation131_spill] sm:$0xff] }
 0x450   : > { %v6899_v29 = vpop.xlane.xlu0 %2284  ;;  %v2235_v33 = vmul.f32 %v5056_v52, %v9032_v41  ;;  %v3158_v35 = vmul.f32 %v2067_v38, %v2003_v53  ;;  %v9040_v53 = vld [vmem:[#allocation144_spill] sm:$0xff] }
 0x451   : > { %2770 = vadd.xlane.f32.xlu1 %v2769_v0  ;;  %v1495_v0 = vsub.f32 %v9031_v44, %v9030_v62  ;;  %v2772_v3 = vadd.f32 %v2068_v60, %v2067_v38  ;;  %v3159_v15 = vmul.f32 %v2068_v60, %v2004_v58  ;;  %v9041_v58 = vld [vmem:[#allocation143_spill] sm:$0xff]  ;;  %v9043_v44 = vld [vmem:[#allocation70_spill] sm:$0xff] }
 0x452   : > { %v6901_v19 = vpop.xlane.xlu1 %3179  ;;  %v2363_v56 = vadd.f32 %v6854_v28, %v2235_v33  ;;  %v1500_v59 = vsub.f32 %v9041_v58, %v9040_v53  ;;  %v9050_v58 = vld [vmem:[#allocation4_spill] sm:$0xff] }
 0x453   : > { %3242 = vadd.xlane.f32.xlu0 %v3241_v51  ;;  %v9034_v51 = vld [vmem:[#allocation127_spill] sm:$0xff]  ;;  %v1529_v39 = vmul.f32 1.442695, %v1495_v0  ;;  %v3064_v0 = vmul.f32 %v5050_v7, %v9043_v44  ;;  %v9052_v44 = vld [vmem:[#allocation41_spill] sm:$0xff] }
 0x454   : > { %v6904_v54 = vpop.xlane.xlu0 %2686  ;;  %v1497_v40 = vsub.f32 %v9034_v51, %v9033_v8 }
 0x455   : > { %3251 = vadd.xlane.f32.xlu1 %v3250_v61  ;;  %v1496_v61 = vsub.f32 %v9036_v10, %v9035_v17  ;;  %5057 = vpow2.f32 %v1529_v39  ;;  %v3256_v33 = vadd.f32 %v6873_v26, %v3064_v0 }
 0x456   : > { %v6906_v16 = vpop.xlane.xlu1 %2287  ;;  %v1533_v12 = vmul.f32 1.442695, %v1497_v40 }
 0x457   : > { %2350 = vadd.xlane.f32.xlu0 %v2349_v23  ;;  %v9037_v23 = vld [vmem:[#allocation37_spill] sm:$0xff]  ;;  %v1531_v4 = vmul.f32 1.442695, %v1496_v61 }
 0x458   : > { %v6908_v9 = vpop.xlane.xlu0 %2689  ;;  %v2647_v27 = vmul.f32 %v5050_v7, %v9037_v23  ;;  %5059 = vpow2.f32 %v1533_v12  ;;  %v9046_v23 = vld [vmem:[#allocation9_spill] sm:$0xff] }
 0x459   : > { %5061 = vpow2.f32 %v1531_v4 }
 0x45a   : > { %v6910_v47 = vpop.xlane.xlu1 %2704  ;;  %v2775_v28 = vadd.f32 %v6859_v18, %v2647_v27  ;;  %v1539_v18 = vmul.f32 1.442695, %v1500_v59 }
 0x45b   : > { %2767 = vadd.xlane.f32.xlu0 %v2766_v48  ;;  %v3253_v48 = vadd.f32 %v3159_v15, %v3158_v35  ;;  %v9044_v35 = vld [vmem:[#allocation75_spill] sm:$0xff] }
 0x45c   : > { %v6912_v36 = vpop.xlane.xlu0 %2701  ;;  %v3069_v15 = vmul.f32 %v5056_v52, %v9044_v35 }
 0x45e   : > { %v6914_v6 = vpop.xlane.xlu1 %3185  ;;  %v3261_v7 = vadd.f32 %v6877_v50, %v3069_v15 }
 0x45f   : > { %3248 = vadd.xlane.f32.xlu0 %v3247_v30  ;;  %v1494_v30 = vsub.f32 %v9039_v32, %v9038_v5 }
 0x460   : > { %v6917_v21 = vpop.xlane.xlu0 %3167 }
 0x461   : > { %v1527_v60 = vmul.f32 1.442695, %v1494_v30 }
 0x462   : > { %v6920_v20 = vpop.xlane.xlu1 %2293 }
 0x463   : > { %2356 = vadd.xlane.f32.xlu0 %v2355_v11  ;;  %v2652_v11 = vmul.f32 %v5056_v52, %v9042_v49  ;;  %5063 = vpow2.f32 %v1527_v60  ;;  %v9051_v49 = vld [vmem:[#allocation10_spill] sm:$0xff] }
 0x464   : > { %v6925_v43 = vpop.xlane.xlu0 %3170  ;;  %5065 = vpow2.f32 %v1539_v18 }
 0x466   : > { %v6928_v45 = vpop.xlane.xlu1 %2710  ;;  %2422 = vrot.lane.b32.xlu1 %v2358_v13, %s5371_s11  ;;  %v2780_v13 = vadd.f32 %v6865_v55, %v2652_v11  ;;  %v5058_v55 = vpop.eup %5057 }
 0x467   : > { %2773 = vadd.xlane.f32.xlu0 %v2772_v3  ;;  %v5060_v40 = vpop.eup %5059 }
 0x468   : > { %v6936_v57 = vpop.xlane.xlu0 %3182  ;;  %v6974_v26 = vpop.eup %5061  ;;  %v2234_v27 = vmul.f32 %v5060_v40, %v9046_v23  ;;  %v2651_v0 = vmul.f32 %v5060_v40, %v9052_v44  ;;  %v9056_v23 = vld [vmem:[#allocation36_spill] sm:$0xff] }
 0x46a   : > { %v6939_v22 = vpop.xlane.xlu1 %3191  ;;  %2432 = vrot.lane.b32.xlu1 %v2363_v56, %s5371_s11  ;;  %v9045_v56 = vld [vmem:[#allocation7_spill] sm:$0xff]  ;;  %v2362_v32 = vadd.f32 %v6847_v2, %v2234_v27 }
 0x46b   : > { %3254 = vadd.xlane.f32.xlu0 %v3253_v48  ;;  %v2232_v39 = vmul.f32 %v5058_v55, %v9045_v56  ;;  %v9047_v48 = vld [vmem:[#allocation6_spill] sm:$0xff] }
 0x46c   : > { %v6947_v25 = vpop.xlane.xlu0 %2290  ;;  %v2233_v50 = vmul.f32 %v6974_v26, %v9047_v48  ;;  %v9057_v48 = vld [vmem:[#allocation38_spill] sm:$0xff] }
 0x46d   : > { %v2360_v52 = vadd.f32 %v6883_v63, %v2232_v39  ;;  %v5064_v61 = vpop.eup %5063  ;;  %v9049_v63 = vld [vmem:[#allocation135_spill] sm:$0xff] }
 0x46e   : > { %v6950_v38 = vpop.xlane.xlu1 %2299  ;;  %2839 = vrot.lane.b32.xlu1 %v2775_v28, %s5372_s13  ;;  %v6985_v5 = vpop.eup %5065  ;;  %v2361_v30 = vadd.f32 %v6893_v46, %v2233_v50  ;;  %v9048_v28 = vld [vmem:[#allocation136_spill] sm:$0xff]  ;;  %v2231_v59 = vmul.f32 %v5064_v61, %v9050_v58  ;;  %v2648_v27 = vmul.f32 %v5064_v61, %v9056_v23  ;;  %v2650_v50 = vmul.f32 %v6974_v26, %v9057_v48 }
 0x46f   : > { %v1499_v4 = vsub.f32 %v9049_v63, %v9048_v28  ;;  %v2237_v11 = vmul.f32 %v6985_v5, %v9051_v49  ;;  %v9059_v28 = vld [vmem:[#allocation141_spill] sm:$0xff] }
 0x470   : > { %v6954_v62 = vpop.xlane.xlu0 %2707  ;;  %v2359_v2 = vadd.f32 %v6857_v31, %v2231_v59  ;;  %v9054_v31 = vld [vmem:[#allocation146_spill] sm:$0xff]  ;;  %v9060_v59 = vld [vmem:[#allocation76_spill] sm:$0xff] }
 0x471   : > { %v2365_v46 = vadd.f32 %v6899_v29, %v2237_v11  ;;  %v9055_v29 = vld [vmem:[#allocation145_spill] sm:$0xff]  ;;  %v3068_v49 = vmul.f32 %v5060_v40, %v9060_v59  ;;  %v9061_v11 = vld [vmem:[#allocation42_spill] sm:$0xff]  ;;  %v9063_v40 = vld [vmem:[#allocation72_spill] sm:$0xff] }
 0x472   : > { %v6957_v41 = vpop.xlane.xlu1 %2716  ;;  %2849 = vrot.lane.b32.xlu1 %v2780_v13, %s5372_s13  ;;  %v1537_v13 = vmul.f32 1.442695, %v1499_v4  ;;  %v1502_v39 = vsub.f32 %v9055_v29, %v9054_v31  ;;  %v9065_v29 = vld [vmem:[#allocation149_spill] sm:$0xff] }
 0x474   : > { %v6961_v3 = vpop.xlane.xlu0 %3188  ;;  %5067 = vpow2.f32 %v1537_v13  ;;  %v1543_v4 = vmul.f32 1.442695, %v1502_v39 }
 0x476   : > { %v6964_v8 = vpop.xlane.xlu1 %3197  ;;  %3320 = vrot.lane.b32.xlu1 %v3256_v33, %s5373_s14  ;;  %v9053_v33 = vld [vmem:[#allocation39_spill] sm:$0xff]  ;;  %5069 = vpow2.f32 %v1543_v4 }
 0x477   : > { %v2649_v35 = vmul.f32 %v5058_v55, %v9053_v33  ;;  %v9070_v4 = vld [vmem:[#allocation43_spill] sm:$0xff] }
 0x478   : > { %v6968_v51 = vpop.xlane.xlu0 %2296 }
 0x479   : > { %v2777_v56 = vadd.f32 %v6904_v54, %v2649_v35  ;;  %v2778_v54 = vadd.f32 %v6908_v9, %v2650_v50  ;;  %v3066_v35 = vmul.f32 %v5058_v55, %v9063_v40  ;;  %v9067_v55 = vld [vmem:[#allocation71_spill] sm:$0xff] }
 0x47a   : > { %v6971_v17 = vpop.xlane.xlu1 %2305  ;;  %3330 = vrot.lane.b32.xlu1 %v3261_v7, %s5373_s14  ;;  %v2779_v7 = vadd.f32 %v6861_v1, %v2651_v0  ;;  %v2776_v1 = vadd.f32 %v6867_v34, %v2648_v27  ;;  %v3260_v34 = vadd.f32 %v6875_v14, %v3068_v49  ;;  %v9062_v0 = vld [vmem:[#allocation68_spill] sm:$0xff]  ;;  %v3067_v48 = vmul.f32 %v6974_v26, %v9067_v55  ;;  %v9071_v49 = vld [vmem:[#allocation81_spill] sm:$0xff] }
 0x47b   : > { %v3065_v33 = vmul.f32 %v5064_v61, %v9062_v0  ;;  %v3258_v14 = vadd.f32 %v6917_v21, %v3066_v35  ;;  %v9066_v61 = vld [vmem:[#allocation11_spill] sm:$0xff]  ;;  %v3071_v26 = vmul.f32 %v6985_v5, %v9071_v49 }
 0x47c   : > { %v6977_v10 = vpop.xlane.xlu0 %2713  ;;  %v3259_v21 = vadd.f32 %v6925_v43, %v3067_v48  ;;  %v9078_v48 = vld [vmem:[#allocation152_spill] sm:$0xff] }
 0x47d   : > { %v3257_v31 = vadd.f32 %v6879_v42, %v3065_v33  ;;  %v9073_v33 = vld [vmem:[#allocation12_spill] sm:$0xff] }
 0x47e   : > { %v6982_v12 = vpop.xlane.xlu1 %2722  ;;  %2426 = vrot.lane.b32.xlu1 %v2360_v52, %s5371_s11 }
 0x480   : > { %v6991_v53 = vpop.xlane.xlu0 %3194 }
 0x481   : > { %2430 = vrot.lane.b32.xlu0 %v2362_v32, %s5371_s11 }
 0x482   : > { %v6996_v60 = vpop.xlane.xlu1 %3203  ;;  %2428 = vrot.lane.b32.xlu1 %v2361_v30, %s5371_s11  ;;  %v9058_v30 = vld [vmem:[#allocation142_spill] sm:$0xff] }
 0x483   : > { %v1501_v63 = vsub.f32 %v9059_v28, %v9058_v30 }
 0x484   : > { %v7002_v18 = vpop.xlane.xlu0 %2302 }
 0x485   : > { %2424 = vrot.lane.b32.xlu0 %v2359_v2, %s5371_s11  ;;  %v2654_v2 = vmul.f32 %v6985_v5, %v9061_v11  ;;  %v1541_v13 = vmul.f32 1.442695, %v1501_v63 }
 0x486   : > { %v7006_v15 = vpop.xlane.xlu1 %2311  ;;  %2436 = vrot.lane.b32.xlu1 %v2365_v46, %s5371_s11 }
 0x487   : > { %v2782_v9 = vadd.f32 %v6912_v36, %v2654_v2  ;;  %5071 = vpow2.f32 %v1541_v13  ;;  %v9064_v36 = vld [vmem:[#allocation150_spill] sm:$0xff]  ;;  %v3263_v2 = vadd.f32 %v6936_v57, %v3071_v26 }
 0x488   : > { %v7014_v52 = vpop.xlane.xlu0 %2719  ;;  %v1504_v39 = vsub.f32 %v9065_v29, %v9064_v36  ;;  %v9072_v13 = vld [vmem:[#allocation82_spill] sm:$0xff] }
 0x489   : > { %2847 = vrot.lane.b32.xlu0 %v2779_v7, %s5372_s13  ;;  %v9074_v57 = vld [vmem:[#allocation154_spill] sm:$0xff] }
 0x48a   : > { %v7019_v32 = vpop.xlane.xlu1 %2728  ;;  %2843 = vrot.lane.b32.xlu1 %v2777_v56, %s5372_s13  ;;  %v5068_v56 = vpop.eup %5067  ;;  %v1547_v28 = vmul.f32 1.442695, %v1504_v39 }
 0x48b   : > { %v2236_v27 = vmul.f32 %v5068_v56, %v9066_v61  ;;  %v2653_v59 = vmul.f32 %v5068_v56, %v9070_v4  ;;  %v3070_v0 = vmul.f32 %v5068_v56, %v9072_v13  ;;  %v9076_v56 = vld [vmem:[#allocation13_spill] sm:$0xff]  ;;  %v9077_v61 = vld [vmem:[#allocation44_spill] sm:$0xff]  ;;  %v9081_v4 = vld [vmem:[#allocation86_spill] sm:$0xff] }
 0x48c   : > { %v7027_v58 = vpop.xlane.xlu0 %3200  ;;  %5073 = vpow2.f32 %v1547_v28 }
 0x48d   : > { %2841 = vrot.lane.b32.xlu0 %v2776_v1, %s5372_s13  ;;  %v2364_v42 = vadd.f32 %v6885_v37, %v2236_v27  ;;  %v9068_v1 = vld [vmem:[#allocation148_spill] sm:$0xff]  ;;  %v5070_v37 = vpop.eup %5069  ;;  %v2781_v43 = vadd.f32 %v6895_v24, %v2653_v59 }
 0x48e   : > { %v7032_v46 = vpop.xlane.xlu1 %3209  ;;  %2845 = vrot.lane.b32.xlu1 %v2778_v54, %s5372_s13  ;;  %v9069_v54 = vld [vmem:[#allocation147_spill] sm:$0xff]  ;;  %v2239_v40 = vmul.f32 %v5070_v37, %v9073_v33  ;;  %v2656_v27 = vmul.f32 %v5070_v37, %v9077_v61  ;;  %v3073_v59 = vmul.f32 %v5070_v37, %v9081_v4 }
 0x48f   : > { %v1503_v30 = vsub.f32 %v9069_v54, %v9068_v1 }
 0x490   : > { %v7038_v44 = vpop.xlane.xlu0 %2308  ;;  %v2367_v24 = vadd.f32 %v6947_v25, %v2239_v40  ;;  %v2784_v25 = vadd.f32 %v6954_v62, %v2656_v27  ;;  %v3265_v62 = vadd.f32 %v6961_v3, %v3073_v59  ;;  %v9084_v3 = vld [vmem:[#allocation158_spill] sm:$0xff]  ;;  %v9088_v27 = vld [vmem:[#allocation156_spill] sm:$0xff] }
 0x491   : > { %3328 = vrot.lane.b32.xlu0 %v3260_v34, %s5373_s14  ;;  %v1545_v34 = vmul.f32 1.442695, %v1503_v30  ;;  %v5072_v35 = vpop.eup %5071  ;;  %v9080_v30 = vld [vmem:[#allocation45_spill] sm:$0xff] }
 0x492   : > { %v7042_v7 = vpop.xlane.xlu1 %2317  ;;  %2853 = vrot.lane.b32.xlu1 %v2782_v9, %s5372_s13  ;;  %v2238_v39 = vmul.f32 %v5072_v35, %v9076_v56  ;;  %v2655_v28 = vmul.f32 %v5072_v35, %v9080_v30  ;;  %v9087_v56 = vld [vmem:[#allocation46_spill] sm:$0xff] }
 0x493   : > { %5075 = vpow2.f32 %v1545_v34  ;;  %v9082_v34 = vld [vmem:[#allocation88_spill] sm:$0xff]  ;;  %v9091_v30 = vld [vmem:[#allocation90_spill] sm:$0xff] }
 0x494   : > { %v7050_v23 = vpop.xlane.xlu0 %2725  ;;  %v3072_v13 = vmul.f32 %v5072_v35, %v9082_v34  ;;  %v9086_v35 = vld [vmem:[#allocation15_spill] sm:$0xff] }
 0x495   : > { %3322 = vrot.lane.b32.xlu0 %v3257_v31, %s5373_s14  ;;  %v3262_v31 = vadd.f32 %v6901_v19, %v3070_v0  ;;  %v2366_v19 = vadd.f32 %v6906_v16, %v2238_v39  ;;  %v2783_v16 = vadd.f32 %v6910_v47, %v2655_v28  ;;  %v9083_v0 = vld [vmem:[#allocation14_spill] sm:$0xff] }
 0x496   : > { %v7055_v50 = vpop.xlane.xlu1 %2734  ;;  %3324 = vrot.lane.b32.xlu1 %v3258_v14, %s5373_s14  ;;  %v9075_v14 = vld [vmem:[#allocation153_spill] sm:$0xff]  ;;  %v5074_v26 = vpop.eup %5073 }
 0x497   : > { %v1506_v36 = vsub.f32 %v9075_v14, %v9074_v57  ;;  %v2241_v33 = vmul.f32 %v5074_v26, %v9083_v0  ;;  %v2658_v39 = vmul.f32 %v5074_v26, %v9087_v56  ;;  %v3075_v28 = vmul.f32 %v5074_v26, %v9091_v30 }
 0x498   : > { %v7063_v63 = vpop.xlane.xlu0 %3206 }
 0x499   : > { %2434 = vrot.lane.b32.xlu0 %v2364_v42, %s5371_s11  ;;  %v9079_v42 = vld [vmem:[#allocation151_spill] sm:$0xff]  ;;  %v1551_v1 = vmul.f32 1.442695, %v1506_v36  ;;  %v2369_v47 = vadd.f32 %v6968_v51, %v2241_v33  ;;  %v2786_v51 = vadd.f32 %v6977_v10, %v2658_v39  ;;  %v3267_v10 = vadd.f32 %v6991_v53, %v3075_v28  ;;  %v9094_v53 = vld [vmem:[#allocation162_spill] sm:$0xff]  ;;  %v9098_v39 = vld [vmem:[#allocation160_spill] sm:$0xff] }
 0x49a   : > { %v7068_v11 = vpop.xlane.xlu1 %3215  ;;  %3326 = vrot.lane.b32.xlu1 %v3259_v21, %s5373_s14  ;;  %v1505_v21 = vsub.f32 %v9079_v42, %v9078_v48 }
 0x49b   : > { %5077 = vpow2.f32 %v1551_v1 }
 0x49c   : > { %v7074_v9 = vpop.xlane.xlu0 %2314 }
 0x49d   : > { %2851 = vrot.lane.b32.xlu0 %v2781_v43, %s5372_s13  ;;  %v1549_v43 = vmul.f32 1.442695, %v1505_v21  ;;  %v5076_v40 = vpop.eup %5075  ;;  %v9090_v21 = vld [vmem:[#allocation47_spill] sm:$0xff] }
 0x49e   : > { %v7078_v5 = vpop.xlane.xlu1 %2323  ;;  %3334 = vrot.lane.b32.xlu1 %v3263_v2, %s5373_s14  ;;  %v2240_v36 = vmul.f32 %v5076_v40, %v9086_v35  ;;  %v2657_v1 = vmul.f32 %v5076_v40, %v9090_v21  ;;  %v9097_v35 = vld [vmem:[#allocation48_spill] sm:$0xff]  ;;  %v9101_v21 = vld [vmem:[#allocation95_spill] sm:$0xff] }
 0x49f   : > { %5079 = vpow2.f32 %v1549_v43  ;;  %v9092_v43 = vld [vmem:[#allocation92_spill] sm:$0xff] }
 0x4a0   : > { %v7086_v29 = vpop.xlane.xlu0 %2731  ;;  %v3074_v34 = vmul.f32 %v5076_v40, %v9092_v43  ;;  %v9096_v40 = vld [vmem:[#allocation17_spill] sm:$0xff] }
 0x4a1   : > { %3332 = vrot.lane.b32.xlu0 %v3262_v31, %s5373_s14  ;;  %v3264_v31 = vadd.f32 %v6914_v6, %v3072_v13  ;;  %v2368_v6 = vadd.f32 %v6920_v20, %v2240_v36  ;;  %v2785_v20 = vadd.f32 %v6928_v45, %v2657_v1  ;;  %v9093_v13 = vld [vmem:[#allocation16_spill] sm:$0xff] }
 0x4a2   : > { %v7090_v55 = vpop.xlane.xlu1 %2740  ;;  %2440 = vrot.lane.b32.xlu1 %v2367_v24, %s5371_s11  ;;  %v9085_v24 = vld [vmem:[#allocation157_spill] sm:$0xff] }
 0x4a3   : > { %v1508_v57 = vsub.f32 %v9085_v24, %v9084_v3 }
 0x4a4   : > { %v7098_v54 = vpop.xlane.xlu0 %3212 }
 0x4a5   : > { %2438 = vrot.lane.b32.xlu0 %v2366_v19, %s5371_s11  ;;  %v9089_v19 = vld [vmem:[#allocation155_spill] sm:$0xff]  ;;  %v1555_v48 = vmul.f32 1.442695, %v1508_v57  ;;  %v5078_v59 = vpop.eup %5077 }
 0x4a6   : > { %v7102_v49 = vpop.xlane.xlu1 %3221  ;;  %2857 = vrot.lane.b32.xlu1 %v2784_v25, %s5372_s13  ;;  %v1507_v25 = vsub.f32 %v9089_v19, %v9088_v27  ;;  %v2243_v0 = vmul.f32 %v5078_v59, %v9093_v13  ;;  %v2660_v36 = vmul.f32 %v5078_v59, %v9097_v35  ;;  %v3077_v1 = vmul.f32 %v5078_v59, %v9101_v21 }
 0x4a7   : > { %5081 = vpow2.f32 %v1555_v48 }
 0x4a8   : > { %v7108_v2 = vpop.xlane.xlu0 %2320  ;;  %v2371_v45 = vadd.f32 %v7002_v18, %v2243_v0  ;;  %v2788_v18 = vadd.f32 %v7014_v52, %v2660_v36  ;;  %v3269_v52 = vadd.f32 %v7027_v58, %v3077_v1  ;;  %v9104_v58 = vld [vmem:[#allocation166_spill] sm:$0xff]  ;;  %v9108_v36 = vld [vmem:[#allocation164_spill] sm:$0xff] }
 0x4a9   : > { %2855 = vrot.lane.b32.xlu0 %v2783_v16, %s5372_s13  ;;  %v1553_v16 = vmul.f32 1.442695, %v1507_v25  ;;  %v5080_v33 = vpop.eup %5079  ;;  %v9100_v25 = vld [vmem:[#allocation49_spill] sm:$0xff] }
 0x4aa   : > { %v7112_v37 = vpop.xlane.xlu1 %2329  ;;  %3338 = vrot.lane.b32.xlu1 %v3265_v62, %s5373_s14  ;;  %v2242_v57 = vmul.f32 %v5080_v33, %v9096_v40  ;;  %v2659_v48 = vmul.f32 %v5080_v33, %v9100_v25  ;;  %v9107_v40 = vld [vmem:[#allocation50_spill] sm:$0xff]  ;;  %v9111_v25 = vld [vmem:[#allocation101_spill] sm:$0xff] }
 0x4ab   : > { %5083 = vpow2.f32 %v1553_v16  ;;  %v9102_v16 = vld [vmem:[#allocation96_spill] sm:$0xff] }
 0x4ac   : > { %v7120_v14 = vpop.xlane.xlu0 %2737  ;;  %v3076_v43 = vmul.f32 %v5080_v33, %v9102_v16  ;;  %v9106_v33 = vld [vmem:[#allocation19_spill] sm:$0xff] }
 0x4ad   : > { %3336 = vrot.lane.b32.xlu0 %v3264_v31, %s5373_s14  ;;  %v3266_v31 = vadd.f32 %v6939_v22, %v3074_v34  ;;  %v2370_v22 = vadd.f32 %v6950_v38, %v2242_v57  ;;  %v2787_v38 = vadd.f32 %v6957_v41, %v2659_v48  ;;  %v9103_v34 = vld [vmem:[#allocation18_spill] sm:$0xff] }
 0x4ae   : > { %v7124_v61 = vpop.xlane.xlu1 %2746  ;;  %2444 = vrot.lane.b32.xlu1 %v2369_v47, %s5371_s11  ;;  %v9095_v47 = vld [vmem:[#allocation161_spill] sm:$0xff] }
 0x4af   : > { %v1510_v3 = vsub.f32 %v9095_v47, %v9094_v53 }
 0x4b0   : > { %v7132_v42 = vpop.xlane.xlu0 %3218 }
 0x4b1   : > { %2442 = vrot.lane.b32.xlu0 %v2368_v6, %s5371_s11  ;;  %v9099_v6 = vld [vmem:[#allocation159_spill] sm:$0xff]  ;;  %v1559_v27 = vmul.f32 1.442695, %v1510_v3  ;;  %v5082_v28 = vpop.eup %5081 }
 0x4b2   : > { %v7136_v4 = vpop.xlane.xlu1 %3227  ;;  %2861 = vrot.lane.b32.xlu1 %v2786_v51, %s5372_s13  ;;  %v1509_v51 = vsub.f32 %v9099_v6, %v9098_v39  ;;  %v2245_v13 = vmul.f32 %v5082_v28, %v9103_v34  ;;  %v2662_v57 = vmul.f32 %v5082_v28, %v9107_v40  ;;  %v3079_v48 = vmul.f32 %v5082_v28, %v9111_v25 }
 0x4b3   : > { %5085 = vpow2.f32 %v1559_v27 }
 0x4b4   : > { %v7142_v62 = vpop.xlane.xlu0 %2326  ;;  %v2373_v41 = vadd.f32 %v7038_v44, %v2245_v13  ;;  %v2790_v44 = vadd.f32 %v7050_v23, %v2662_v57  ;;  %v3271_v23 = vadd.f32 %v7063_v63, %v3079_v48  ;;  %v9114_v63 = vld [vmem:[#allocation170_spill] sm:$0xff]  ;;  %v9118_v57 = vld [vmem:[#allocation168_spill] sm:$0xff] }
 0x4b5   : > { %2859 = vrot.lane.b32.xlu0 %v2785_v20, %s5372_s13  ;;  %v1557_v20 = vmul.f32 1.442695, %v1509_v51  ;;  %v5084_v0 = vpop.eup %5083  ;;  %v9110_v51 = vld [vmem:[#allocation51_spill] sm:$0xff] }
 0x4b6   : > { %v7146_v26 = vpop.xlane.xlu1 %2335  ;;  %3342 = vrot.lane.b32.xlu1 %v3267_v10, %s5373_s14  ;;  %v2244_v3 = vmul.f32 %v5084_v0, %v9106_v33  ;;  %v2661_v27 = vmul.f32 %v5084_v0, %v9110_v51  ;;  %v9117_v33 = vld [vmem:[#allocation52_spill] sm:$0xff]  ;;  %v9121_v51 = vld [vmem:[#allocation106_spill] sm:$0xff] }
 0x4b7   : > { %5087 = vpow2.f32 %v1557_v20  ;;  %v9112_v20 = vld [vmem:[#allocation102_spill] sm:$0xff] }
 0x4b8   : > { %v7154_v24 = vpop.xlane.xlu0 %2743  ;;  %v3078_v16 = vmul.f32 %v5084_v0, %v9112_v20  ;;  %v9116_v0 = vld [vmem:[#allocation21_spill] sm:$0xff] }
 0x4b9   : > { %3340 = vrot.lane.b32.xlu0 %v3266_v31, %s5373_s14  ;;  %v3268_v31 = vadd.f32 %v6964_v8, %v3076_v43  ;;  %v2372_v8 = vadd.f32 %v6971_v17, %v2244_v3  ;;  %v2789_v17 = vadd.f32 %v6982_v12, %v2661_v27  ;;  %v9113_v43 = vld [vmem:[#allocation20_spill] sm:$0xff] }
 0x4ba   : > { %v7158_v56 = vpop.xlane.xlu1 %2752  ;;  %2448 = vrot.lane.b32.xlu1 %v2371_v45, %s5371_s11  ;;  %v9105_v45 = vld [vmem:[#allocation165_spill] sm:$0xff] }
 0x4bb   : > { %v1512_v53 = vsub.f32 %v9105_v45, %v9104_v58 }
 0x4bc   : > { %v7166_v19 = vpop.xlane.xlu0 %3224 }
 0x4bd   : > { %2446 = vrot.lane.b32.xlu0 %v2370_v22, %s5371_s11  ;;  %v9109_v22 = vld [vmem:[#allocation163_spill] sm:$0xff]  ;;  %v1563_v39 = vmul.f32 1.442695, %v1512_v53  ;;  %v5086_v1 = vpop.eup %5085 }
 0x4be   : > { %v7170_v30 = vpop.xlane.xlu1 %3233  ;;  %2865 = vrot.lane.b32.xlu1 %v2788_v18, %s5372_s13  ;;  %v1511_v18 = vsub.f32 %v9109_v22, %v9108_v36  ;;  %v2247_v34 = vmul.f32 %v5086_v1, %v9113_v43  ;;  %v2664_v3 = vmul.f32 %v5086_v1, %v9117_v33  ;;  %v3081_v27 = vmul.f32 %v5086_v1, %v9121_v51 }
 0x4bf   : > { %5089 = vpow2.f32 %v1563_v39 }
 0x4c0   : > { %v7176_v10 = vpop.xlane.xlu0 %2332  ;;  %v2375_v12 = vadd.f32 %v7074_v9, %v2247_v34  ;;  %v2792_v9 = vadd.f32 %v7086_v29, %v2664_v3  ;;  %v3273_v29 = vadd.f32 %v7098_v54, %v3081_v27  ;;  %v9124_v54 = vld [vmem:[#allocation174_spill] sm:$0xff]  ;;  %v9128_v3 = vld [vmem:[#allocation172_spill] sm:$0xff] }
 0x4c1   : > { %2863 = vrot.lane.b32.xlu0 %v2787_v38, %s5372_s13  ;;  %v1561_v38 = vmul.f32 1.442695, %v1511_v18  ;;  %v5088_v13 = vpop.eup %5087  ;;  %v9120_v18 = vld [vmem:[#allocation53_spill] sm:$0xff] }
 0x4c2   : > { %v7180_v59 = vpop.xlane.xlu1 %2341  ;;  %3346 = vrot.lane.b32.xlu1 %v3269_v52, %s5373_s14  ;;  %v2246_v53 = vmul.f32 %v5088_v13, %v9116_v0  ;;  %v2663_v39 = vmul.f32 %v5088_v13, %v9120_v18  ;;  %v9127_v0 = vld [vmem:[#allocation54_spill] sm:$0xff] }
 0x4c3   : > { %5091 = vpow2.f32 %v1561_v38  ;;  %v9122_v38 = vld [vmem:[#allocation108_spill] sm:$0xff]  ;;  %v9131_v18 = vld [vmem:[#allocation110_spill] sm:$0xff] }
 0x4c4   : > { %v7188_v47 = vpop.xlane.xlu0 %2749  ;;  %v3080_v20 = vmul.f32 %v5088_v13, %v9122_v38  ;;  %v9126_v13 = vld [vmem:[#allocation23_spill] sm:$0xff] }
 0x4c5   : > { %3344 = vrot.lane.b32.xlu0 %v3268_v31, %s5373_s14  ;;  %v3270_v31 = vadd.f32 %v6996_v60, %v3078_v16  ;;  %v2374_v60 = vadd.f32 %v7006_v15, %v2246_v53  ;;  %v2791_v15 = vadd.f32 %v7019_v32, %v2663_v39  ;;  %v9123_v16 = vld [vmem:[#allocation22_spill] sm:$0xff] }
 0x4c6   : > { %v7192_v35 = vpop.xlane.xlu1 %2758  ;;  %2452 = vrot.lane.b32.xlu1 %v2373_v41, %s5371_s11  ;;  %v9115_v41 = vld [vmem:[#allocation169_spill] sm:$0xff] }
 0x4c7   : > { %v1514_v58 = vsub.f32 %v9115_v41, %v9114_v63 }
 0x4c8   : > { %v7200_v6 = vpop.xlane.xlu0 %3230 }
 0x4c9   : > { %2450 = vrot.lane.b32.xlu0 %v2372_v8, %s5371_s11  ;;  %v9119_v8 = vld [vmem:[#allocation167_spill] sm:$0xff]  ;;  %v1567_v36 = vmul.f32 1.442695, %v1514_v58  ;;  %v5090_v48 = vpop.eup %5089 }
 0x4ca   : > { %v7204_v21 = vpop.xlane.xlu1 %3239  ;;  %2869 = vrot.lane.b32.xlu1 %v2790_v44, %s5372_s13  ;;  %v1513_v44 = vsub.f32 %v9119_v8, %v9118_v57  ;;  %v2249_v43 = vmul.f32 %v5090_v48, %v9123_v16  ;;  %v2666_v53 = vmul.f32 %v5090_v48, %v9127_v0  ;;  %v3083_v39 = vmul.f32 %v5090_v48, %v9131_v18 }
 0x4cb   : > { %5093 = vpow2.f32 %v1567_v36 }
 0x4cc   : > { %v7210_v52 = vpop.xlane.xlu0 %2338  ;;  %v2377_v32 = vadd.f32 %v7108_v2, %v2249_v43  ;;  %v2794_v2 = vadd.f32 %v7120_v14, %v2666_v53  ;;  %v3275_v14 = vadd.f32 %v7132_v42, %v3083_v39  ;;  %v9138_v53 = vld [vmem:[#allocation176_spill] sm:$0xff] }
 0x4cd   : > { %2867 = vrot.lane.b32.xlu0 %v2789_v17, %s5372_s13  ;;  %v1565_v17 = vmul.f32 1.442695, %v1513_v44  ;;  %v5092_v34 = vpop.eup %5091  ;;  %v9130_v44 = vld [vmem:[#allocation55_spill] sm:$0xff] }
 0x4ce   : > { %v7214_v28 = vpop.xlane.xlu1 %2347  ;;  %3350 = vrot.lane.b32.xlu1 %v3271_v23, %s5373_s14  ;;  %v2248_v58 = vmul.f32 %v5092_v34, %v9126_v13  ;;  %v2665_v36 = vmul.f32 %v5092_v34, %v9130_v44  ;;  %v9137_v13 = vld [vmem:[#allocation56_spill] sm:$0xff]  ;;  %v9141_v44 = vld [vmem:[#allocation115_spill] sm:$0xff] }
 0x4cf   : > { %5095 = vpow2.f32 %v1565_v17  ;;  %v9132_v17 = vld [vmem:[#allocation112_spill] sm:$0xff] }
 0x4d0   : > { %v7222_v45 = vpop.xlane.xlu0 %2755  ;;  %v3082_v38 = vmul.f32 %v5092_v34, %v9132_v17  ;;  %v9136_v34 = vld [vmem:[#allocation25_spill] sm:$0xff] }
 0x4d1   : > { %3348 = vrot.lane.b32.xlu0 %v3270_v31, %s5373_s14  ;;  %v3272_v31 = vadd.f32 %v7032_v46, %v3080_v20  ;;  %v2376_v46 = vadd.f32 %v7042_v7, %v2248_v58  ;;  %v2793_v7 = vadd.f32 %v7055_v50, %v2665_v36  ;;  %v9133_v20 = vld [vmem:[#allocation24_spill] sm:$0xff] }
 0x4d2   : > { %v7226_v40 = vpop.xlane.xlu1 %2764  ;;  %2456 = vrot.lane.b32.xlu1 %v2375_v12, %s5371_s11  ;;  %v9125_v12 = vld [vmem:[#allocation173_spill] sm:$0xff]  ;;  %v3274_v50 = vadd.f32 %v7068_v11, %v3082_v38  ;;  %v9143_v38 = vld [vmem:[#allocation26_spill] sm:$0xff] }
 0x4d3   : > { %v1516_v63 = vsub.f32 %v9125_v12, %v9124_v54 }
 0x4d4   : > { %v7234_v22 = vpop.xlane.xlu0 %3236 }
 0x4d5   : > { %2454 = vrot.lane.b32.xlu0 %v2374_v60, %s5371_s11  ;;  %v9129_v60 = vld [vmem:[#allocation171_spill] sm:$0xff]  ;;  %v1571_v57 = vmul.f32 1.442695, %v1516_v63  ;;  %v5094_v27 = vpop.eup %5093 }
 0x4d6   : > { %v7238_v25 = vpop.xlane.xlu1 %3245  ;;  %2873 = vrot.lane.b32.xlu1 %v2792_v9, %s5372_s13  ;;  %v1515_v9 = vsub.f32 %v9129_v60, %v9128_v3  ;;  %v2251_v48 = vmul.f32 %v5094_v27, %v9133_v20  ;;  %v2668_v58 = vmul.f32 %v5094_v27, %v9137_v13  ;;  %v3085_v36 = vmul.f32 %v5094_v27, %v9141_v44  ;;  %v9148_v13 = vld [vmem:[#allocation180_spill] sm:$0xff] }
 0x4d7   : > { %5097 = vpow2.f32 %v1571_v57 }
 0x4d8   : > { %v7244_v23 = vpop.xlane.xlu0 %2344  ;;  %v2379_v42 = vadd.f32 %v7142_v62, %v2251_v48  ;;  %v2796_v62 = vadd.f32 %v7154_v24, %v2668_v58  ;;  %v3277_v24 = vadd.f32 %v7166_v19, %v3085_v36  ;;  %v9149_v58 = vld [vmem:[#allocation179_spill] sm:$0xff] }
 0x4d9   : > { %2871 = vrot.lane.b32.xlu0 %v2791_v15, %s5372_s13  ;;  %v1569_v15 = vmul.f32 1.442695, %v1515_v9  ;;  %v5096_v43 = vpop.eup %5095  ;;  %v9140_v9 = vld [vmem:[#allocation57_spill] sm:$0xff] }
 0x4da   : > { %v7248_v1 = vpop.xlane.xlu1 %2353  ;;  %3354 = vrot.lane.b32.xlu1 %v3273_v29, %s5373_s14  ;;  %v2250_v63 = vmul.f32 %v5096_v43, %v9136_v34  ;;  %v2667_v57 = vmul.f32 %v5096_v43, %v9140_v9 }
 0x4db   : > { %5099 = vpow2.f32 %v1569_v15  ;;  %v9142_v15 = vld [vmem:[#allocation116_spill] sm:$0xff] }
 0x4dc   : > { %v7256_v41 = vpop.xlane.xlu0 %2761  ;;  %v2378_v11 = vadd.f32 %v7078_v5, %v2250_v63  ;;  %v2795_v5 = vadd.f32 %v7090_v55, %v2667_v57  ;;  %v3084_v17 = vmul.f32 %v5096_v43, %v9142_v15 }
 0x4dd   : > { %3352 = vrot.lane.b32.xlu0 %v3272_v31, %s5373_s14  ;;  %v9134_v31 = vld [vmem:[#allocation178_spill] sm:$0xff] }
 0x4de   : > { %v7260_v33 = vpop.xlane.xlu1 %2770  ;;  %2460 = vrot.lane.b32.xlu1 %v2377_v32, %s5371_s11  ;;  %v9135_v32 = vld [vmem:[#allocation177_spill] sm:$0xff]  ;;  %v3276_v55 = vadd.f32 %v7102_v49, %v3084_v17  ;;  %v9154_v17 = vld [vmem:[#allocation186_spill] sm:$0xff] }
 0x4df   : > { %v1518_v54 = vsub.f32 %v9135_v32, %v9134_v31  ;;  %v9146_v31 = vld [vmem:[#allocation27_spill] sm:$0xff] }
 0x4e0   : > { %v7268_v8 = vpop.xlane.xlu0 %3242 }
 0x4e1   : > { %2458 = vrot.lane.b32.xlu0 %v2376_v46, %s5371_s11  ;;  %v9139_v46 = vld [vmem:[#allocation175_spill] sm:$0xff]  ;;  %v1575_v3 = vmul.f32 1.442695, %v1518_v54  ;;  %v5098_v39 = vpop.eup %5097  ;;  %v9147_v54 = vld [vmem:[#allocation58_spill] sm:$0xff] }
 0x4e2   : > { %v7272_v51 = vpop.xlane.xlu1 %3251  ;;  %2877 = vrot.lane.b32.xlu1 %v2794_v2, %s5372_s13  ;;  %v1517_v2 = vsub.f32 %v9139_v46, %v9138_v53  ;;  %v2253_v27 = vmul.f32 %v5098_v39, %v9143_v38  ;;  %v2670_v34 = vmul.f32 %v5098_v39, %v9147_v54  ;;  %v9150_v53 = vld [vmem:[#allocation59_spill] sm:$0xff]  ;;  %v9155_v38 = vld [vmem:[#allocation185_spill] sm:$0xff] }
 0x4e3   : > { %5101 = vpow2.f32 %v1575_v3 }
 0x4e4   : > { %v7278_v29 = vpop.xlane.xlu0 %2350  ;;  %v2381_v19 = vadd.f32 %v7176_v10, %v2253_v27  ;;  %v2798_v10 = vadd.f32 %v7188_v47, %v2670_v34  ;;  %v1522_v27 = vsub.f32 %v9155_v38, %v9154_v17 }
 0x4e5   : > { %2875 = vrot.lane.b32.xlu0 %v2793_v7, %s5372_s13  ;;  %v1573_v7 = vmul.f32 1.442695, %v1517_v2  ;;  %v5100_v48 = vpop.eup %5099  ;;  %v9151_v2 = vld [vmem:[#allocation117_spill] sm:$0xff] }
 0x4e6   : > { %v2423_v16 = vpop.permute.xlu1 %2422  ;;  %3358 = vrot.lane.b32.xlu1 %v3275_v14, %s5373_s14  ;;  %v2252_v32 = vmul.f32 %v5100_v48, %v9146_v31  ;;  %v2669_v46 = vmul.f32 %v5100_v48, %v9150_v53  ;;  %v3087_v3 = vmul.f32 %v5098_v39, %v9151_v2  ;;  %v9159_v31 = vld [vmem:[#allocation183_spill] sm:$0xff]  ;;  %v1583_v54 = vmul.f32 1.442695, %v1522_v27 }
 0x4e7   : > { %2519 = vst.msk [vmem:[#allocation2] sm:$0xff] %vm2518_vm5, %v2423_v16  ;;  %5103 = vpow2.f32 %v1573_v7  ;;  %v9144_v16 = vld [vmem:[#allocation182_spill] sm:$0xff] }
 0x4e8   : > { %v7289_v12 = vpop.xlane.xlu0 %2767  ;;  %v2380_v49 = vadd.f32 %v7112_v37, %v2252_v32  ;;  %v2797_v37 = vadd.f32 %v7124_v61, %v2669_v46  ;;  %v3279_v47 = vadd.f32 %v7200_v6, %v3087_v3  ;;  %v9162_v46 = vld [vmem:[#allocation120_spill] sm:$0xff]  ;;  %v9163_v3 = vld [vmem:[#allocation30_spill] sm:$0xff] }
 0x4e9   : > { %3356 = vrot.lane.b32.xlu0 %v3274_v50, %s5373_s14  ;;  %v9145_v50 = vld [vmem:[#allocation181_spill] sm:$0xff] }
 0x4ea   : > { %v2433_v0 = vpop.permute.xlu1 %2432  ;;  %2464 = vrot.lane.b32.xlu1 %v2379_v42, %s5371_s11  ;;  %v1520_v42 = vsub.f32 %v9145_v50, %v9144_v16 }
 0x4eb   : > { %2524 = vst.msk [vmem:[#allocation2 + $0x28] sm:$0xff] %vm2518_vm5, %v2433_v0  ;;  %v1519_v0 = vsub.f32 %v9149_v58, %v9148_v13 }
 0x4ec   : > { %v7300_v60 = vpop.xlane.xlu0 %3248 }
 0x4ed   : > { %2462 = vrot.lane.b32.xlu0 %v2378_v11, %s5371_s11  ;;  %v1579_v11 = vmul.f32 1.442695, %v1520_v42  ;;  %v5102_v57 = vpop.eup %5101  ;;  %v1577_v44 = vmul.f32 1.442695, %v1519_v0  ;;  %v9158_v42 = vld [vmem:[#allocation184_spill] sm:$0xff] }
 0x4ee   : > { %v2840_v18 = vpop.permute.xlu1 %2839  ;;  %2881 = vrot.lane.b32.xlu1 %v2796_v62, %s5372_s13  ;;  %v1521_v32 = vsub.f32 %v9159_v31, %v9158_v42  ;;  %v9172_v42 = vld [vmem:[#allocation122_spill] sm:$0xff] }
 0x4ef   : > { %2936 = vst.msk [vmem:[#allocation2] sm:$0xff] %vm2935_vm6, %v2840_v18  ;;  %5105 = vpow2.f32 %v1579_v11  ;;  %v9152_v18 = vld [vmem:[#allocation118_spill] sm:$0xff] }
 0x4f0   : > { %v7309_v14 = vpop.xlane.xlu0 %2356  ;;  %5107 = vpow2.f32 %v1577_v44  ;;  %v1581_v11 = vmul.f32 1.442695, %v1521_v32  ;;  %v9165_v44 = vld [vmem:[#allocation189_spill] sm:$0xff]  ;;  %v9173_v32 = vld [vmem:[#allocation32_spill] sm:$0xff] }
 0x4f1   : > { %2879 = vrot.lane.b32.xlu0 %v2795_v5, %s5372_s13  ;;  %v3086_v5 = vmul.f32 %v5100_v48, %v9152_v18  ;;  %v5104_v15 = vpop.eup %5103  ;;  %v9156_v48 = vld [vmem:[#allocation29_spill] sm:$0xff]  ;;  %5109 = vpow2.f32 %v1583_v54 }
 0x4f2   : > { %v2850_v20 = vpop.permute.xlu1 %2849  ;;  %3362 = vrot.lane.b32.xlu1 %v3277_v24, %s5373_s14  ;;  %v9153_v24 = vld [vmem:[#allocation28_spill] sm:$0xff]  ;;  %v3088_v2 = vmul.f32 %v5104_v15, %v9162_v46  ;;  %5111 = vpow2.f32 %v1581_v11  ;;  %v9176_v11 = vld [vmem:[#allocation65_spill] sm:$0xff]  ;;  %v9177_v46 = vld [vmem:[#allocation123_spill] sm:$0xff] }
 0x4f3   : > { %2941 = vst.msk [vmem:[#allocation2 + $0x28] sm:$0xff] %vm2935_vm6, %v2850_v20  ;;  %v2255_v7 = vmul.f32 %v5102_v57, %v9153_v24  ;;  %v3278_v61 = vadd.f32 %v7136_v4, %v3086_v5  ;;  %v9166_v5 = vld [vmem:[#allocation31_spill] sm:$0xff] }
 0x4f4   : > { %v7320_v43 = vpop.xlane.xlu0 %2773 }
 0x4f5   : > { %3360 = vrot.lane.b32.xlu0 %v3276_v55, %s5373_s14  ;;  %v2383_v6 = vadd.f32 %v7210_v52, %v2255_v7  ;;  %v2254_v55 = vmul.f32 %v5104_v15, %v9156_v48  ;;  %v9167_v7 = vld [vmem:[#allocation62_spill] sm:$0xff] }
 0x4f6   : > { %v3321_v63 = vpop.permute.xlu1 %3320  ;;  %2468 = vrot.lane.b32.xlu1 %v2381_v19, %s5371_s11  ;;  %v9157_v19 = vld [vmem:[#allocation60_spill] sm:$0xff] }
 0x4f7   : > { %3417 = vst.msk [vmem:[#allocation2] sm:$0xff] %vm3416_vm7, %v3321_v63  ;;  %v2672_v16 = vmul.f32 %v5102_v57, %v9157_v19  ;;  %v2382_v4 = vadd.f32 %v7146_v26, %v2254_v55  ;;  %v9160_v63 = vld [vmem:[#allocation61_spill] sm:$0xff] }
 0x4f8   : > { %v7331_v62 = vpop.xlane.xlu0 %3254  ;;  %v9171_v55 = vld [vmem:[#allocation121_spill] sm:$0xff] }
 0x4f9   : > { %2466 = vrot.lane.b32.xlu0 %v2380_v49, %s5371_s11  ;;  %v2800_v52 = vadd.f32 %v7222_v45, %v2672_v16  ;;  %v2671_v49 = vmul.f32 %v5104_v15, %v9160_v63  ;;  %v5106_v0 = vpop.eup %5105 }
 0x4fa   : > { %v3331_v9 = vpop.permute.xlu1 %3330  ;;  %2885 = vrot.lane.b32.xlu1 %v2798_v10, %s5372_s13  ;;  %v9161_v10 = vld [vmem:[#allocation119_spill] sm:$0xff]  ;;  %v3091_v19 = vmul.f32 %v5106_v0, %v9171_v55 }
 0x4fb   : > { %3422 = vst.msk [vmem:[#allocation2 + $0x28] sm:$0xff] %vm3416_vm7, %v3331_v9  ;;  %v3089_v13 = vmul.f32 %v5102_v57, %v9161_v10  ;;  %v2799_v26 = vadd.f32 %v7158_v56, %v2671_v49  ;;  %v2257_v9 = vmul.f32 %v5106_v0, %v9163_v3  ;;  %v3280_v56 = vadd.f32 %v7170_v30, %v3088_v2  ;;  %v9174_v10 = vld [vmem:[#allocation33_spill] sm:$0xff] }
 0x4fc   : > { %v2431_v36 = vpop.permute.xlu0 %2430 }
 0x4fd   : > { %2523 = vst.msk [vmem:[#allocation2 + $0x20] sm:$0xff] %vm2518_vm5, %v2431_v36  ;;  %2883 = vrot.lane.b32.xlu0 %v2797_v37, %s5372_s13  ;;  %v3281_v45 = vadd.f32 %v7234_v22, %v3089_v13  ;;  %v5108_v37 = vpop.eup %5107  ;;  %v2385_v22 = vadd.f32 %v7244_v23, %v2257_v9 }
 0x4fe   : > { %v2427_v39 = vpop.permute.xlu1 %2426  ;;  %3366 = vrot.lane.b32.xlu1 %v3279_v47, %s5373_s14  ;;  %v9164_v47 = vld [vmem:[#allocation190_spill] sm:$0xff]  ;;  %v2256_v24 = vmul.f32 %v5108_v37, %v9166_v5  ;;  %v3090_v31 = vmul.f32 %v5108_v37, %v9172_v42  ;;  %v9180_v5 = vld [vmem:[#allocation35_spill] sm:$0xff] }
 0x4ff   : > { %2521 = vst.msk [vmem:[#allocation2 + $0x10] sm:$0xff] %vm2518_vm5, %v2427_v39  ;;  %v1524_v36 = vsub.f32 %v9165_v44, %v9164_v47  ;;  %v2674_v39 = vmul.f32 %v5106_v0, %v9167_v7  ;;  %v9181_v7 = vld [vmem:[#allocation66_spill] sm:$0xff] }
 0x500   : > { %v2425_v20 = vpop.permute.xlu0 %2424  ;;  %v2384_v30 = vadd.f32 %v7180_v59, %v2256_v24 }
 0x501   : > { %2520 = vst.msk [vmem:[#allocation2 + $0x8] sm:$0xff] %vm2518_vm5, %v2425_v20  ;;  %3364 = vrot.lane.b32.xlu0 %v3278_v61, %s5373_s14  ;;  %v2802_v23 = vadd.f32 %v7256_v41, %v2674_v39  ;;  %v9168_v61 = vld [vmem:[#allocation188_spill] sm:$0xff]  ;;  %v1587_v38 = vmul.f32 1.442695, %v1524_v36  ;;  %v9170_v20 = vld [vmem:[#allocation63_spill] sm:$0xff]  ;;  %v3283_v41 = vadd.f32 %v7268_v8, %v3091_v19 }
 0x502   : > { %v2429_v50 = vpop.permute.xlu1 %2428  ;;  %2472 = vrot.lane.b32.xlu1 %v2383_v6, %s5371_s11  ;;  %v9169_v6 = vld [vmem:[#allocation187_spill] sm:$0xff]  ;;  %v2673_v48 = vmul.f32 %v5108_v37, %v9170_v20  ;;  %v9178_v37 = vld [vmem:[#allocation124_spill] sm:$0xff] }
 0x503   : > { %2522 = vst.msk [vmem:[#allocation2 + $0x18] sm:$0xff] %vm2518_vm5, %v2429_v50  ;;  %v1523_v17 = vsub.f32 %v9169_v6, %v9168_v61  ;;  %v5110_v50 = vpop.eup %5109  ;;  %5113 = vpow2.f32 %v1587_v38  ;;  %v9183_v6 = vld [vmem:[#allocation125_spill] sm:$0xff] }
 0x504   : > { %v2848_v34 = vpop.permute.xlu0 %2847  ;;  %v2801_v59 = vadd.f32 %v7192_v35, %v2673_v48  ;;  %v2259_v54 = vmul.f32 %v5110_v50, %v9173_v32  ;;  %v5112_v63 = vpop.eup %5111  ;;  %v3282_v35 = vadd.f32 %v7204_v21, %v3090_v31  ;;  %v3093_v2 = vmul.f32 %v5110_v50, %v9177_v46 }
 0x505   : > { %2940 = vst.msk [vmem:[#allocation2 + $0x20] sm:$0xff] %vm2935_vm6, %v2848_v34  ;;  %2470 = vrot.lane.b32.xlu0 %v2382_v4, %s5371_s11  ;;  %v1585_v4 = vmul.f32 1.442695, %v1523_v17  ;;  %v2258_v13 = vmul.f32 %v5112_v63, %v9174_v10 }
 0x506   : > { %v2437_v58 = vpop.permute.xlu1 %2436  ;;  %2889 = vrot.lane.b32.xlu1 %v2800_v52, %s5372_s13  ;;  %v2387_v8 = vadd.f32 %v7278_v29, %v2259_v54 }
 0x507   : > { %2526 = vst.msk [vmem:[#allocation2 + $0x38] sm:$0xff] %vm2518_vm5, %v2437_v58  ;;  %5115 = vpow2.f32 %v1585_v4  ;;  %v9175_v58 = vld [vmem:[#allocation64_spill] sm:$0xff] }
 0x508   : > { %v2842_v53 = vpop.permute.xlu0 %2841  ;;  %v2676_v0 = vmul.f32 %v5110_v50, %v9175_v58 }
 0x509   : > { %2937 = vst.msk [vmem:[#allocation2 + $0x8] sm:$0xff] %vm2935_vm6, %v2842_v53  ;;  %2887 = vrot.lane.b32.xlu0 %v2799_v26, %s5372_s13  ;;  %v2675_v53 = vmul.f32 %v5112_v63, %v9176_v11 }
 0x50a   : > { %v2844_v57 = vpop.permute.xlu1 %2843  ;;  %3370 = vrot.lane.b32.xlu1 %v3281_v45, %s5373_s14  ;;  %v2386_v45 = vadd.f32 %v7214_v28, %v2258_v13  ;;  %v2804_v21 = vadd.f32 %v7289_v12, %v2676_v0  ;;  %v3285_v28 = vadd.f32 %v7300_v60, %v3093_v2 }
 0x50b   : > { %2938 = vst.msk [vmem:[#allocation2 + $0x10] sm:$0xff] %vm2935_vm6, %v2844_v57  ;;  %v2803_v57 = vadd.f32 %v7226_v40, %v2675_v53 }
 0x50c   : > { %v3329_v18 = vpop.permute.xlu0 %3328 }
 0x50d   : > { %3421 = vst.msk [vmem:[#allocation2 + $0x20] sm:$0xff] %vm3416_vm7, %v3329_v18  ;;  %3368 = vrot.lane.b32.xlu0 %v3280_v56, %s5373_s14  ;;  %v5114_v9 = vpop.eup %5113  ;;  %v3092_v56 = vmul.f32 %v5112_v63, %v9178_v37 }
 0x50e   : > { %v2846_v15 = vpop.permute.xlu1 %2845  ;;  %2476 = vrot.lane.b32.xlu1 %v2385_v22, %s5371_s11  ;;  %v9179_v22 = vld [vmem:[#allocation34_spill] sm:$0xff]  ;;  %v2678_v39 = vmul.f32 %v5114_v9, %v9181_v7  ;;  %v3095_v17 = vmul.f32 %v5114_v9, %v9183_v6 }
 0x50f   : > { %2939 = vst.msk [vmem:[#allocation2 + $0x18] sm:$0xff] %vm2935_vm6, %v2846_v15  ;;  %v2261_v47 = vmul.f32 %v5114_v9, %v9179_v22  ;;  %v3284_v18 = vadd.f32 %v7238_v25, %v3092_v56 }
 0x510   : > { %v3323_v27 = vpop.permute.xlu0 %3322  ;;  %v2806_v25 = vadd.f32 %v7320_v43, %v2678_v39  ;;  %v9184_v43 = vld [vmem:[#allocation126_spill] sm:$0xff] }
 0x511   : > { %3418 = vst.msk [vmem:[#allocation2 + $0x8] sm:$0xff] %vm3416_vm7, %v3323_v27  ;;  %2474 = vrot.lane.b32.xlu0 %v2384_v30, %s5371_s11  ;;  %v5116_v36 = vpop.eup %5115  ;;  %v2389_v40 = vadd.f32 %v7309_v14, %v2261_v47  ;;  %v9182_v14 = vld [vmem:[#allocation67_spill] sm:$0xff] }
 0x512   : > { %v2854_v16 = vpop.permute.xlu1 %2853  ;;  %2893 = vrot.lane.b32.xlu1 %v2802_v23, %s5372_s13  ;;  %v2260_v24 = vmul.f32 %v5116_v36, %v9180_v5  ;;  %v2677_v61 = vmul.f32 %v5116_v36, %v9182_v14  ;;  %v3094_v48 = vmul.f32 %v5116_v36, %v9184_v43 }
 0x513   : > { %2943 = vst.msk [vmem:[#allocation2 + $0x38] sm:$0xff] %vm2935_vm6, %v2854_v16 }
 0x514   : > { %v2435_v52 = vpop.permute.xlu0 %2434  ;;  %v2388_v30 = vadd.f32 %v7248_v1, %v2260_v24  ;;  %v2805_v27 = vadd.f32 %v7260_v33, %v2677_v61  ;;  %v3287_v1 = vadd.f32 %v7331_v62, %v3095_v17  ;;  %v3286_v19 = vadd.f32 %v7272_v51, %v3094_v48 }
 0x515   : > { %2525 = vst.msk [vmem:[#allocation2 + $0x30] sm:$0xff] %vm2518_vm5, %v2435_v52  ;;  %2891 = vrot.lane.b32.xlu0 %v2801_v59, %s5372_s13 }
 0x516   : > { %v3325_v34 = vpop.permute.xlu1 %3324  ;;  %3374 = vrot.lane.b32.xlu1 %v3283_v41, %s5373_s14 }
 0x517   : > { %3419 = vst.msk [vmem:[#allocation2 + $0x10] sm:$0xff] %vm3416_vm7, %v3325_v34 }
 0x518   : > { %v2852_v49 = vpop.permute.xlu0 %2851 }
 0x519   : > { %2942 = vst.msk [vmem:[#allocation2 + $0x30] sm:$0xff] %vm2935_vm6, %v2852_v49  ;;  %3372 = vrot.lane.b32.xlu0 %v3282_v35, %s5373_s14 }
 0x51a   : > { %v3327_v26 = vpop.permute.xlu1 %3326  ;;  %2480 = vrot.lane.b32.xlu1 %v2387_v8, %s5371_s11 }
 0x51b   : > { %3420 = vst.msk [vmem:[#allocation2 + $0x18] sm:$0xff] %vm3416_vm7, %v3327_v26 }
 0x51c   : > { %v3333_v29 = vpop.permute.xlu0 %3332 }
 0x51d   : > { %3423 = vst.msk [vmem:[#allocation2 + $0x30] sm:$0xff] %vm3416_vm7, %v3333_v29  ;;  %2478 = vrot.lane.b32.xlu0 %v2386_v45, %s5371_s11 }
 0x51e   : > { %v3335_v3 = vpop.permute.xlu1 %3334  ;;  %2897 = vrot.lane.b32.xlu1 %v2804_v21, %s5372_s13 }
 0x51f   : > { %3424 = vst.msk [vmem:[#allocation2 + $0x38] sm:$0xff] %vm3416_vm7, %v3335_v3 }
 0x520   : > { %v2439_v12 = vpop.permute.xlu0 %2438 }
 0x521   : > { %2527 = vst.msk [vmem:[#allocation2 + $0x40] sm:$0xff] %vm2518_vm5, %v2439_v12  ;;  %2895 = vrot.lane.b32.xlu0 %v2803_v57, %s5372_s13 }
 0x522   : > { %v2441_v44 = vpop.permute.xlu1 %2440  ;;  %3378 = vrot.lane.b32.xlu1 %v3285_v28, %s5373_s14 }
 0x523   : > { %2528 = vst.msk [vmem:[#allocation2 + $0x48] sm:$0xff] %vm2518_vm5, %v2441_v44 }
 0x524   : > { %v2856_v60 = vpop.permute.xlu0 %2855 }
 0x525   : > { %2944 = vst.msk [vmem:[#allocation2 + $0x40] sm:$0xff] %vm2935_vm6, %v2856_v60  ;;  %3376 = vrot.lane.b32.xlu0 %v3284_v18, %s5373_s14 }
 0x526   : > { %v2858_v15 = vpop.permute.xlu1 %2857  ;;  %2484 = vrot.lane.b32.xlu1 %v2389_v40, %s5371_s11 }
 0x527   : > { %2945 = vst.msk [vmem:[#allocation2 + $0x48] sm:$0xff] %vm2935_vm6, %v2858_v15 }
 0x528   : > { %v3337_v23 = vpop.permute.xlu0 %3336 }
 0x529   : > { %3425 = vst.msk [vmem:[#allocation2 + $0x40] sm:$0xff] %vm3416_vm7, %v3337_v23  ;;  %2482 = vrot.lane.b32.xlu0 %v2388_v30, %s5371_s11 }
 0x52a   : > { %v3339_v38 = vpop.permute.xlu1 %3338  ;;  %2901 = vrot.lane.b32.xlu1 %v2806_v25, %s5372_s13 }
 0x52b   : > { %3426 = vst.msk [vmem:[#allocation2 + $0x48] sm:$0xff] %vm3416_vm7, %v3339_v38 }
 0x52c   : > { %v2443_v20 = vpop.permute.xlu0 %2442 }
 0x52d   : > { %2529 = vst.msk [vmem:[#allocation2 + $0x50] sm:$0xff] %vm2518_vm5, %v2443_v20  ;;  %2899 = vrot.lane.b32.xlu0 %v2805_v27, %s5372_s13 }
 0x52e   : > { %v2445_v55 = vpop.permute.xlu1 %2444  ;;  %3382 = vrot.lane.b32.xlu1 %v3287_v1, %s5373_s14 }
 0x52f   : > { %2530 = vst.msk [vmem:[#allocation2 + $0x58] sm:$0xff] %vm2518_vm5, %v2445_v55 }
 0x530   : > { %v2860_v16 = vpop.permute.xlu0 %2859 }
 0x531   : > { %2946 = vst.msk [vmem:[#allocation2 + $0x50] sm:$0xff] %vm2935_vm6, %v2860_v16  ;;  %3380 = vrot.lane.b32.xlu0 %v3286_v19, %s5373_s14 }
 0x532   : > { %v2862_v50 = vpop.permute.xlu1 %2861 }
 0x533   : > { %2947 = vst.msk [vmem:[#allocation2 + $0x58] sm:$0xff] %vm2935_vm6, %v2862_v50 }
 0x534   : > { %v3341_v33 = vpop.permute.xlu0 %3340 }
 0x535   : > { %3427 = vst.msk [vmem:[#allocation2 + $0x50] sm:$0xff] %vm3416_vm7, %v3341_v33 }
 0x536   : > { %v3343_v62 = vpop.permute.xlu1 %3342 }
 0x537   : > { %3428 = vst.msk [vmem:[#allocation2 + $0x58] sm:$0xff] %vm3416_vm7, %v3343_v62 }
 0x538   : > { %v2447_v59 = vpop.permute.xlu0 %2446 }
 0x539   : > { %2531 = vst.msk [vmem:[#allocation2 + $0x60] sm:$0xff] %vm2518_vm5, %v2447_v59 }
 0x53a   : > { %v2449_v41 = vpop.permute.xlu1 %2448 }
 0x53b   : > { %2532 = vst.msk [vmem:[#allocation2 + $0x68] sm:$0xff] %vm2518_vm5, %v2449_v41 }
 0x53c   : > { %v2864_v51 = vpop.permute.xlu0 %2863 }
 0x53d   : > { %2948 = vst.msk [vmem:[#allocation2 + $0x60] sm:$0xff] %vm2935_vm6, %v2864_v51 }
 0x53e   : > { %v2866_v4 = vpop.permute.xlu1 %2865 }
 0x53f   : > { %2949 = vst.msk [vmem:[#allocation2 + $0x68] sm:$0xff] %vm2935_vm6, %v2866_v4 }
 0x540   : > { %v3345_v52 = vpop.permute.xlu0 %3344 }
 0x541   : > { %3429 = vst.msk [vmem:[#allocation2 + $0x60] sm:$0xff] %vm3416_vm7, %v3345_v52 }
 0x542   : > { %v3347_v42 = vpop.permute.xlu1 %3346 }
 0x543   : > { %3430 = vst.msk [vmem:[#allocation2 + $0x68] sm:$0xff] %vm3416_vm7, %v3347_v42 }
 0x544   : > { %v2451_v31 = vpop.permute.xlu0 %2450 }
 0x545   : > { %2533 = vst.msk [vmem:[#allocation2 + $0x70] sm:$0xff] %vm2518_vm5, %v2451_v31 }
 0x546   : > { %v2453_v32 = vpop.permute.xlu1 %2452 }
 0x547   : > { %2534 = vst.msk [vmem:[#allocation2 + $0x78] sm:$0xff] %vm2518_vm5, %v2453_v32 }
 0x548   : > { %v2868_v54 = vpop.permute.xlu0 %2867 }
 0x549   : > { %2950 = vst.msk [vmem:[#allocation2 + $0x70] sm:$0xff] %vm2935_vm6, %v2868_v54 }
 0x54a   : > { %v2870_v34 = vpop.permute.xlu1 %2869 }
 0x54b   : > { %2951 = vst.msk [vmem:[#allocation2 + $0x78] sm:$0xff] %vm2935_vm6, %v2870_v34 }
 0x54c   : > { %v3349_v63 = vpop.permute.xlu0 %3348 }
 0x54d   : > { %3431 = vst.msk [vmem:[#allocation2 + $0x70] sm:$0xff] %vm3416_vm7, %v3349_v63 }
 0x54e   : > { %v3351_v35 = vpop.permute.xlu1 %3350 }
 0x54f   : > { %3432 = vst.msk [vmem:[#allocation2 + $0x78] sm:$0xff] %vm3416_vm7, %v3351_v35 }
 0x550   : > { %v2455_v8 = vpop.permute.xlu0 %2454 }
 0x551   : > { %2535 = vst.msk [vmem:[#allocation2 + $0x80] sm:$0xff] %vm2518_vm5, %v2455_v8 }
 0x552   : > { %v2457_v49 = vpop.permute.xlu1 %2456 }
 0x553   : > { %2536 = vst.msk [vmem:[#allocation2 + $0x88] sm:$0xff] %vm2518_vm5, %v2457_v49 }
 0x554   : > { %v2872_v10 = vpop.permute.xlu0 %2871 }
 0x555   : > { %2952 = vst.msk [vmem:[#allocation2 + $0x80] sm:$0xff] %vm2935_vm6, %v2872_v10 }
 0x556   : > { %v2874_v13 = vpop.permute.xlu1 %2873 }
 0x557   : > { %2953 = vst.msk [vmem:[#allocation2 + $0x88] sm:$0xff] %vm2935_vm6, %v2874_v13 }
 0x558   : > { %v3353_v58 = vpop.permute.xlu0 %3352 }
 0x559   : > { %3433 = vst.msk [vmem:[#allocation2 + $0x80] sm:$0xff] %vm3416_vm7, %v3353_v58 }
 0x55a   : > { %v3355_v0 = vpop.permute.xlu1 %3354 }
 0x55b   : > { %3434 = vst.msk [vmem:[#allocation2 + $0x88] sm:$0xff] %vm3416_vm7, %v3355_v0 }
 0x55c   : > { %v2459_v26 = vpop.permute.xlu0 %2458 }
 0x55d   : > { %2537 = vst.msk [vmem:[#allocation2 + $0x90] sm:$0xff] %vm2518_vm5, %v2459_v26 }
 0x55e   : > { %v2461_v45 = vpop.permute.xlu1 %2460 }
 0x55f   : > { %2538 = vst.msk [vmem:[#allocation2 + $0x98] sm:$0xff] %vm2518_vm5, %v2461_v45 }
 0x560   : > { %v2876_v21 = vpop.permute.xlu0 %2875 }
 0x561   : > { %2954 = vst.msk [vmem:[#allocation2 + $0x90] sm:$0xff] %vm2935_vm6, %v2876_v21 }
 0x562   : > { %v2878_v29 = vpop.permute.xlu1 %2877 }
 0x563   : > { %2955 = vst.msk [vmem:[#allocation2 + $0x98] sm:$0xff] %vm2935_vm6, %v2878_v29 }
 0x564   : > { %v3357_v11 = vpop.permute.xlu0 %3356 }
 0x565   : > { %3435 = vst.msk [vmem:[#allocation2 + $0x90] sm:$0xff] %vm3416_vm7, %v3357_v11 }
 0x566   : > { %v3359_v53 = vpop.permute.xlu1 %3358 }
 0x567   : > { %3436 = vst.msk [vmem:[#allocation2 + $0x98] sm:$0xff] %vm3416_vm7, %v3359_v53 }
 0x568   : > { %v2463_v46 = vpop.permute.xlu0 %2462 }
 0x569   : > { %2539 = vst.msk [vmem:[#allocation2 + $0xa0] sm:$0xff] %vm2518_vm5, %v2463_v46 }
 0x56a   : > { %v2465_v2 = vpop.permute.xlu1 %2464 }
 0x56b   : > { %2540 = vst.msk [vmem:[#allocation2 + $0xa8] sm:$0xff] %vm2518_vm5, %v2465_v2 }
 0x56c   : > { %v2880_v3 = vpop.permute.xlu0 %2879 }
 0x56d   : > { %2956 = vst.msk [vmem:[#allocation2 + $0xa0] sm:$0xff] %vm2935_vm6, %v2880_v3 }
 0x56e   : > { %v2882_v9 = vpop.permute.xlu1 %2881 }
 0x56f   : > { %2957 = vst.msk [vmem:[#allocation2 + $0xa8] sm:$0xff] %vm2935_vm6, %v2882_v9 }
 0x570   : > { %v3361_v57 = vpop.permute.xlu0 %3360 }
 0x571   : > { %3437 = vst.msk [vmem:[#allocation2 + $0xa0] sm:$0xff] %vm3416_vm7, %v3361_v57 }
 0x572   : > { %v3363_v28 = vpop.permute.xlu1 %3362 }
 0x573   : > { %3438 = vst.msk [vmem:[#allocation2 + $0xa8] sm:$0xff] %vm3416_vm7, %v3363_v28 }
 0x574   : > { %v2467_v12 = vpop.permute.xlu0 %2466 }
 0x575   : > { %2541 = vst.msk [vmem:[#allocation2 + $0xb0] sm:$0xff] %vm2518_vm5, %v2467_v12 }
 0x576   : > { %v2469_v37 = vpop.permute.xlu1 %2468 }
 0x577   : > { %2542 = vst.msk [vmem:[#allocation2 + $0xb8] sm:$0xff] %vm2518_vm5, %v2469_v37 }
 0x578   : > { %v2884_v56 = vpop.permute.xlu0 %2883 }
 0x579   : > { %2958 = vst.msk [vmem:[#allocation2 + $0xb0] sm:$0xff] %vm2935_vm6, %v2884_v56 }
 0x57a   : > { %v2886_v22 = vpop.permute.xlu1 %2885 }
 0x57b   : > { %2959 = vst.msk [vmem:[#allocation2 + $0xb8] sm:$0xff] %vm2935_vm6, %v2886_v22 }
 0x57c   : > { %v3365_v47 = vpop.permute.xlu0 %3364 }
 0x57d   : > { %3439 = vst.msk [vmem:[#allocation2 + $0xb0] sm:$0xff] %vm3416_vm7, %v3365_v47 }
 0x57e   : > { %v3367_v44 = vpop.permute.xlu1 %3366 }
 0x57f   : > { %3440 = vst.msk [vmem:[#allocation2 + $0xb8] sm:$0xff] %vm3416_vm7, %v3367_v44 }
 0x580   : > { %v2471_v36 = vpop.permute.xlu0 %2470 }
 0x581   : > { %2543 = vst.msk [vmem:[#allocation2 + $0xc0] sm:$0xff] %vm2518_vm5, %v2471_v36 }
 0x582   : > { %v2473_v18 = vpop.permute.xlu1 %2472 }
 0x583   : > { %2544 = vst.msk [vmem:[#allocation2 + $0xc8] sm:$0xff] %vm2518_vm5, %v2473_v18 }
 0x584   : > { %v2888_v40 = vpop.permute.xlu0 %2887 }
 0x585   : > { %2960 = vst.msk [vmem:[#allocation2 + $0xc0] sm:$0xff] %vm2935_vm6, %v2888_v40 }
 0x586   : > { %v2890_v60 = vpop.permute.xlu1 %2889 }
 0x587   : > { %2961 = vst.msk [vmem:[#allocation2 + $0xc8] sm:$0xff] %vm2935_vm6, %v2890_v60 }
 0x588   : > { %v3369_v5 = vpop.permute.xlu0 %3368 }
 0x589   : > { %3441 = vst.msk [vmem:[#allocation2 + $0xc0] sm:$0xff] %vm3416_vm7, %v3369_v5 }
 0x58a   : > { %v3371_v24 = vpop.permute.xlu1 %3370 }
 0x58b   : > { %3442 = vst.msk [vmem:[#allocation2 + $0xc8] sm:$0xff] %vm3416_vm7, %v3371_v24 }
 0x58c   : > { %v2475_v7 = vpop.permute.xlu0 %2474 }
 0x58d   : > { %2545 = vst.msk [vmem:[#allocation2 + $0xd0] sm:$0xff] %vm2518_vm5, %v2475_v7 }
 0x58e   : > { %v2477_v39 = vpop.permute.xlu1 %2476 }
 0x58f   : > { %2546 = vst.msk [vmem:[#allocation2 + $0xd8] sm:$0xff] %vm2518_vm5, %v2477_v39 }
 0x590   : > { %v2892_v15 = vpop.permute.xlu0 %2891 }
 0x591   : > { %2962 = vst.msk [vmem:[#allocation2 + $0xd0] sm:$0xff] %vm2935_vm6, %v2892_v15 }
 0x592   : > { %v2894_v30 = vpop.permute.xlu1 %2893 }
 0x593   : > { %2963 = vst.msk [vmem:[#allocation2 + $0xd8] sm:$0xff] %vm2935_vm6, %v2894_v30 }
 0x594   : > { %v3373_v25 = vpop.permute.xlu0 %3372 }
 0x595   : > { %3443 = vst.msk [vmem:[#allocation2 + $0xd0] sm:$0xff] %vm3416_vm7, %v3373_v25 }
 0x596   : > { %v3375_v23 = vpop.permute.xlu1 %3374 }
 0x597   : > { %3444 = vst.msk [vmem:[#allocation2 + $0xd8] sm:$0xff] %vm3416_vm7, %v3375_v23 }
 0x598   : > { %v2479_v14 = vpop.permute.xlu0 %2478 }
 0x599   : > { %2547 = vst.msk [vmem:[#allocation2 + $0xe0] sm:$0xff] %vm2518_vm5, %v2479_v14 }
 0x59a   : > { %v2481_v61 = vpop.permute.xlu1 %2480 }
 0x59b   : > { %2548 = vst.msk [vmem:[#allocation2 + $0xe8] sm:$0xff] %vm2518_vm5, %v2481_v61 }
 0x59c   : > { %v2896_v6 = vpop.permute.xlu0 %2895 }
 0x59d   : > { %2964 = vst.msk [vmem:[#allocation2 + $0xe0] sm:$0xff] %vm2935_vm6, %v2896_v6 }
 0x59e   : > { %v2898_v17 = vpop.permute.xlu1 %2897 }
 0x59f   : > { %2965 = vst.msk [vmem:[#allocation2 + $0xe8] sm:$0xff] %vm2935_vm6, %v2898_v17 }
 0x5a0   : > { %v3377_v38 = vpop.permute.xlu0 %3376 }
 0x5a1   : > { %3445 = vst.msk [vmem:[#allocation2 + $0xe0] sm:$0xff] %vm3416_vm7, %v3377_v38 }
 0x5a2   : > { %v3379_v27 = vpop.permute.xlu1 %3378 }
 0x5a3   : > { %3446 = vst.msk [vmem:[#allocation2 + $0xe8] sm:$0xff] %vm3416_vm7, %v3379_v27 }
 0x5a4   : > { %v2483_v1 = vpop.permute.xlu0 %2482 }
 0x5a5   : > { %2549 = vst.msk [vmem:[#allocation2 + $0xf0] sm:$0xff] %vm2518_vm5, %v2483_v1 }
 0x5a6   : > { %v2485_v20 = vpop.permute.xlu1 %2484 }
 0x5a7   : > { %2550 = vst.msk [vmem:[#allocation2 + $0xf8] sm:$0xff] %vm2518_vm5, %v2485_v20 }
 0x5a8   : > { %v2900_v43 = vpop.permute.xlu0 %2899 }
 0x5a9   : > { %2966 = vst.msk [vmem:[#allocation2 + $0xf0] sm:$0xff] %vm2935_vm6, %v2900_v43  ;;  %3452 = sbr.rel (%p4761_p12) target bundleno = 1970 (0x7b2), region = 82 }
 0x5aa   : > { %v2902_v48 = vpop.permute.xlu1 %2901 }
 0x5ab   : > { %2967 = vst.msk [vmem:[#allocation2 + $0xf8] sm:$0xff] %vm2935_vm6, %v2902_v48 }
 0x5ac   : > { %v3381_v55 = vpop.permute.xlu0 %3380 }
 0x5ad   : > { %3447 = vst.msk [vmem:[#allocation2 + $0xf0] sm:$0xff] %vm3416_vm7, %v3381_v55 }
 0x5ae   : > { %v3383_v19 = vpop.permute.xlu1 %3382 }
 0x5af   : > { %3448 = vst.msk [vmem:[#allocation2 + $0xf8] sm:$0xff] %vm3416_vm7, %v3383_v19 }
 0x5b0   : > { %v7516_v16 = vld [vmem:[#allocation2 + $0x10] sm:$0xff]  ;;  %v7518_v50 = vld [vmem:[#allocation2] sm:$0xff]  ;;  %v7520_v33 = vld [vmem:[#allocation2 + $0x18] sm:$0xff]  ;;  %s5374_s20 = smov 1   ;;  %s5375_s15 = smov 2  }
 0x5b1   : > { %5181 = vrcp.f32 %v7516_v16  ;;  %v7523_v62 = vld [vmem:[#allocation2 + $0x8] sm:$0xff]  ;;  %v7530_v41 = vld [vmem:[#allocation2 + $0x20] sm:$0xff]  ;;  %v7534_v51 = vld [vmem:[#allocation2 + $0x38] sm:$0xff]  ;;  %s5376_s16 = smov 126   ;;  %s5377_s17 = smov 125  }
 0x5b2   : > { %5183 = vrcp.f32 %v7518_v50  ;;  %v7528_v59 = vld [vmem:[#allocation2 + $0x28] sm:$0xff]  ;;  %v7536_v4 = vld [vmem:[#allocation2 + $0x30] sm:$0xff]  ;;  %v7552_v54 = vld [vmem:[#allocation2 + $0x40] sm:$0xff] }
 0x5b3   : > { %5185 = vrcp.f32 %v7520_v33  ;;  %v7546_v31 = vld [vmem:[#allocation2 + $0x48] sm:$0xff]  ;;  %v7560_v63 = vld [vmem:[#allocation2 + $0x58] sm:$0xff]  ;;  %v7566_v8 = vld [vmem:[#allocation2 + $0x50] sm:$0xff] }
 0x5b4   : > { %5187 = vrcp.f32 %v7523_v62  ;;  %v7574_v10 = vld [vmem:[#allocation2 + $0x68] sm:$0xff]  ;;  %v7580_v58 = vld [vmem:[#allocation2 + $0x60] sm:$0xff]  ;;  %v7588_v26 = vld [vmem:[#allocation2 + $0x78] sm:$0xff] }
 0x5b5   : > { %5189 = vrcp.f32 %v7528_v59  ;;  %v7594_v21 = vld [vmem:[#allocation2 + $0x70] sm:$0xff]  ;;  %v7602_v11 = vld [vmem:[#allocation2 + $0x88] sm:$0xff]  ;;  %v7608_v46 = vld [vmem:[#allocation2 + $0x80] sm:$0xff] }
 0x5b6   : > { %5191 = vrcp.f32 %v7530_v41  ;;  %v7616_v3 = vld [vmem:[#allocation2 + $0x98] sm:$0xff]  ;;  %v7622_v57 = vld [vmem:[#allocation2 + $0x90] sm:$0xff]  ;;  %v7630_v12 = vld [vmem:[#allocation2 + $0xa8] sm:$0xff] }
 0x5b7   : > { %5193 = vrcp.f32 %v7534_v51  ;;  %9185 = vst [vmem:[#allocation191_spill] sm:$0xff] %v7622_v57  ;;  %9186 = vst [vmem:[#allocation192_spill] sm:$0xff] %v7630_v12  ;;  %v7636_v56 = vld [vmem:[#allocation2 + $0xa0] sm:$0xff]  ;;  %v7644_v47 = vld [vmem:[#allocation2 + $0xb8] sm:$0xff] }
 0x5b8   : > { %5195 = vrcp.f32 %v7536_v4  ;;  %9187 = vst [vmem:[#allocation193_spill] sm:$0xff] %v7636_v56  ;;  %9188 = vst [vmem:[#allocation194_spill] sm:$0xff] %v7644_v47  ;;  %v7650_v36 = vld [vmem:[#allocation2 + $0xb0] sm:$0xff]  ;;  %v7658_v40 = vld [vmem:[#allocation2 + $0xc8] sm:$0xff] }
 0x5b9   : > { %5197 = vrcp.f32 %v7546_v31  ;;  %9189 = vst [vmem:[#allocation195_spill] sm:$0xff] %v7650_v36  ;;  %9190 = vst [vmem:[#allocation196_spill] sm:$0xff] %v7658_v40  ;;  %v7662_v5 = vld [vmem:[#allocation2 + $0xc0] sm:$0xff]  ;;  %v7667_v7 = vld [vmem:[#allocation2 + $0xd8] sm:$0xff] }
 0x5ba   : > { %5199 = vrcp.f32 %v7552_v54  ;;  %9191 = vst [vmem:[#allocation197_spill] sm:$0xff] %v7662_v5  ;;  %9192 = vst [vmem:[#allocation198_spill] sm:$0xff] %v7667_v7  ;;  %v7670_v15 = vld [vmem:[#allocation2 + $0xd0] sm:$0xff]  ;;  %v7675_v25 = vld [vmem:[#allocation2 + $0xe8] sm:$0xff] }
 0x5bb   : > { %v7538_v52 = vpop.eup %5181  ;;  %5201 = vrcp.f32 %v7560_v63  ;;  %9193 = vst [vmem:[#allocation199_spill] sm:$0xff] %v7670_v15  ;;  %v7678_v14 = vld [vmem:[#allocation2 + $0xe0] sm:$0xff]  ;;  %v7683_v6 = vld [vmem:[#allocation2 + $0xf8] sm:$0xff]  ;;  %v7686_v38 = vld [vmem:[#allocation2 + $0xf0] sm:$0xff] }
 0x5bc   : > { %v7541_v42 = vpop.eup %5183  ;;  %3553 = vrot.lane.b32.xlu1 %v7538_v52, %s5374_s20  ;;  %5203 = vrcp.f32 %v7566_v8  ;;  %9194 = vst [vmem:[#allocation200_spill] sm:$0xff] %v7678_v14 }
 0x5bd   : > { %v7548_v32 = vpop.eup %5185  ;;  %3549 = vrot.lane.b32.xlu0 %v7541_v42, %s5374_s20  ;;  %5205 = vrcp.f32 %v7574_v10 }
 0x5be   : > { %v7554_v34 = vpop.eup %5187  ;;  %5207 = vrcp.f32 %v7580_v58 }
 0x5bf   : > { %v7562_v35 = vpop.eup %5189  ;;  %5209 = vrcp.f32 %v7588_v26 }
 0x5c0   : > { %3555 = vrot.lane.b32.xlu1 %v7548_v32, %s5374_s20  ;;  %v7568_v49 = vpop.eup %5191  ;;  %5211 = vrcp.f32 %v7594_v21 }
 0x5c1   : > { %3551 = vrot.lane.b32.xlu0 %v7554_v34, %s5374_s20  ;;  %v7576_v13 = vpop.eup %5193  ;;  %5213 = vrcp.f32 %v7602_v11 }
 0x5c2   : > { %v7582_v0 = vpop.eup %5195  ;;  %5215 = vrcp.f32 %v7608_v46 }
 0x5c3   : > { %v7590_v45 = vpop.eup %5197  ;;  %5217 = vrcp.f32 %v7616_v3 }
 0x5c4   : > { %3559 = vrot.lane.b32.xlu1 %v7562_v35, %s5374_s20  ;;  %v7596_v29 = vpop.eup %5199  ;;  %5219 = vrcp.f32 %v7622_v57 }
 0x5c5   : > { %3557 = vrot.lane.b32.xlu0 %v7568_v49, %s5374_s20  ;;  %v7604_v53 = vpop.eup %5201  ;;  %5221 = vrcp.f32 %v7630_v12 }
 0x5c6   : > { %v7610_v2 = vpop.eup %5203  ;;  %5223 = vrcp.f32 %v7636_v56 }
 0x5c7   : > { %v7618_v9 = vpop.eup %5205  ;;  %5225 = vrcp.f32 %v7644_v47 }
 0x5c8   : > { %3563 = vrot.lane.b32.xlu1 %v7576_v13, %s5374_s20  ;;  %v7624_v28 = vpop.eup %5207  ;;  %5227 = vrcp.f32 %v7650_v36 }
 0x5c9   : > { %3561 = vrot.lane.b32.xlu0 %v7582_v0, %s5374_s20  ;;  %v7632_v37 = vpop.eup %5209  ;;  %5229 = vrcp.f32 %v7658_v40 }
 0x5ca   : > { %v7638_v22 = vpop.eup %5211  ;;  %5231 = vrcp.f32 %v7662_v5 }
 0x5cb   : > { %v7646_v44 = vpop.eup %5213  ;;  %5233 = vrcp.f32 %v7667_v7 }
 0x5cc   : > { %3567 = vrot.lane.b32.xlu1 %v7590_v45, %s5374_s20  ;;  %v7652_v18 = vpop.eup %5215  ;;  %5235 = vrcp.f32 %v7670_v15 }
 0x5cd   : > { %3565 = vrot.lane.b32.xlu0 %v7596_v29, %s5374_s20  ;;  %v5218_v60 = vpop.eup %5217  ;;  %5237 = vrcp.f32 %v7675_v25 }
 0x5ce   : > { %v5220_v24 = vpop.eup %5219  ;;  %5239 = vrcp.f32 %v7678_v14 }
 0x5cf   : > { %v5222_v39 = vpop.eup %5221  ;;  %5241 = vrcp.f32 %v7683_v6 }
 0x5d0   : > { %3571 = vrot.lane.b32.xlu1 %v7604_v53, %s5374_s20  ;;  %v5224_v30 = vpop.eup %5223  ;;  %5243 = vrcp.f32 %v7686_v38 }
 0x5d1   : > { %3569 = vrot.lane.b32.xlu0 %v7610_v2, %s5374_s20  ;;  %v5226_v23 = vpop.eup %5225 }
 0x5d2   : > { %v5228_v61 = vpop.eup %5227 }
 0x5d3   : > { %v5230_v17 = vpop.eup %5229 }
 0x5d4   : > { %3575 = vrot.lane.b32.xlu1 %v7618_v9, %s5374_s20  ;;  %v5232_v27 = vpop.eup %5231 }
 0x5d5   : > { %3573 = vrot.lane.b32.xlu0 %v7624_v28, %s5374_s20  ;;  %v5234_v1 = vpop.eup %5233 }
 0x5d6   : > { %v5236_v20 = vpop.eup %5235 }
 0x5d7   : > { %v5238_v43 = vpop.eup %5237 }
 0x5d8   : > { %3579 = vrot.lane.b32.xlu1 %v7632_v37, %s5374_s20  ;;  %v5240_v48 = vpop.eup %5239 }
 0x5d9   : > { %3577 = vrot.lane.b32.xlu0 %v7638_v22, %s5374_s20  ;;  %v5242_v55 = vpop.eup %5241 }
 0x5da   : > { %v5244_v19 = vpop.eup %5243 }
 0x5dc   : > { %3583 = vrot.lane.b32.xlu1 %v7646_v44, %s5374_s20 }
 0x5dd   : > { %3581 = vrot.lane.b32.xlu0 %v7652_v18, %s5374_s20 }
 0x5e0   : > { %3587 = vrot.lane.b32.xlu1 %v5218_v60, %s5374_s20 }
 0x5e1   : > { %3585 = vrot.lane.b32.xlu0 %v5220_v24, %s5374_s20 }
 0x5e4   : > { %3591 = vrot.lane.b32.xlu1 %v5222_v39, %s5374_s20 }
 0x5e5   : > { %3589 = vrot.lane.b32.xlu0 %v5224_v30, %s5374_s20 }
 0x5e8   : > { %3595 = vrot.lane.b32.xlu1 %v5226_v23, %s5374_s20 }
 0x5e9   : > { %3593 = vrot.lane.b32.xlu0 %v5228_v61, %s5374_s20 }
 0x5ec   : > { %3599 = vrot.lane.b32.xlu1 %v5230_v17, %s5374_s20 }
 0x5ed   : > { %3597 = vrot.lane.b32.xlu0 %v5232_v27, %s5374_s20 }
 0x5f0   : > { %3603 = vrot.lane.b32.xlu1 %v5234_v1, %s5374_s20 }
 0x5f1   : > { %3601 = vrot.lane.b32.xlu0 %v5236_v20, %s5374_s20 }
 0x5f4   : > { %3607 = vrot.lane.b32.xlu1 %v5238_v43, %s5374_s20 }
 0x5f5   : > { %3605 = vrot.lane.b32.xlu0 %v5240_v48, %s5374_s20 }
 0x5f8   : > { %3611 = vrot.lane.b32.xlu1 %v5242_v55, %s5374_s20 }
 0x5f9   : > { %3609 = vrot.lane.b32.xlu0 %v5244_v19, %s5374_s20 }
 0x5fc   : > { %3679 = vrot.lane.b32.xlu1 %v7554_v34, %s5375_s15 }
 0x5fd   : > { %3677 = vrot.lane.b32.xlu0 %v7541_v42, %s5375_s15 }
 0x600   : > { %3683 = vrot.lane.b32.xlu1 %v7548_v32, %s5375_s15 }
 0x601   : > { %3681 = vrot.lane.b32.xlu0 %v7538_v52, %s5375_s15 }
 0x604   : > { %3687 = vrot.lane.b32.xlu1 %v7562_v35, %s5375_s15 }
 0x605   : > { %3685 = vrot.lane.b32.xlu0 %v7568_v49, %s5375_s15 }
 0x608   : > { %3691 = vrot.lane.b32.xlu1 %v7576_v13, %s5375_s15 }
 0x609   : > { %3689 = vrot.lane.b32.xlu0 %v7582_v0, %s5375_s15 }
 0x60c   : > { %3695 = vrot.lane.b32.xlu1 %v7590_v45, %s5375_s15 }
 0x60d   : > { %3693 = vrot.lane.b32.xlu0 %v7596_v29, %s5375_s15 }
 0x610   : > { %3699 = vrot.lane.b32.xlu1 %v7604_v53, %s5375_s15 }
 0x611   : > { %3697 = vrot.lane.b32.xlu0 %v7610_v2, %s5375_s15 }
 0x614   : > { %3703 = vrot.lane.b32.xlu1 %v7618_v9, %s5375_s15 }
 0x615   : > { %3701 = vrot.lane.b32.xlu0 %v7624_v28, %s5375_s15 }
 0x618   : > { %3707 = vrot.lane.b32.xlu1 %v7632_v37, %s5375_s15 }
 0x619   : > { %3705 = vrot.lane.b32.xlu0 %v7638_v22, %s5375_s15 }
 0x61c   : > { %3711 = vrot.lane.b32.xlu1 %v7646_v44, %s5375_s15 }
 0x61d   : > { %3709 = vrot.lane.b32.xlu0 %v7652_v18, %s5375_s15 }
 0x620   : > { %3715 = vrot.lane.b32.xlu1 %v5218_v60, %s5375_s15 }
 0x621   : > { %3713 = vrot.lane.b32.xlu0 %v5220_v24, %s5375_s15 }
 0x624   : > { %3719 = vrot.lane.b32.xlu1 %v5222_v39, %s5375_s15 }
 0x625   : > { %3717 = vrot.lane.b32.xlu0 %v5224_v30, %s5375_s15 }
 0x628   : > { %3723 = vrot.lane.b32.xlu1 %v5226_v23, %s5375_s15 }
 0x629   : > { %3721 = vrot.lane.b32.xlu0 %v5228_v61, %s5375_s15 }
 0x62c   : > { %3727 = vrot.lane.b32.xlu1 %v5230_v17, %s5375_s15 }
 0x62d   : > { %3725 = vrot.lane.b32.xlu0 %v5232_v27, %s5375_s15 }
 0x62e   : > { %v3554_v52 = vpop.permute.xlu1 %3553 }
 0x62f   : > { %v3550_v42 = vpop.permute.xlu0 %3549  ;;  %v7762_v9 = vmul.f32 %v3554_v52, %v7516_v16 }
 0x630   : > { %3731 = vrot.lane.b32.xlu1 %v5234_v1, %s5375_s15  ;;  %v7752_v45 = vmul.f32 %v3550_v42, %v7518_v50 }
 0x631   : > { %3729 = vrot.lane.b32.xlu0 %v5236_v20, %s5375_s15 }
 0x632   : > { %v3556_v32 = vpop.permute.xlu1 %3555 }
 0x633   : > { %v3552_v34 = vpop.permute.xlu0 %3551  ;;  %v7759_v53 = vmul.f32 %v3556_v32, %v7520_v33 }
 0x634   : > { %3735 = vrot.lane.b32.xlu1 %v5238_v43, %s5375_s15  ;;  %v7749_v13 = vmul.f32 %v3552_v34, %v7523_v62 }
 0x635   : > { %3733 = vrot.lane.b32.xlu0 %v5240_v48, %s5375_s15 }
 0x636   : > { %v3560_v35 = vpop.permute.xlu1 %3559 }
 0x637   : > { %v3558_v49 = vpop.permute.xlu0 %3557  ;;  %v7769_v37 = vmul.f32 %v3560_v35, %v7528_v59 }
 0x638   : > { %3739 = vrot.lane.b32.xlu1 %v5242_v55, %s5375_s15  ;;  %v7772_v44 = vmul.f32 %v3558_v49, %v7530_v41 }
 0x639   : > { %3737 = vrot.lane.b32.xlu0 %v5244_v19, %s5375_s15 }
 0x63a   : > { %v3564_v0 = vpop.permute.xlu1 %3563 }
 0x63b   : > { %v3562_v29 = vpop.permute.xlu0 %3561  ;;  %v7779_v60 = vmul.f32 %v3564_v0, %v7534_v51 }
 0x63c   : > { %3839 = vrot.lane.b32.xlu1 %v7749_v13, %s5376_s16  ;;  %v7782_v39 = vmul.f32 %v3562_v29, %v7536_v4 }
 0x63d   : > { %3837 = vrot.lane.b32.xlu0 %v7752_v45, %s5376_s16 }
 0x63e   : > { %v3568_v2 = vpop.permute.xlu1 %3567 }
 0x63f   : > { %v3566_v28 = vpop.permute.xlu0 %3565  ;;  %v7789_v23 = vmul.f32 %v3568_v2, %v7546_v31 }
 0x640   : > { %3843 = vrot.lane.b32.xlu1 %v7759_v53, %s5376_s16  ;;  %v7792_v17 = vmul.f32 %v3566_v28, %v7552_v54 }
 0x641   : > { %3841 = vrot.lane.b32.xlu0 %v7762_v9, %s5376_s16 }
 0x642   : > { %v3572_v22 = vpop.permute.xlu1 %3571 }
 0x643   : > { %v3570_v18 = vpop.permute.xlu0 %3569  ;;  %v7799_v1 = vmul.f32 %v3572_v22, %v7560_v63 }
 0x644   : > { %3847 = vrot.lane.b32.xlu1 %v7769_v37, %s5376_s16  ;;  %v7802_v43 = vmul.f32 %v3570_v18, %v7566_v8 }
 0x645   : > { %3845 = vrot.lane.b32.xlu0 %v7772_v44, %s5376_s16 }
 0x646   : > { %v3576_v24 = vpop.permute.xlu1 %3575 }
 0x647   : > { %v3574_v30 = vpop.permute.xlu0 %3573  ;;  %v7809_v55 = vmul.f32 %v3576_v24, %v7574_v10 }
 0x648   : > { %3851 = vrot.lane.b32.xlu1 %v7779_v60, %s5376_s16  ;;  %v7812_v52 = vmul.f32 %v3574_v30, %v7580_v58 }
 0x649   : > { %3849 = vrot.lane.b32.xlu0 %v7782_v39, %s5376_s16 }
 0x64a   : > { %v3580_v61 = vpop.permute.xlu1 %3579 }
 0x64b   : > { %v3578_v27 = vpop.permute.xlu0 %3577  ;;  %v7819_v32 = vmul.f32 %v3580_v61, %v7588_v26 }
 0x64c   : > { %3855 = vrot.lane.b32.xlu1 %v7789_v23, %s5376_s16  ;;  %v7822_v35 = vmul.f32 %v3578_v27, %v7594_v21 }
 0x64d   : > { %3853 = vrot.lane.b32.xlu0 %v7792_v17, %s5376_s16 }
 0x64e   : > { %v3584_v20 = vpop.permute.xlu1 %3583 }
 0x64f   : > { %v3582_v48 = vpop.permute.xlu0 %3581  ;;  %v7829_v0 = vmul.f32 %v3584_v20, %v7602_v11 }
 0x650   : > { %3859 = vrot.lane.b32.xlu1 %v7799_v1, %s5376_s16  ;;  %v7832_v2 = vmul.f32 %v3582_v48, %v7608_v46 }
 0x651   : > { %3857 = vrot.lane.b32.xlu0 %v7802_v43, %s5376_s16 }
 0x652   : > { %v3588_v19 = vpop.permute.xlu1 %3587 }
 0x653   : > { %v3586_v42 = vpop.permute.xlu0 %3585  ;;  %v7839_v22 = vmul.f32 %v3588_v19, %v7616_v3 }
 0x654   : > { %3863 = vrot.lane.b32.xlu1 %v7809_v55, %s5376_s16  ;;  %v7842_v24 = vmul.f32 %v3586_v42, %v7622_v57 }
 0x655   : > { %3861 = vrot.lane.b32.xlu0 %v7812_v52, %s5376_s16 }
 0x656   : > { %v3592_v34 = vpop.permute.xlu1 %3591 }
 0x657   : > { %v3590_v49 = vpop.permute.xlu0 %3589  ;;  %v7849_v61 = vmul.f32 %v3592_v34, %v7630_v12 }
 0x658   : > { %3867 = vrot.lane.b32.xlu1 %v7819_v32, %s5376_s16  ;;  %v7852_v20 = vmul.f32 %v3590_v49, %v7636_v56 }
 0x659   : > { %3865 = vrot.lane.b32.xlu0 %v7822_v35, %s5376_s16 }
 0x65a   : > { %v3596_v29 = vpop.permute.xlu1 %3595 }
 0x65b   : > { %v3594_v28 = vpop.permute.xlu0 %3593  ;;  %v7859_v19 = vmul.f32 %v3596_v29, %v7644_v47 }
 0x65c   : > { %3871 = vrot.lane.b32.xlu1 %v7829_v0, %s5376_s16  ;;  %v7864_v57 = vmul.f32 %v3594_v28, %v7650_v36 }
 0x65d   : > { %3869 = vrot.lane.b32.xlu0 %v7832_v2, %s5376_s16 }
 0x65e   : > { %v3600_v18 = vpop.permute.xlu1 %3599 }
 0x65f   : > { %v3598_v30 = vpop.permute.xlu0 %3597  ;;  %v7871_v49 = vmul.f32 %v3600_v18, %v7658_v40 }
 0x660   : > { %3875 = vrot.lane.b32.xlu1 %v7839_v22, %s5376_s16  ;;  %v7876_v29 = vmul.f32 %v3598_v30, %v7662_v5  ;;  %v3965_v30 = vmul.f32 %v7752_v45, %v7752_v45  ;;  %v3966_v45 = vmul.f32 %v7749_v13, %v7749_v13  ;;  %v3971_v13 = vmul.f32 %v7782_v39, %v7782_v39 }
 0x661   : > { %3873 = vrot.lane.b32.xlu0 %v7842_v24, %s5376_s16 }
 0x662   : > { %v3604_v27 = vpop.permute.xlu1 %3603 }
 0x663   : > { %v3602_v48 = vpop.permute.xlu0 %3601  ;;  %v7885_v28 = vmul.f32 %v3604_v27, %v7667_v7 }
 0x664   : > { %3879 = vrot.lane.b32.xlu1 %v7849_v61, %s5376_s16  ;;  %v7890_v18 = vmul.f32 %v3602_v48, %v7670_v15  ;;  %v3967_v48 = vmul.f32 %v7762_v9, %v7762_v9 }
 0x665   : > { %3877 = vrot.lane.b32.xlu0 %v7852_v20, %s5376_s16 }
 0x666   : > { %v7861_v42 = vpop.permute.xlu1 %3607 }
 0x667   : > { %v3606_v34 = vpop.permute.xlu0 %3605 }
 0x668   : > { %3883 = vrot.lane.b32.xlu1 %v7859_v19, %s5376_s16  ;;  %v7903_v27 = vmul.f32 %v3606_v34, %v7678_v14  ;;  %v3969_v34 = vmul.f32 %v7772_v44, %v7772_v44  ;;  %v3968_v14 = vmul.f32 %v7759_v53, %v7759_v53  ;;  %v3973_v53 = vmul.f32 %v7792_v17, %v7792_v17 }
 0x669   : > { %3881 = vrot.lane.b32.xlu0 %v7864_v57, %s5376_s16 }
 0x66a   : > { %v7873_v56 = vpop.permute.xlu1 %3611 }
 0x66b   : > { %v7878_v47 = vpop.permute.xlu0 %3609 }
 0x66c   : > { %3887 = vrot.lane.b32.xlu1 %v7871_v49, %s5376_s16 }
 0x66d   : > { %3885 = vrot.lane.b32.xlu0 %v7876_v29, %s5376_s16 }
 0x66e   : > { %v7887_v36 = vpop.permute.xlu1 %3679 }
 0x66f   : > { %v7892_v40 = vpop.permute.xlu0 %3677 }
 0x670   : > { %3891 = vrot.lane.b32.xlu1 %v7885_v28, %s5376_s16 }
 0x671   : > { %3889 = vrot.lane.b32.xlu0 %v7890_v18, %s5376_s16 }
 0x672   : > { %v7900_v5 = vpop.permute.xlu1 %3683 }
 0x673   : > { %v7905_v7 = vpop.permute.xlu0 %3681 }
 0x674   : > { %4029 = vrot.lane.b32.xlu1 %v3965_v30, %s5374_s20 }
 0x675   : > { %3893 = vrot.lane.b32.xlu0 %v7903_v27, %s5376_s16 }
 0x676   : > { %v7912_v15 = vpop.permute.xlu1 %3687 }
 0x677   : > { %v7916_v12 = vpop.permute.xlu0 %3685 }
 0x678   : > { %4033 = vrot.lane.b32.xlu1 %v3967_v48, %s5374_s20 }
 0x679   : > { %4031 = vrot.lane.b32.xlu0 %v3966_v45, %s5374_s20  ;;  %v3970_v45 = vmul.f32 %v7769_v37, %v7769_v37  ;;  %v3975_v37 = vmul.f32 %v7802_v43, %v7802_v43 }
 0x67a   : > { %v7922_v30 = vpop.permute.xlu1 %3691 }
 0x67b   : > { %v7926_v9 = vpop.permute.xlu0 %3689 }
 0x67c   : > { %4037 = vrot.lane.b32.xlu1 %v3969_v34, %s5374_s20 }
 0x67d   : > { %4035 = vrot.lane.b32.xlu0 %v3968_v14, %s5374_s20  ;;  %v3972_v14 = vmul.f32 %v7779_v60, %v7779_v60  ;;  %v3977_v60 = vmul.f32 %v7812_v52, %v7812_v52 }
 0x67e   : > { %v7932_v48 = vpop.permute.xlu1 %3695 }
 0x67f   : > { %v7936_v44 = vpop.permute.xlu0 %3693 }
 0x680   : > { %4041 = vrot.lane.b32.xlu1 %v3971_v13, %s5374_s20 }
 0x681   : > { %4039 = vrot.lane.b32.xlu0 %v3970_v45, %s5374_s20  ;;  %v3974_v45 = vmul.f32 %v7789_v23, %v7789_v23  ;;  %v3979_v23 = vmul.f32 %v7822_v35, %v7822_v35 }
 0x682   : > { %v7942_v34 = vpop.permute.xlu1 %3699 }
 0x683   : > { %v7946_v39 = vpop.permute.xlu0 %3697 }
 0x684   : > { %4045 = vrot.lane.b32.xlu1 %v3973_v53, %s5374_s20 }
 0x685   : > { %4043 = vrot.lane.b32.xlu0 %v3972_v14, %s5374_s20  ;;  %v3976_v14 = vmul.f32 %v7799_v1, %v7799_v1  ;;  %v3981_v1 = vmul.f32 %v7832_v2, %v7832_v2 }
 0x686   : > { %v7952_v13 = vpop.permute.xlu1 %3703 }
 0x687   : > { %v7956_v17 = vpop.permute.xlu0 %3701 }
 0x688   : > { %4049 = vrot.lane.b32.xlu1 %v3975_v37, %s5374_s20 }
 0x689   : > { %4047 = vrot.lane.b32.xlu0 %v3974_v45, %s5374_s20  ;;  %v3978_v45 = vmul.f32 %v7809_v55, %v7809_v55  ;;  %v3983_v55 = vmul.f32 %v7842_v24, %v7842_v24 }
 0x68a   : > { %v7962_v53 = vpop.permute.xlu1 %3707 }
 0x68b   : > { %v7966_v43 = vpop.permute.xlu0 %3705 }
 0x68c   : > { %4053 = vrot.lane.b32.xlu1 %v3977_v60, %s5374_s20 }
 0x68d   : > { %4051 = vrot.lane.b32.xlu0 %v3976_v14, %s5374_s20  ;;  %v3980_v14 = vmul.f32 %v7819_v32, %v7819_v32  ;;  %v3985_v32 = vmul.f32 %v7852_v20, %v7852_v20 }
 0x68e   : > { %v7972_v37 = vpop.permute.xlu1 %3711 }
 0x68f   : > { %v7976_v52 = vpop.permute.xlu0 %3709 }
 0x690   : > { %4057 = vrot.lane.b32.xlu1 %v3979_v23, %s5374_s20 }
 0x691   : > { %4055 = vrot.lane.b32.xlu0 %v3978_v45, %s5374_s20  ;;  %v3982_v45 = vmul.f32 %v7829_v0, %v7829_v0  ;;  %v3987_v0 = vmul.f32 %v7864_v57, %v7864_v57 }
 0x692   : > { %v7982_v60 = vpop.permute.xlu1 %3715 }
 0x693   : > { %v7986_v35 = vpop.permute.xlu0 %3713 }
 0x694   : > { %4061 = vrot.lane.b32.xlu1 %v3981_v1, %s5374_s20 }
 0x695   : > { %4059 = vrot.lane.b32.xlu0 %v3980_v14, %s5374_s20  ;;  %v3984_v14 = vmul.f32 %v7839_v22, %v7839_v22  ;;  %v3989_v22 = vmul.f32 %v7876_v29, %v7876_v29 }
 0x696   : > { %v7992_v23 = vpop.permute.xlu1 %3719 }
 0x697   : > { %v7996_v2 = vpop.permute.xlu0 %3717 }
 0x698   : > { %4065 = vrot.lane.b32.xlu1 %v3983_v55, %s5374_s20 }
 0x699   : > { %4063 = vrot.lane.b32.xlu0 %v3982_v45, %s5374_s20  ;;  %v3986_v45 = vmul.f32 %v7849_v61, %v7849_v61  ;;  %v3991_v61 = vmul.f32 %v7890_v18, %v7890_v18 }
 0x69a   : > { %v8002_v1 = vpop.permute.xlu1 %3723 }
 0x69b   : > { %v8006_v24 = vpop.permute.xlu0 %3721 }
 0x69c   : > { %4069 = vrot.lane.b32.xlu1 %v3985_v32, %s5374_s20 }
 0x69d   : > { %4067 = vrot.lane.b32.xlu0 %v3984_v14, %s5374_s20  ;;  %v3988_v14 = vmul.f32 %v7859_v19, %v7859_v19  ;;  %v3993_v19 = vmul.f32 %v7903_v27, %v7903_v27 }
 0x69e   : > { %v8012_v55 = vpop.permute.xlu1 %3727 }
 0x69f   : > { %v8016_v20 = vpop.permute.xlu0 %3725 }
 0x6a0   : > { %4073 = vrot.lane.b32.xlu1 %v3987_v0, %s5374_s20 }
 0x6a1   : > { %4071 = vrot.lane.b32.xlu0 %v3986_v45, %s5374_s20  ;;  %v3990_v45 = vmul.f32 %v7871_v49, %v7871_v49  ;;  %v3674_v49 = vmul.f32 %v7861_v42, %v7675_v25 }
 0x6a2   : > { %v8022_v32 = vpop.permute.xlu1 %3731 }
 0x6a3   : > { %v8026_v57 = vpop.permute.xlu0 %3729 }
 0x6a4   : > { %4077 = vrot.lane.b32.xlu1 %v3989_v22, %s5374_s20  ;;  %v3675_v22 = vmul.f32 %v7878_v47, %v7686_v38  ;;  %v3994_v47 = vmul.f32 %v3674_v49, %v3674_v49 }
 0x6a5   : > { %4075 = vrot.lane.b32.xlu0 %v3988_v14, %s5374_s20  ;;  %v3992_v14 = vmul.f32 %v7885_v28, %v7885_v28 }
 0x6a6   : > { %v8032_v0 = vpop.permute.xlu1 %3735  ;;  %v3995_v27 = vmul.f32 %v3675_v22, %v3675_v22 }
 0x6a7   : > { %v8036_v29 = vpop.permute.xlu0 %3733 }
 0x6a8   : > { %9195 = vst [vmem:[#allocation201_spill] sm:$0xff] %v8036_v29  ;;  %4081 = vrot.lane.b32.xlu1 %v3991_v61, %s5374_s20 }
 0x6a9   : > { %4079 = vrot.lane.b32.xlu0 %v3990_v45, %s5374_s20  ;;  %v3676_v45 = vmul.f32 %v7873_v56, %v7683_v6 }
 0x6aa   : > { %v8044_v18 = vpop.permute.xlu1 %3739 }
 0x6ab   : > { %v8050_v29 = vpop.permute.xlu0 %3737 }
 0x6ac   : > { %4085 = vrot.lane.b32.xlu1 %v3993_v19, %s5374_s20  ;;  %v3996_v19 = vmul.f32 %v3676_v45, %v3676_v45 }
 0x6ad   : > { %4083 = vrot.lane.b32.xlu0 %v3992_v14, %s5374_s20 }
 0x6ae   : > { %v3840_v61 = vpop.permute.xlu1 %3839 }
 0x6af   : > { %3934 = vst.msk [vmem:[%s5544_s7 + $0x8] sm:$0xff] %vm2069_vm4, %v3840_v61  ;;  %v3838_v28 = vpop.permute.xlu0 %3837 }
 0x6b0   : > { %3933 = vst.msk [vmem:[%s5544_s7] sm:$0xff] %vm2069_vm4, %v3838_v28  ;;  %4089 = vrot.lane.b32.xlu1 %v3995_v27, %s5374_s20 }
 0x6b1   : > { %4087 = vrot.lane.b32.xlu0 %v3994_v47, %s5374_s20 }
 0x6b2   : > { %v3844_v42 = vpop.permute.xlu1 %3843 }
 0x6b3   : > { %3936 = vst.msk [vmem:[%s5544_s7 + $0x18] sm:$0xff] %vm2069_vm4, %v3844_v42  ;;  %v3842_v14 = vpop.permute.xlu0 %3841 }
 0x6b4   : > { %3935 = vst.msk [vmem:[%s5544_s7 + $0x10] sm:$0xff] %vm2069_vm4, %v3842_v14  ;;  %3895 = vrot.lane.b32.xlu1 %v3674_v49, %s5376_s16 }
 0x6b5   : > { %4091 = vrot.lane.b32.xlu0 %v3996_v19, %s5374_s20 }
 0x6b6   : > { %v3848_v56 = vpop.permute.xlu1 %3847 }
 0x6b7   : > { %3938 = vst.msk [vmem:[%s5544_s7 + $0x28] sm:$0xff] %vm2069_vm4, %v3848_v56  ;;  %v3846_v27 = vpop.permute.xlu0 %3845 }
 0x6b8   : > { %3937 = vst.msk [vmem:[%s5544_s7 + $0x20] sm:$0xff] %vm2069_vm4, %v3846_v27  ;;  %3899 = vrot.lane.b32.xlu1 %v3676_v45, %s5376_s16 }
 0x6b9   : > { %3897 = vrot.lane.b32.xlu0 %v3675_v22, %s5376_s16 }
 0x6ba   : > { %v3852_v61 = vpop.permute.xlu1 %3851 }
 0x6bb   : > { %3940 = vst.msk [vmem:[%s5544_s7 + $0x38] sm:$0xff] %vm2069_vm4, %v3852_v61  ;;  %v3850_v49 = vpop.permute.xlu0 %3849 }
 0x6bc   : > { %3939 = vst.msk [vmem:[%s5544_s7 + $0x30] sm:$0xff] %vm2069_vm4, %v3850_v49 }
 0x6be   : > { %v3856_v47 = vpop.permute.xlu1 %3855 }
 0x6bf   : > { %3942 = vst.msk [vmem:[%s5544_s7 + $0x48] sm:$0xff] %vm2069_vm4, %v3856_v47  ;;  %v3854_v28 = vpop.permute.xlu0 %3853 }
 0x6c0   : > { %3941 = vst.msk [vmem:[%s5544_s7 + $0x40] sm:$0xff] %vm2069_vm4, %v3854_v28 }
 0x6c2   : > { %v3860_v45 = vpop.permute.xlu1 %3859 }
 0x6c3   : > { %3944 = vst.msk [vmem:[%s5544_s7 + $0x58] sm:$0xff] %vm2069_vm4, %v3860_v45  ;;  %v3858_v22 = vpop.permute.xlu0 %3857 }
 0x6c4   : > { %3943 = vst.msk [vmem:[%s5544_s7 + $0x50] sm:$0xff] %vm2069_vm4, %v3858_v22 }
 0x6c6   : > { %v3864_v42 = vpop.permute.xlu1 %3863 }
 0x6c7   : > { %3946 = vst.msk [vmem:[%s5544_s7 + $0x68] sm:$0xff] %vm2069_vm4, %v3864_v42  ;;  %v3862_v19 = vpop.permute.xlu0 %3861 }
 0x6c8   : > { %3945 = vst.msk [vmem:[%s5544_s7 + $0x60] sm:$0xff] %vm2069_vm4, %v3862_v19 }
 0x6ca   : > { %v3868_v14 = vpop.permute.xlu1 %3867 }
 0x6cb   : > { %3948 = vst.msk [vmem:[%s5544_s7 + $0x78] sm:$0xff] %vm2069_vm4, %v3868_v14  ;;  %v3866_v56 = vpop.permute.xlu0 %3865 }
 0x6cc   : > { %3947 = vst.msk [vmem:[%s5544_s7 + $0x70] sm:$0xff] %vm2069_vm4, %v3866_v56 }
 0x6ce   : > { %v3872_v27 = vpop.permute.xlu1 %3871 }
 0x6cf   : > { %3950 = vst.msk [vmem:[%s5544_s7 + $0x88] sm:$0xff] %vm2069_vm4, %v3872_v27  ;;  %v3870_v61 = vpop.permute.xlu0 %3869 }
 0x6d0   : > { %3949 = vst.msk [vmem:[%s5544_s7 + $0x80] sm:$0xff] %vm2069_vm4, %v3870_v61  ;;  %v3773_v61 = vmul.f32 %v7892_v40, %v7518_v50  ;;  %v3777_v50 = vmul.f32 %v7916_v12, %v7530_v41  ;;  %v8150_v41 = vmul.f32 %v7942_v34, %v7560_v63  ;;  %v8167_v63 = vmul.f32 %v7962_v53, %v7588_v26  ;;  %v9196_v26 = vld [vmem:[#allocation191_spill] sm:$0xff]  ;;  %v9201_v53 = vld [vmem:[#allocation196_spill] sm:$0xff] }
 0x6d2   : > { %v3876_v49 = vpop.permute.xlu1 %3875 }
 0x6d3   : > { %3952 = vst.msk [vmem:[%s5544_s7 + $0x98] sm:$0xff] %vm2069_vm4, %v3876_v49  ;;  %v3874_v47 = vpop.permute.xlu0 %3873 }
 0x6d4   : > { %3951 = vst.msk [vmem:[%s5544_s7 + $0x90] sm:$0xff] %vm2069_vm4, %v3874_v47 }
 0x6d6   : > { %v3880_v28 = vpop.permute.xlu1 %3879 }
 0x6d7   : > { %3954 = vst.msk [vmem:[%s5544_s7 + $0xa8] sm:$0xff] %vm2069_vm4, %v3880_v28  ;;  %v3878_v45 = vpop.permute.xlu0 %3877 }
 0x6d8   : > { %3953 = vst.msk [vmem:[%s5544_s7 + $0xa0] sm:$0xff] %vm2069_vm4, %v3878_v45  ;;  %v3774_v45 = vmul.f32 %v7887_v36, %v7523_v62  ;;  %v8142_v62 = vmul.f32 %v7932_v48, %v7546_v31  ;;  %v8159_v31 = vmul.f32 %v7952_v13, %v7574_v10  ;;  %v8179_v10 = vmul.f32 %v7976_v52, %v7608_v46  ;;  %v9198_v48 = vld [vmem:[#allocation193_spill] sm:$0xff]  ;;  %v9200_v13 = vld [vmem:[#allocation195_spill] sm:$0xff] }
 0x6d9   : > { %v8199_v46 = vmul.f32 %v7996_v2, %v9198_v48  ;;  %v9202_v52 = vld [vmem:[#allocation197_spill] sm:$0xff]  ;;  %v9204_v2 = vld [vmem:[#allocation199_spill] sm:$0xff] }
 0x6da   : > { %v3884_v22 = vpop.permute.xlu1 %3883 }
 0x6db   : > { %3956 = vst.msk [vmem:[%s5544_s7 + $0xb8] sm:$0xff] %vm2069_vm4, %v3884_v22  ;;  %v3882_v42 = vpop.permute.xlu0 %3881  ;;  %v3776_v22 = vmul.f32 %v7900_v5, %v7520_v33  ;;  %v3779_v33 = vmul.f32 %v7926_v9, %v7536_v4  ;;  %v8175_v5 = vmul.f32 %v7972_v37, %v7602_v11 }
 0x6dc   : > { %3955 = vst.msk [vmem:[%s5544_s7 + $0xb0] sm:$0xff] %vm2069_vm4, %v3882_v42  ;;  %v3775_v42 = vmul.f32 %v7905_v7, %v7516_v16  ;;  %v8146_v16 = vmul.f32 %v7936_v44, %v7552_v54  ;;  %v8163_v54 = vmul.f32 %v7956_v17, %v7580_v58  ;;  %v8185_v58 = vmul.f32 %v7982_v60, %v7616_v3  ;;  %v9199_v44 = vld [vmem:[#allocation194_spill] sm:$0xff] }
 0x6dd   : > { %v8203_v34 = vmul.f32 %v8002_v1, %v9199_v44  ;;  %v8208_v17 = vmul.f32 %v8006_v24, %v9200_v13  ;;  %v8217_v60 = vmul.f32 %v8016_v20, %v9202_v52  ;;  %v8225_v1 = vmul.f32 %v8026_v57, %v9204_v2 }
 0x6de   : > { %v3888_v19 = vpop.permute.xlu1 %3887  ;;  %v8239_v20 = vmul.f32 %v8044_v18, %v7683_v6  ;;  %v8245_v57 = vmul.f32 %v8050_v29, %v7686_v38 }
 0x6df   : > { %3958 = vst.msk [vmem:[%s5544_s7 + $0xc8] sm:$0xff] %vm2069_vm4, %v3888_v19  ;;  %v3886_v14 = vpop.permute.xlu0 %3885  ;;  %v3778_v19 = vmul.f32 %v7912_v15, %v7528_v59  ;;  %v8189_v15 = vmul.f32 %v7986_v35, %v9196_v26  ;;  %v9203_v35 = vld [vmem:[#allocation198_spill] sm:$0xff] }
 0x6e0   : > { %3957 = vst.msk [vmem:[%s5544_s7 + $0xc0] sm:$0xff] %vm2069_vm4, %v3886_v14  ;;  %v8136_v14 = vmul.f32 %v7922_v30, %v7534_v51  ;;  %v8154_v51 = vmul.f32 %v7946_v39, %v7566_v8  ;;  %v8171_v8 = vmul.f32 %v7966_v43, %v7594_v21  ;;  %v9197_v21 = vld [vmem:[#allocation192_spill] sm:$0xff]  ;;  %v8212_v43 = vmul.f32 %v8012_v55, %v9201_v53 }
 0x6e1   : > { %v8193_v30 = vmul.f32 %v7992_v23, %v9197_v21  ;;  %v8221_v23 = vmul.f32 %v8022_v32, %v9203_v35  ;;  %v8231_v55 = vmul.f32 %v8032_v0, %v7675_v25 }
 0x6e2   : > { %v3892_v56 = vpop.permute.xlu1 %3891 }
 0x6e3   : > { %3960 = vst.msk [vmem:[%s5544_s7 + $0xd8] sm:$0xff] %vm2069_vm4, %v3892_v56  ;;  %v3890_v27 = vpop.permute.xlu0 %3889  ;;  %v9205_v56 = vld [vmem:[#allocation200_spill] sm:$0xff] }
 0x6e4   : > { %3959 = vst.msk [vmem:[%s5544_s7 + $0xd0] sm:$0xff] %vm2069_vm4, %v3890_v27  ;;  %v9206_v27 = vld [vmem:[#allocation201_spill] sm:$0xff] }
 0x6e6   : > { %v4030_v49 = vpop.permute.xlu1 %4029 }
 0x6e7   : > { %v4125_v47 = vsub.f32 %v3773_v61, %v4030_v49  ;;  %v3894_v28 = vpop.permute.xlu0 %3893  ;;  %v8235_v61 = vmul.f32 %v9206_v27, %v9205_v56 }
 0x6e8   : > { %3961 = vst.msk [vmem:[%s5544_s7 + $0xe0] sm:$0xff] %vm2069_vm4, %v3894_v28 }
 0x6e9   : > { %v8132_v40 = vmax.f32 %v4125_v47, 1e-05 }
 0x6ea   : > { %v4034_v59 = vpop.permute.xlu1 %4033 }
 0x6eb   : > { %5245 = vrsqrt.f32 %v8132_v40  ;;  %v4127_v4 = vsub.f32 %v3775_v42, %v4034_v59  ;;  %v4032_v12 = vpop.permute.xlu0 %4031  ;;  %vm4191_vm8 = vcmp.eq.f32.partialorder %v8132_v40, inf  ;;  %vm4193_vm9 = vcmp.eq.f32.partialorder %v8132_v40, 0.0 }
 0x6ec   : > { %v4126_v36 = vsub.f32 %v3774_v45, %v4032_v12  ;;  %v4194_v6 = vand.u32 2147483648, %v8132_v40 }
 0x6ed   : > { %v8181_v7 = vmax.f32 %v4127_v4, 1e-05 }
 0x6ee   : > { %v8195_v11 = vmax.f32 %v4126_v36, 1e-05  ;;  %v4038_v9 = vpop.permute.xlu1 %4037 }
 0x6ef   : > { %5247 = vrsqrt.f32 %v8181_v7  ;;  %v4129_v3 = vsub.f32 %v3777_v50, %v4038_v9  ;;  %v4036_v39 = vpop.permute.xlu0 %4035  ;;  %vm4205_vm10 = vcmp.eq.f32.partialorder %v8181_v7, inf  ;;  %vm4207_vm11 = vcmp.eq.f32.partialorder %v8181_v7, 0.0 }
 0x6f0   : > { %5249 = vrsqrt.f32 %v8195_v11  ;;  %v4128_v37 = vsub.f32 %v3776_v22, %v4036_v39  ;;  %v4208_v38 = vand.u32 2147483648, %v8181_v7  ;;  %vm4198_vm12 = vcmp.eq.f32.partialorder %v8195_v11, inf }
 0x6f1   : > { %v8227_v24 = vmax.f32 %v4129_v3, 1e-05  ;;  %vm4200_vm13 = vcmp.eq.f32.partialorder %v8195_v11, 0.0  ;;  %v4201_v50 = vand.u32 2147483648, %v8195_v11 }
 0x6f2   : > { %v8241_v32 = vmax.f32 %v4128_v37, 1e-05  ;;  %v4042_v49 = vpop.permute.xlu1 %4041 }
 0x6f3   : > { %5251 = vrsqrt.f32 %v8227_v24  ;;  %v4131_v47 = vsub.f32 %v3779_v33, %v4042_v49  ;;  %v4040_v25 = vpop.permute.xlu0 %4039  ;;  %vm4219_vm14 = vcmp.eq.f32.partialorder %v8227_v24, inf  ;;  %vm4221_vm15 = vcmp.eq.f32.partialorder %v8227_v24, 0.0 }
 0x6f4   : > { %5253 = vrsqrt.f32 %v8241_v32  ;;  %v4130_v0 = vsub.f32 %v3778_v19, %v4040_v25  ;;  %v4222_v36 = vand.u32 2147483648, %v8227_v24  ;;  %vm4212_vm0 = vcmp.eq.f32.partialorder %v8241_v32, inf }
 0x6f5   : > { %v5246_v18 = vpop.eup %5245  ;;  %v8252_v28 = vmax.f32 %v4131_v47, 1e-05  ;;  %vm4214_vm1 = vcmp.eq.f32.partialorder %v8241_v32, 0.0  ;;  %v4215_v48 = vand.u32 2147483648, %v8241_v32 }
 0x6f6   : > { %v8257_v29 = vmax.f32 %v4130_v0, 1e-05  ;;  %v4046_v45 = vpop.permute.xlu1 %4045  ;;  %v4190_v22 = vmul.f32 %v5246_v18, %v8132_v40 }
 0x6f7   : > { %5255 = vrsqrt.f32 %v8252_v28  ;;  %v4133_v42 = vsub.f32 %v8146_v16, %v4046_v45  ;;  %v4044_v19 = vpop.permute.xlu0 %4043  ;;  %vm4233_vm2 = vcmp.eq.f32.partialorder %v8252_v28, inf  ;;  %v4236_v39 = vand.u32 2147483648, %v8252_v28 }
 0x6f8   : > { %5257 = vrsqrt.f32 %v8257_v29  ;;  %v4132_v33 = vsub.f32 %v8136_v14, %v4044_v19  ;;  %v4192_v59 = vsel %vm4191_vm8, %v8132_v40, %v4190_v22  ;;  %vm4235_vm3 = vcmp.eq.f32.partialorder %v8252_v28, 0.0 }
 0x6f9   : > { %v5248_v4 = vpop.eup %5247  ;;  %v8272_v12 = vmax.f32 %v4133_v42, 1e-05  ;;  %v4195_v16 = vsel %vm4193_vm9, %v4194_v6, %v4192_v59  ;;  %vm4226_vm5 = vcmp.eq.f32.partialorder %v8257_v29, inf  ;;  %vm4228_vm6 = vcmp.eq.f32.partialorder %v8257_v29, 0.0 }
 0x6fa   : > { %v5250_v26 = vpop.eup %5249  ;;  %v8278_v21 = vmax.f32 %v4132_v33, 1e-05  ;;  %v4050_v14 = vpop.permute.xlu1 %4049  ;;  %4445 = vrot.lane.b32.xlu0 %v4195_v16, %s5377_s17  ;;  %v4204_v9 = vmul.f32 %v5248_v4, %v8181_v7 }
 0x6fb   : > { %5259 = vrsqrt.f32 %v8272_v12  ;;  %v4135_v40 = vsub.f32 %v8154_v51, %v4050_v14  ;;  %v4048_v44 = vpop.permute.xlu0 %4047  ;;  %v4197_v3 = vmul.f32 %v5250_v26, %v8195_v11  ;;  %vm4247_vm7 = vcmp.eq.f32.partialorder %v8272_v12, inf }
 0x6fc   : > { %5261 = vrsqrt.f32 %v8278_v21  ;;  %v4134_v13 = vsub.f32 %v8142_v62, %v4048_v44  ;;  %v4206_v53 = vsel %vm4205_vm10, %v8181_v7, %v4204_v9  ;;  %v4229_v7 = vand.u32 2147483648, %v8257_v29 }
 0x6fd   : > { %v5252_v51 = vpop.eup %5251  ;;  %v8296_v37 = vmax.f32 %v4135_v40, 1e-05  ;;  %v4209_v52 = vsel %vm4207_vm11, %v4208_v38, %v4206_v53  ;;  %v4199_v35 = vsel %vm4198_vm12, %v8195_v11, %v4197_v3  ;;  %v4250_v6 = vand.u32 2147483648, %v8272_v12 }
 0x6fe   : > { %v5254_v62 = vpop.eup %5253  ;;  %v8304_v2 = vmax.f32 %v4134_v13, 1e-05  ;;  %v4054_v56 = vpop.permute.xlu1 %4053  ;;  %4449 = vrot.lane.b32.xlu0 %v4209_v52, %s5377_s17  ;;  %v4202_v27 = vsel %vm4200_vm13, %v4201_v50, %v4199_v35  ;;  %v4218_v49 = vmul.f32 %v5252_v51, %v8227_v24  ;;  %vm4249_vm8 = vcmp.eq.f32.partialorder %v8272_v12, 0.0 }
 0x6ff   : > { %5263 = vrsqrt.f32 %v8296_v37  ;;  %v4137_v47 = vsub.f32 %v8163_v54, %v4054_v56  ;;  %4447 = vrot.lane.b32.xlu1 %v4202_v27, %s5377_s17  ;;  %v4052_v25 = vpop.permute.xlu0 %4051  ;;  %v4211_v0 = vmul.f32 %v5254_v62, %v8241_v32  ;;  %vm4240_vm9 = vcmp.eq.f32.partialorder %v8278_v21, inf }
 0x700   : > { %5265 = vrsqrt.f32 %v8304_v2  ;;  %v4136_v11 = vsub.f32 %v8150_v41, %v4052_v25  ;;  %v4220_v18 = vsel %vm4219_vm14, %v8227_v24, %v4218_v49  ;;  %vm4242_vm10 = vcmp.eq.f32.partialorder %v8278_v21, 0.0 }
 0x701   : > { %v5256_v54 = vpop.eup %5255  ;;  %v8324_v38 = vmax.f32 %v4137_v47, 1e-05  ;;  %v4223_v45 = vsel %vm4221_vm15, %v4222_v36, %v4220_v18  ;;  %v4213_v22 = vsel %vm4212_vm0, %v8241_v32, %v4211_v0  ;;  %v4243_v24 = vand.u32 2147483648, %v8278_v21 }
 0x702   : > { %v5258_v41 = vpop.eup %5257  ;;  %v8332_v42 = vmax.f32 %v4136_v11, 1e-05  ;;  %v4058_v19 = vpop.permute.xlu1 %4057  ;;  %4453 = vrot.lane.b32.xlu0 %v4223_v45, %s5377_s17  ;;  %v4216_v50 = vsel %vm4214_vm1, %v4215_v48, %v4213_v22  ;;  %v4232_v33 = vmul.f32 %v5256_v54, %v8252_v28  ;;  %vm4261_vm11 = vcmp.eq.f32.partialorder %v8296_v37, inf }
 0x703   : > { %5267 = vrsqrt.f32 %v8324_v38  ;;  %v4139_v59 = vsub.f32 %v8171_v8, %v4058_v19  ;;  %4451 = vrot.lane.b32.xlu1 %v4216_v50, %s5377_s17  ;;  %v4056_v4 = vpop.permute.xlu0 %4055  ;;  %v4225_v16 = vmul.f32 %v5258_v41, %v8257_v29  ;;  %v4264_v36 = vand.u32 2147483648, %v8296_v37 }
 0x704   : > { %5269 = vrsqrt.f32 %v8332_v42  ;;  %v4138_v32 = vsub.f32 %v8159_v31, %v4056_v4  ;;  %v4234_v26 = vsel %vm4233_vm2, %v8252_v28, %v4232_v33  ;;  %vm4263_vm12 = vcmp.eq.f32.partialorder %v8296_v37, 0.0 }
 0x705   : > { %vm4254_vm13 = vcmp.eq.f32.partialorder %v8304_v2, inf  ;;  %v5260_v8 = vpop.eup %5259  ;;  %v8352_v14 = vmax.f32 %v4139_v59, 1e-05  ;;  %v4237_v9 = vsel %vm4235_vm3, %v4236_v39, %v4234_v26  ;;  %v4227_v48 = vsel %vm4226_vm5, %v8257_v29, %v4225_v16 }
 0x706   : > { %vm4256_vm14 = vcmp.eq.f32.partialorder %v8304_v2, 0.0  ;;  %v5262_v31 = vpop.eup %5261  ;;  %v8360_v40 = vmax.f32 %v4138_v32, 1e-05  ;;  %v4062_v44 = vpop.permute.xlu1 %4061  ;;  %4457 = vrot.lane.b32.xlu0 %v4237_v9, %s5377_s17  ;;  %v4230_v3 = vsel %vm4228_vm6, %v4229_v7, %v4227_v48  ;;  %v4246_v13 = vmul.f32 %v5260_v8, %v8272_v12 }
 0x707   : > { %v4257_v28 = vand.u32 2147483648, %v8304_v2  ;;  %5271 = vrsqrt.f32 %v8352_v14  ;;  %v4141_v39 = vsub.f32 %v8179_v10, %v4062_v44  ;;  %4455 = vrot.lane.b32.xlu1 %v4230_v3, %s5377_s17  ;;  %v4060_v53 = vpop.permute.xlu0 %4059  ;;  %v4239_v51 = vmul.f32 %v5262_v31, %v8278_v21 }
 0x708   : > { %vm4275_vm15 = vcmp.eq.f32.partialorder %v8324_v38, inf  ;;  %5273 = vrsqrt.f32 %v8360_v40  ;;  %v4140_v29 = vsub.f32 %v8167_v63, %v4060_v53  ;;  %v4248_v52 = vsel %vm4247_vm7, %v8272_v12, %v4246_v13 }
 0x709   : > { %vm4277_vm0 = vcmp.eq.f32.partialorder %v8324_v38, 0.0  ;;  %v5264_v35 = vpop.eup %5263  ;;  %v8378_v62 = vmax.f32 %v4141_v39, 1e-05  ;;  %v4251_v10 = vsel %vm4249_vm8, %v4250_v6, %v4248_v52  ;;  %v4241_v56 = vsel %vm4240_vm9, %v8278_v21, %v4239_v51 }
 0x70a   : > { %v4278_v27 = vand.u32 2147483648, %v8324_v38  ;;  %v5266_v49 = vpop.eup %5265  ;;  %v8386_v63 = vmax.f32 %v4140_v29, 1e-05  ;;  %v4066_v7 = vpop.permute.xlu1 %4065  ;;  %4461 = vrot.lane.b32.xlu0 %v4251_v10, %s5377_s17  ;;  %v4244_v47 = vsel %vm4242_vm10, %v4243_v24, %v4241_v56  ;;  %v4260_v25 = vmul.f32 %v5264_v35, %v8296_v37 }
 0x70b   : > { %vm4268_vm1 = vcmp.eq.f32.partialorder %v8332_v42, inf  ;;  %5275 = vrsqrt.f32 %v8378_v62  ;;  %v4143_v12 = vsub.f32 %v8189_v15, %v4066_v7  ;;  %4459 = vrot.lane.b32.xlu1 %v4244_v47, %s5377_s17  ;;  %v4064_v0 = vpop.permute.xlu0 %4063  ;;  %v4253_v6 = vmul.f32 %v5266_v49, %v8304_v2 }
 0x70c   : > { %vm4270_vm2 = vcmp.eq.f32.partialorder %v8332_v42, 0.0  ;;  %5277 = vrsqrt.f32 %v8386_v63  ;;  %v4142_v21 = vsub.f32 %v8175_v5, %v4064_v0  ;;  %v4262_v11 = vsel %vm4261_vm11, %v8296_v37, %v4260_v25 }
 0x70d   : > { %v4271_v18 = vand.u32 2147483648, %v8332_v42  ;;  %v5268_v54 = vpop.eup %5267  ;;  %v8404_v45 = vmax.f32 %v4143_v12, 1e-05  ;;  %v4265_v15 = vsel %vm4263_vm12, %v4264_v36, %v4262_v11  ;;  %v4255_v22 = vsel %vm4254_vm13, %v8304_v2, %v4253_v6 }
 0x70e   : > { %vm4289_vm3 = vcmp.eq.f32.partialorder %v8352_v14, inf  ;;  %v5270_v41 = vpop.eup %5269  ;;  %v8412_v5 = vmax.f32 %v4142_v21, 1e-05  ;;  %v4070_v19 = vpop.permute.xlu1 %4069  ;;  %4465 = vrot.lane.b32.xlu0 %v4265_v15, %s5377_s17  ;;  %v4258_v50 = vsel %vm4256_vm14, %v4257_v28, %v4255_v22  ;;  %v4274_v33 = vmul.f32 %v5268_v54, %v8324_v38 }
 0x70f   : > { %vm4291_vm5 = vcmp.eq.f32.partialorder %v8352_v14, 0.0  ;;  %5279 = vrsqrt.f32 %v8404_v45  ;;  %v4145_v37 = vsub.f32 %v8199_v46, %v4070_v19  ;;  %4463 = vrot.lane.b32.xlu1 %v4258_v50, %s5377_s17  ;;  %v4068_v24 = vpop.permute.xlu0 %4067  ;;  %v4267_v59 = vmul.f32 %v5270_v41, %v8332_v42 }
 0x710   : > { %v4292_v4 = vand.u32 2147483648, %v8352_v14  ;;  %5281 = vrsqrt.f32 %v8412_v5  ;;  %v4144_v2 = vsub.f32 %v8185_v58, %v4068_v24  ;;  %v4276_v16 = vsel %vm4275_vm15, %v8324_v38, %v4274_v33 }
 0x711   : > { %vm4282_vm6 = vcmp.eq.f32.partialorder %v8360_v40, inf  ;;  %v5272_v36 = vpop.eup %5271  ;;  %v8430_v32 = vmax.f32 %v4145_v37, 1e-05  ;;  %v4279_v46 = vsel %vm4277_vm0, %v4278_v27, %v4276_v16  ;;  %v4269_v26 = vsel %vm4268_vm1, %v8332_v42, %v4267_v59 }
 0x712   : > { %vm4284_vm7 = vcmp.eq.f32.partialorder %v8360_v40, 0.0  ;;  %v5274_v8 = vpop.eup %5273  ;;  %v8438_v58 = vmax.f32 %v4144_v2, 1e-05  ;;  %v4074_v9 = vpop.permute.xlu1 %4073  ;;  %4469 = vrot.lane.b32.xlu0 %v4279_v46, %s5377_s17  ;;  %v4272_v48 = vsel %vm4270_vm2, %v4271_v18, %v4269_v26  ;;  %v4288_v31 = vmul.f32 %v5272_v36, %v8352_v14 }
 0x713   : > { %v4285_v38 = vand.u32 2147483648, %v8360_v40  ;;  %5283 = vrsqrt.f32 %v8430_v32  ;;  %v4147_v44 = vsub.f32 %v8208_v17, %v4074_v9  ;;  %4467 = vrot.lane.b32.xlu1 %v4272_v48, %s5377_s17  ;;  %v4072_v3 = vpop.permute.xlu0 %4071  ;;  %v4281_v13 = vmul.f32 %v5274_v8, %v8360_v40 }
 0x714   : > { %vm4303_vm8 = vcmp.eq.f32.partialorder %v8378_v62, inf  ;;  %5285 = vrsqrt.f32 %v8438_v58  ;;  %v4146_v42 = vsub.f32 %v8193_v30, %v4072_v3  ;;  %v4290_v28 = vsel %vm4289_vm3, %v8352_v14, %v4288_v31 }
 0x715   : > { %vm4305_vm9 = vcmp.eq.f32.partialorder %v8378_v62, 0.0  ;;  %v5276_v39 = vpop.eup %5275  ;;  %v8456_v53 = vmax.f32 %v4147_v44, 1e-05  ;;  %v4293_v17 = vsel %vm4291_vm5, %v4292_v4, %v4290_v28  ;;  %v4283_v51 = vsel %vm4282_vm6, %v8360_v40, %v4281_v13 }
 0x716   : > { %v4306_v29 = vand.u32 2147483648, %v8378_v62  ;;  %v5278_v52 = vpop.eup %5277  ;;  %v8464_v30 = vmax.f32 %v4146_v42, 1e-05  ;;  %v4078_v35 = vpop.permute.xlu1 %4077  ;;  %4473 = vrot.lane.b32.xlu0 %v4293_v17, %s5377_s17  ;;  %v4286_v10 = vsel %vm4284_vm7, %v4285_v38, %v4283_v51  ;;  %v4302_v56 = vmul.f32 %v5276_v39, %v8378_v62 }
 0x717   : > { %vm4296_vm10 = vcmp.eq.f32.partialorder %v8386_v63, inf  ;;  %5287 = vrsqrt.f32 %v8456_v53  ;;  %v4149_v14 = vsub.f32 %v8217_v60, %v4078_v35  ;;  %4471 = vrot.lane.b32.xlu1 %v4286_v10, %s5377_s17  ;;  %v4076_v27 = vpop.permute.xlu0 %4075  ;;  %v4295_v49 = vmul.f32 %v5278_v52, %v8386_v63 }
 0x718   : > { %vm4298_vm11 = vcmp.eq.f32.partialorder %v8386_v63, 0.0  ;;  %5289 = vrsqrt.f32 %v8464_v30  ;;  %v4148_v40 = vsub.f32 %v8203_v34, %v4076_v27  ;;  %v4304_v7 = vsel %vm4303_vm8, %v8378_v62, %v4302_v56 }
 0x719   : > { %v4299_v47 = vand.u32 2147483648, %v8386_v63  ;;  %v5280_v25 = vpop.eup %5279  ;;  %v8482_v12 = vmax.f32 %v4149_v14, 1e-05  ;;  %v4307_v60 = vsel %vm4305_vm9, %v4306_v29, %v4304_v7  ;;  %v4297_v0 = vsel %vm4296_vm10, %v8386_v63, %v4295_v49 }
 0x71a   : > { %vm4317_vm12 = vcmp.eq.f32.partialorder %v8404_v45, inf  ;;  %v5282_v6 = vpop.eup %5281  ;;  %v8488_v21 = vmax.f32 %v4148_v40, 1e-05  ;;  %v4082_v34 = vpop.permute.xlu1 %4081  ;;  %4477 = vrot.lane.b32.xlu0 %v4307_v60, %s5377_s17  ;;  %v4316_v18 = vmul.f32 %v5280_v25, %v8404_v45  ;;  %vm4319_vm13 = vcmp.eq.f32.partialorder %v8404_v45, 0.0 }
 0x71b   : > { %v4300_v11 = vsel %vm4298_vm11, %v4299_v47, %v4297_v0  ;;  %5291 = vrsqrt.f32 %v8482_v12  ;;  %v4151_v62 = vsub.f32 %v8225_v1, %v4082_v34  ;;  %v4080_v63 = vpop.permute.xlu0 %4079  ;;  %v4320_v54 = vand.u32 2147483648, %v8404_v45 }
 0x71c   : > { %4475 = vrot.lane.b32.xlu1 %v4300_v11, %s5377_s17  ;;  %v4309_v15 = vmul.f32 %v5282_v6, %v8412_v5  ;;  %5293 = vrsqrt.f32 %v8488_v21  ;;  %v4150_v22 = vsub.f32 %v8212_v43, %v4080_v63  ;;  %v4318_v41 = vsel %vm4317_vm12, %v8404_v45, %v4316_v18 }
 0x71d   : > { %vm4310_vm14 = vcmp.eq.f32.partialorder %v8412_v5, inf  ;;  %v5284_v19 = vpop.eup %5283  ;;  %v8504_v50 = vmax.f32 %v4151_v62, 1e-05  ;;  %v4321_v1 = vsel %vm4319_vm13, %v4320_v54, %v4318_v41  ;;  %vm4312_vm15 = vcmp.eq.f32.partialorder %v8412_v5, 0.0 }
 0x71e   : > { %v4311_v33 = vsel %vm4310_vm14, %v8412_v5, %v4309_v15  ;;  %v5286_v37 = vpop.eup %5285  ;;  %v8508_v24 = vmax.f32 %v4150_v22, 1e-05  ;;  %v4086_v59 = vpop.permute.xlu1 %4085  ;;  %4481 = vrot.lane.b32.xlu0 %v4321_v1, %s5377_s17  ;;  %v4313_v43 = vand.u32 2147483648, %v8412_v5  ;;  %v4330_v45 = vmul.f32 %v5284_v19, %v8430_v32 }
 0x71f   : > { %vm4331_vm0 = vcmp.eq.f32.partialorder %v8430_v32, inf  ;;  %5295 = vrsqrt.f32 %v8504_v50  ;;  %v4153_v4 = vsub.f32 %v8235_v61, %v4086_v59  ;;  %v4084_v2 = vpop.permute.xlu0 %4083  ;;  %vm4333_vm1 = vcmp.eq.f32.partialorder %v8430_v32, 0.0 }
 0x720   : > { %v4334_v16 = vand.u32 2147483648, %v8430_v32  ;;  %5297 = vrsqrt.f32 %v8508_v24  ;;  %v4314_v36 = vsel %vm4312_vm15, %v4313_v43, %v4311_v33  ;;  %v4152_v46 = vsub.f32 %v8221_v23, %v4084_v2 }
 0x721   : > { %v4332_v5 = vsel %vm4331_vm0, %v8430_v32, %v4330_v45  ;;  %v5288_v26 = vpop.eup %5287  ;;  %v8521_v8 = vmax.f32 %v4153_v4, 1e-05  ;;  %4479 = vrot.lane.b32.xlu1 %v4314_v36, %s5377_s17  ;;  %v4323_v61 = vmul.f32 %v5286_v37, %v8438_v58  ;;  %vm4324_vm2 = vcmp.eq.f32.partialorder %v8438_v58, inf }
 0x722   : > { %v4335_v9 = vsel %vm4333_vm1, %v4334_v16, %v4332_v5  ;;  %v5290_v48 = vpop.eup %5289  ;;  %v8526_v31 = vmax.f32 %v4152_v46, 1e-05  ;;  %v4090_v38 = vpop.permute.xlu1 %4089  ;;  %vm4326_vm3 = vcmp.eq.f32.partialorder %v8438_v58, 0.0  ;;  %v4327_v23 = vand.u32 2147483648, %v8438_v58 }
 0x723   : > { %4485 = vrot.lane.b32.xlu0 %v4335_v9, %s5377_s17  ;;  %v4344_v32 = vmul.f32 %v5288_v26, %v8456_v53  ;;  %5299 = vrsqrt.f32 %v8521_v8  ;;  %v4155_v44 = vsub.f32 %v8245_v57, %v4090_v38  ;;  %v4325_v3 = vsel %vm4324_vm2, %v8438_v58, %v4323_v61  ;;  %v4088_v13 = vpop.permute.xlu0 %4087 }
 0x724   : > { %vm4345_vm5 = vcmp.eq.f32.partialorder %v8456_v53, inf  ;;  %5301 = vrsqrt.f32 %v8526_v31  ;;  %v4328_v42 = vsel %vm4326_vm3, %v4327_v23, %v4325_v3  ;;  %v4154_v28 = vsub.f32 %v8231_v55, %v4088_v13 }
 0x725   : > { %v4346_v39 = vsel %vm4345_vm5, %v8456_v53, %v4344_v32  ;;  %v5292_v17 = vpop.eup %5291  ;;  %v8539_v51 = vmax.f32 %v4155_v44, 1e-05  ;;  %4483 = vrot.lane.b32.xlu1 %v4328_v42, %s5377_s17  ;;  %vm4347_vm6 = vcmp.eq.f32.partialorder %v8456_v53, 0.0  ;;  %v4348_v57 = vand.u32 2147483648, %v8456_v53 }
 0x726   : > { %v4337_v58 = vmul.f32 %v5290_v48, %v8464_v30  ;;  %v5294_v29 = vpop.eup %5293  ;;  %v8545_v52 = vmax.f32 %v4154_v28, 1e-05  ;;  %v3896_v35 = vpop.permute.xlu1 %3895  ;;  %vm4338_vm7 = vcmp.eq.f32.partialorder %v8464_v30, inf  ;;  %vm4340_vm8 = vcmp.eq.f32.partialorder %v8464_v30, 0.0 }
 0x727   : > { %v4341_v55 = vand.u32 2147483648, %v8464_v30  ;;  %5303 = vrsqrt.f32 %v8539_v51  ;;  %3962 = vst.msk [vmem:[%s5544_s7 + $0xe8] sm:$0xff] %vm2069_vm4, %v3896_v35  ;;  %v4349_v10 = vsel %vm4347_vm6, %v4348_v57, %v4346_v39  ;;  %v4092_v53 = vpop.permute.xlu0 %4091  ;;  %v4358_v14 = vmul.f32 %v5292_v17, %v8482_v12 }
 0x728   : > { %v4339_v56 = vsel %vm4338_vm7, %v8464_v30, %v4337_v58  ;;  %5305 = vrsqrt.f32 %v8545_v52  ;;  %4489 = vrot.lane.b32.xlu0 %v4349_v10, %s5377_s17  ;;  %v4156_v49 = vsub.f32 %v8239_v20, %v4092_v53  ;;  %vm4359_vm9 = vcmp.eq.f32.partialorder %v8482_v12, inf }
 0x729   : > { %v4342_v27 = vsel %vm4340_vm8, %v4341_v55, %v4339_v56  ;;  %v5296_v40 = vpop.eup %5295  ;;  %v4360_v7 = vsel %vm4359_vm9, %v8482_v12, %v4358_v14  ;;  %v4362_v30 = vand.u32 2147483648, %v8482_v12  ;;  %v4351_v47 = vmul.f32 %v5294_v29, %v8488_v21 }
 0x72a   : > { %4487 = vrot.lane.b32.xlu1 %v4342_v27, %s5377_s17  ;;  %v5298_v25 = vpop.eup %5297  ;;  %v8563_v60 = vmax.f32 %v4156_v49, 1e-05  ;;  %v3900_v0 = vpop.permute.xlu1 %3899  ;;  %vm4361_vm10 = vcmp.eq.f32.partialorder %v8482_v12, 0.0  ;;  %vm4352_vm11 = vcmp.eq.f32.partialorder %v8488_v21, inf  ;;  %v4355_v20 = vand.u32 2147483648, %v8488_v21 }
 0x72b   : > { %3964 = vst.msk [vmem:[%s5544_s7 + $0xf8] sm:$0xff] %vm2069_vm4, %v3900_v0  ;;  %v4363_v6 = vsel %vm4361_vm10, %v4362_v30, %v4360_v7  ;;  %v4353_v34 = vsel %vm4352_vm11, %v8488_v21, %v4351_v47  ;;  %vm4354_vm12 = vcmp.eq.f32.partialorder %v8488_v21, 0.0  ;;  %v3898_v11 = vpop.permute.xlu0 %3897  ;;  %v4372_v18 = vmul.f32 %v5296_v40, %v8504_v50 }
 0x72c   : > { %5307 = vrsqrt.f32 %v8563_v60  ;;  %4493 = vrot.lane.b32.xlu0 %v4363_v6, %s5377_s17  ;;  %v4356_v62 = vsel %vm4354_vm12, %v4355_v20, %v4353_v34  ;;  %3963 = vst.msk [vmem:[%s5544_s7 + $0xf0] sm:$0xff] %vm2069_vm4, %v3898_v11  ;;  %vm4373_vm13 = vcmp.eq.f32.partialorder %v8504_v50, inf  ;;  %v4376_v12 = vand.u32 2147483648, %v8504_v50 }
 0x72d   : > { %v5300_v63 = vpop.eup %5299  ;;  %v4374_v54 = vsel %vm4373_vm13, %v8504_v50, %v4372_v18  ;;  %vm4375_vm14 = vcmp.eq.f32.partialorder %v8504_v50, 0.0  ;;  %v4365_v21 = vmul.f32 %v5298_v25, %v8508_v24  ;;  %vm4366_vm15 = vcmp.eq.f32.partialorder %v8508_v24, inf }
 0x72e   : > { %4491 = vrot.lane.b32.xlu1 %v4356_v62, %s5377_s17  ;;  %v5302_v15 = vpop.eup %5301  ;;  %v4377_v22 = vsel %vm4375_vm14, %v4376_v12, %v4374_v54  ;;  %vm4368_vm0 = vcmp.eq.f32.partialorder %v8508_v24, 0.0  ;;  %v4369_v41 = vand.u32 2147483648, %v8508_v24  ;;  %v4386_v19 = vmul.f32 %v5300_v63, %v8521_v8 }
 0x72f   : > { %v4367_v1 = vsel %vm4366_vm15, %v8508_v24, %v4365_v21  ;;  %vm4387_vm1 = vcmp.eq.f32.partialorder %v8521_v8, inf  ;;  %v4390_v33 = vand.u32 2147483648, %v8521_v8  ;;  %v4379_v50 = vmul.f32 %v5302_v15, %v8526_v31 }
 0x730   : > { %4497 = vrot.lane.b32.xlu0 %v4377_v22, %s5377_s17  ;;  %v4370_v37 = vsel %vm4368_vm0, %v4369_v41, %v4367_v1  ;;  %v4388_v59 = vsel %vm4387_vm1, %v8521_v8, %v4386_v19  ;;  %vm4389_vm2 = vcmp.eq.f32.partialorder %v8521_v8, 0.0  ;;  %vm4380_vm3 = vcmp.eq.f32.partialorder %v8526_v31, inf }
 0x731   : > { %v5304_v43 = vpop.eup %5303  ;;  %v4391_v45 = vsel %vm4389_vm2, %v4390_v33, %v4388_v59  ;;  %v4381_v24 = vsel %vm4380_vm3, %v8526_v31, %v4379_v50  ;;  %v4383_v4 = vand.u32 2147483648, %v8526_v31  ;;  %vm4382_vm5 = vcmp.eq.f32.partialorder %v8526_v31, 0.0 }
 0x732   : > { %4495 = vrot.lane.b32.xlu1 %v4370_v37, %s5377_s17  ;;  %v5306_v2 = vpop.eup %5305  ;;  %v4400_v16 = vmul.f32 %v5304_v43, %v8539_v51  ;;  %vm4401_vm6 = vcmp.eq.f32.partialorder %v8539_v51, inf  ;;  %v4404_v46 = vand.u32 2147483648, %v8539_v51  ;;  %vm4403_vm7 = vcmp.eq.f32.partialorder %v8539_v51, 0.0 }
 0x733   : > { %v4384_v36 = vsel %vm4382_vm5, %v4383_v4, %v4381_v24  ;;  %v4393_v5 = vmul.f32 %v5306_v2, %v8545_v52  ;;  %vm4394_vm8 = vcmp.eq.f32.partialorder %v8545_v52, inf  ;;  %v4397_v8 = vand.u32 2147483648, %v8545_v52 }
 0x734   : > { %4501 = vrot.lane.b32.xlu0 %v4391_v45, %s5377_s17  ;;  %v4402_v26 = vsel %vm4401_vm6, %v8539_v51, %v4400_v16  ;;  %vm4396_vm9 = vcmp.eq.f32.partialorder %v8545_v52, 0.0  ;;  %vm4408_vm10 = vcmp.eq.f32.partialorder %v8563_v60, inf  ;;  %v4411_v23 = vand.u32 2147483648, %v8563_v60 }
 0x735   : > { %v4405_v9 = vsel %vm4403_vm7, %v4404_v46, %v4402_v26  ;;  %v4395_v61 = vsel %vm4394_vm8, %v8545_v52, %v4393_v5  ;;  %vm4410_vm11 = vcmp.eq.f32.partialorder %v8563_v60, 0.0 }
 0x736   : > { %4499 = vrot.lane.b32.xlu1 %v4384_v36, %s5377_s17  ;;  %v5308_v48 = vpop.eup %5307  ;;  %v4398_v31 = vsel %vm4396_vm9, %v4397_v8, %v4395_v61 }
 0x737   : > { %v4407_v38 = vmul.f32 %v5308_v48, %v8563_v60 }
 0x738   : > { %4505 = vrot.lane.b32.xlu0 %v4405_v9, %s5377_s17 }
 0x739   : > { %v4409_v32 = vsel %vm4408_vm10, %v8563_v60, %v4407_v38 }
 0x73a   : > { %4503 = vrot.lane.b32.xlu1 %v4398_v31, %s5377_s17  ;;  %v4412_v44 = vsel %vm4410_vm11, %v4411_v23, %v4409_v32 }
 0x73e   : > { %4507 = vrot.lane.b32.xlu1 %v4412_v44, %s5377_s17 }
 0x76c   : > { %v4446_v3 = vpop.permute.xlu0 %4445 }
 0x76d   : > { %4541 = vst.msk [vmem:[%s5549_s10] sm:$0xff] %vm2069_vm4, %v4446_v3 }
 0x770   : > { %v4450_v13 = vpop.permute.xlu0 %4449 }
 0x771   : > { %v4448_v42 = vpop.permute.xlu1 %4447  ;;  %4543 = vst.msk [vmem:[%s5549_s10 + $0x10] sm:$0xff] %vm2069_vm4, %v4450_v13 }
 0x772   : > { %4542 = vst.msk [vmem:[%s5549_s10 + $0x8] sm:$0xff] %vm2069_vm4, %v4448_v42 }
 0x774   : > { %v4454_v28 = vpop.permute.xlu0 %4453 }
 0x775   : > { %v4452_v39 = vpop.permute.xlu1 %4451  ;;  %4545 = vst.msk [vmem:[%s5549_s10 + $0x20] sm:$0xff] %vm2069_vm4, %v4454_v28 }
 0x776   : > { %4544 = vst.msk [vmem:[%s5549_s10 + $0x18] sm:$0xff] %vm2069_vm4, %v4452_v39 }
 0x778   : > { %v4458_v17 = vpop.permute.xlu0 %4457 }
 0x779   : > { %v4456_v51 = vpop.permute.xlu1 %4455  ;;  %4547 = vst.msk [vmem:[%s5549_s10 + $0x30] sm:$0xff] %vm2069_vm4, %v4458_v17 }
 0x77a   : > { %4546 = vst.msk [vmem:[%s5549_s10 + $0x28] sm:$0xff] %vm2069_vm4, %v4456_v51 }
 0x77c   : > { %v4462_v57 = vpop.permute.xlu0 %4461 }
 0x77d   : > { %v4460_v58 = vpop.permute.xlu1 %4459  ;;  %4549 = vst.msk [vmem:[%s5549_s10 + $0x40] sm:$0xff] %vm2069_vm4, %v4462_v57 }
 0x77e   : > { %4548 = vst.msk [vmem:[%s5549_s10 + $0x38] sm:$0xff] %vm2069_vm4, %v4460_v58 }
 0x780   : > { %v4466_v29 = vpop.permute.xlu0 %4465 }
 0x781   : > { %v4464_v52 = vpop.permute.xlu1 %4463  ;;  %4551 = vst.msk [vmem:[%s5549_s10 + $0x50] sm:$0xff] %vm2069_vm4, %v4466_v29 }
 0x782   : > { %4550 = vst.msk [vmem:[%s5549_s10 + $0x48] sm:$0xff] %vm2069_vm4, %v4464_v52 }
 0x784   : > { %v4470_v35 = vpop.permute.xlu0 %4469 }
 0x785   : > { %v4468_v55 = vpop.permute.xlu1 %4467  ;;  %4553 = vst.msk [vmem:[%s5549_s10 + $0x60] sm:$0xff] %vm2069_vm4, %v4470_v35 }
 0x786   : > { %4552 = vst.msk [vmem:[%s5549_s10 + $0x58] sm:$0xff] %vm2069_vm4, %v4468_v55 }
 0x788   : > { %v4474_v10 = vpop.permute.xlu0 %4473 }
 0x789   : > { %v4472_v56 = vpop.permute.xlu1 %4471  ;;  %4555 = vst.msk [vmem:[%s5549_s10 + $0x70] sm:$0xff] %vm2069_vm4, %v4474_v10 }
 0x78a   : > { %4554 = vst.msk [vmem:[%s5549_s10 + $0x68] sm:$0xff] %vm2069_vm4, %v4472_v56 }
 0x78c   : > { %v4478_v53 = vpop.permute.xlu0 %4477 }
 0x78d   : > { %4557 = vst.msk [vmem:[%s5549_s10 + $0x80] sm:$0xff] %vm2069_vm4, %v4478_v53 }
 0x78e   : > { %v4476_v14 = vpop.permute.xlu1 %4475 }
 0x78f   : > { %4556 = vst.msk [vmem:[%s5549_s10 + $0x78] sm:$0xff] %vm2069_vm4, %v4476_v14 }
 0x790   : > { %v4482_v27 = vpop.permute.xlu0 %4481 }
 0x791   : > { %4559 = vst.msk [vmem:[%s5549_s10 + $0x90] sm:$0xff] %vm2069_vm4, %v4482_v27 }
 0x793   : > { %v4480_v49 = vpop.permute.xlu1 %4479 }
 0x794   : > { %4558 = vst.msk [vmem:[%s5549_s10 + $0x88] sm:$0xff] %vm2069_vm4, %v4480_v49 }
 0x795   : > { %v4486_v40 = vpop.permute.xlu0 %4485 }
 0x796   : > { %4561 = vst.msk [vmem:[%s5549_s10 + $0xa0] sm:$0xff] %vm2069_vm4, %v4486_v40 }
 0x797   : > { %v4484_v7 = vpop.permute.xlu1 %4483 }
 0x798   : > { %4560 = vst.msk [vmem:[%s5549_s10 + $0x98] sm:$0xff] %vm2069_vm4, %v4484_v7 }
 0x79a   : > { %v4490_v30 = vpop.permute.xlu0 %4489 }
 0x79b   : > { %4563 = vst.msk [vmem:[%s5549_s10 + $0xb0] sm:$0xff] %vm2069_vm4, %v4490_v30 }
 0x79c   : > { %v4488_v47 = vpop.permute.xlu1 %4487 }
 0x79d   : > { %4562 = vst.msk [vmem:[%s5549_s10 + $0xa8] sm:$0xff] %vm2069_vm4, %v4488_v47 }
 0x79e   : > { %v4494_v25 = vpop.permute.xlu0 %4493 }
 0x79f   : > { %4565 = vst.msk [vmem:[%s5549_s10 + $0xc0] sm:$0xff] %vm2069_vm4, %v4494_v25 }
 0x7a0   : > { %v4492_v60 = vpop.permute.xlu1 %4491 }
 0x7a1   : > { %4564 = vst.msk [vmem:[%s5549_s10 + $0xb8] sm:$0xff] %vm2069_vm4, %v4492_v60 }
 0x7a2   : > { %v4498_v0 = vpop.permute.xlu0 %4497 }
 0x7a3   : > { %4567 = vst.msk [vmem:[%s5549_s10 + $0xd0] sm:$0xff] %vm2069_vm4, %v4498_v0 }
 0x7a4   : > { %v4496_v20 = vpop.permute.xlu1 %4495 }
 0x7a5   : > { %4566 = vst.msk [vmem:[%s5549_s10 + $0xc8] sm:$0xff] %vm2069_vm4, %v4496_v20 }
 0x7a6   : > { %v4502_v6 = vpop.permute.xlu0 %4501 }
 0x7a7   : > { %4569 = vst.msk [vmem:[%s5549_s10 + $0xe0] sm:$0xff] %vm2069_vm4, %v4502_v6 }
 0x7a8   : > { %v4500_v34 = vpop.permute.xlu1 %4499 }
 0x7a9   : > { %4568 = vst.msk [vmem:[%s5549_s10 + $0xd8] sm:$0xff] %vm2069_vm4, %v4500_v34 }
 0x7aa   : > { %v4506_v11 = vpop.permute.xlu0 %4505 }
 0x7ab   : > { %4571 = vst.msk [vmem:[%s5549_s10 + $0xf0] sm:$0xff] %vm2069_vm4, %v4506_v11 }
 0x7ac   : > { %v4504_v18 = vpop.permute.xlu1 %4503 }
 0x7ad   : > { %4570 = vst.msk [vmem:[%s5549_s10 + $0xe8] sm:$0xff] %vm2069_vm4, %v4504_v18 }
 0x7b0   : > { %v4508_v62 = vpop.permute.xlu1 %4507 }
 0x7b1   : > { %4572 = vst.msk [vmem:[%s5549_s10 + $0xf8] sm:$0xff] %vm2069_vm4, %v4508_v62 }
 0x7b2 PF: > { %s16_s24 = sadd.s32 1, %s5363_s24   ;;  %s9207_s18 = smov %s5343_s19 }
 0x7b3   : > { %p13_p13 = scmp.ge.s32.totalorder %s16_s24, 6   ;;  %s9208_s19 = smov %s5459_s6 }
 0x7b4   : > { %s9209_s20 = smov %s5355_s22  ;;  %s9210_s21 = smov %s5359_s23 }
 0x7b5   : > { %s9211_s22 = smov %s9214_s25  ;;  %s9212_s23 = smov %s9218_s26 }
 0x7b6   :  { %15 = sbr.rel (!%p13_p13) target bundleno = 4 (0x4), region = 129 }

</bundles_post_ra>
